<compile_context>
chip_gen: v7x
topology: tpu7x:2x2x1
jax: 0.10.0
libtpu: 0.0.40
codegen_flags: <defaults>
</compile_context>

<pallas_src>
from functools import partial

import jax
import jax.numpy as jnp
from jax.experimental import pallas as pl
from jax.experimental.pallas import tpu as pltpu

_BN_EPS = 1e-5


# ----------------------------------------------------------------------------
# In-kernel helpers
# ----------------------------------------------------------------------------
def _bn_two_view(y, n, gamma=None, beta=None):
    """BatchNorm1d (training-mode batch stats, biased var) applied independently
    to the two stacked views (rows [0:n) and [n:2n)) — matches two separate
    PyTorch forward passes.  No slice/concat: reshape (2n, C) -> (2, n, C) and
    reduce over axis=1 (n is sublane-aligned, so the reshape is layout-cheap).
    Two-pass (centered) variance avoids E[y^2]-E[y]^2 cancellation."""
    c = y.shape[-1]
    h = y.reshape(2, n, c)
    mean = jnp.mean(h, axis=1, keepdims=True)
    centered = h - mean
    var = jnp.mean(centered * centered, axis=1, keepdims=True)
    h = centered * jax.lax.rsqrt(var + _BN_EPS)
    h = h.reshape(2 * n, c)
    if gamma is not None:
        h = h * gamma + beta
    return h


def _pair_loss_sum(q, k, inv_t):
    """Un-normalized sum_i CE(logits_i, label=i) for logits = (q/T) k^T.
    Returns a (1, 1) f32 block."""
    # F.normalize(x, dim=1): x / max(||x||, 1e-12)  ->  x * rsqrt(max(||x||^2, 1e-24))
    qn = q * jax.lax.rsqrt(jnp.maximum(jnp.sum(q * q, axis=1, keepdims=True), 1e-24))
    kn = k * jax.lax.rsqrt(jnp.maximum(jnp.sum(k * k, axis=1, keepdims=True), 1e-24))
    qn = qn * inv_t  # fold 1/T into q instead of dividing the NxN logits
    # diag(logits) via a rowwise dot: (N, dim) mul + reduce, no NxN iota/where.
    target = jnp.sum(qn * kn, axis=1, keepdims=True)
    logits = jnp.einsum(
        "nc,mc->nm", qn.astype(jnp.bfloat16), kn.astype(jnp.bfloat16),
        preferred_element_type=jnp.float32)
    row_max = jnp.max(logits, axis=1, keepdims=True)
    lse = jnp.log(jnp.sum(jnp.exp(logits - row_max), axis=1, keepdims=True)) + row_max
    return jnp.sum(lse - target, keepdims=True)  # (1, 1)


# ----------------------------------------------------------------------------
# Single fused MoCo forward kernel (EMA update + both encoders + predictor + loss)
# ----------------------------------------------------------------------------
def _moco_forward_kernel(
        x_ref,
        bb_w_ref, bp_w1_ref, bp_g1_ref, bp_b1_ref, bp_w2_ref,   # base encoder (f32)
        mb_w_ref, mp_w1_ref, mp_g1_ref, mp_b1_ref, mp_w2_ref,   # momentum encoder (f32, aliased)
        pr_w1_ref, pr_g1_ref, pr_b1_ref, pr_w2_ref,             # predictor
        m_ref,                                                   # EMA momentum (SMEM scalar)
        loss_ref,
        mb_w_out, mp_w1_out, mp_g1_out, mp_b1_out, mp_w2_out,   # updated momentum params (aliased)
        *, n, temperature):
    x = x_ref[...]  # (2n, feat) bf16, rows [0:n)=view1, [n:2n)=view2

    # ---- momentum EMA update (f32), written back to the aliased outputs ----
    m = m_ref[0]
    one_minus_m = 1.0 - m

    def ema(mom_ref, base_ref, out_ref):
        new = mom_ref[...] * m + base_ref[...] * one_minus_m
        out_ref[...] = new
        return new

    mb_w = ema(mb_w_ref, bb_w_ref, mb_w_out)
    mp_w1 = ema(mp_w1_ref, bp_w1_ref, mp_w1_out)
    mp_g1 = ema(mp_g1_ref, bp_g1_ref, mp_g1_out)
    mp_b1 = ema(mp_b1_ref, bp_b1_ref, mp_b1_out)
    mp_w2 = ema(mp_w2_ref, bp_w2_ref, mp_w2_out)

    def encode(w_back, w1, g1, b1, w2):
        # backbone: Linear(no bias) + ReLU
        h = jnp.dot(x, w_back.astype(jnp.bfloat16), preferred_element_type=jnp.float32)
        h = jnp.maximum(h, 0.0)
        # projector layer 1: Linear -> BN(affine) -> ReLU
        y = jnp.dot(h.astype(jnp.bfloat16), w1.astype(jnp.bfloat16),
                    preferred_element_type=jnp.float32)
        y = jnp.maximum(_bn_two_view(y, n, g1, b1), 0.0)
        # projector layer 2: Linear -> BN(affine=False)
        z = jnp.dot(y.astype(jnp.bfloat16), w2.astype(jnp.bfloat16),
                    preferred_element_type=jnp.float32)
        return _bn_two_view(z, n)

    def predict(z):
        y = jnp.dot(z.astype(jnp.bfloat16), pr_w1_ref[...],
                    preferred_element_type=jnp.float32)
        y = jnp.maximum(_bn_two_view(y, n, pr_g1_ref[...], pr_b1_ref[...]), 0.0)
        return jnp.dot(y.astype(jnp.bfloat16), pr_w2_ref[...],
                       preferred_element_type=jnp.float32)

    q = predict(encode(bb_w_ref[...], bp_w1_ref[...], bp_g1_ref[...],
                       bp_b1_ref[...], bp_w2_ref[...]))
    k = encode(mb_w, mp_w1, mp_g1, mp_b1, mp_w2)   # uses the UPDATED momentum params

    q1, q2 = q[:n], q[n:]
    k1, k2 = k[:n], k[n:]
    inv_t = 1.0 / temperature
    loss_sum = _pair_loss_sum(q1, k2, inv_t) + _pair_loss_sum(q2, k1, inv_t)
    # CrossEntropyLoss mean over N, times 2*T, summed over the two pairs.
    loss_ref[...] = loss_sum * (2.0 * temperature / n)


# ----------------------------------------------------------------------------
# Parameter init (deterministic, synthetic) and model glue
# ----------------------------------------------------------------------------
def _randn(key, shape, scale=0.05):
    return scale * jax.random.normal(key, shape, dtype=jnp.float32)


def init_encoder_params(key, feat_dim, hidden_dim, mlp_dim, dim):
    k0, k1, k2 = jax.random.split(key, 3)
    return {
        # synthetic backbone trunk (stand-in for ResNet): Linear(no bias) + ReLU
        "backbone_w": _randn(k0, (feat_dim, hidden_dim)),
        # projector = _build_mlp(2, hidden_dim, mlp_dim, dim)
        "proj_w1": _randn(k1, (hidden_dim, mlp_dim)),
        "proj_g1": jnp.ones((1, mlp_dim), jnp.float32),
        "proj_b1": jnp.zeros((1, mlp_dim), jnp.float32),
        "proj_w2": _randn(k2, (mlp_dim, dim)),
        # final BN has affine=False -> no params
    }


def init_predictor_params(key, dim, mlp_dim):
    k0, k1 = jax.random.split(key, 2)
    return {
        # predictor = _build_mlp(2, dim, mlp_dim, dim, last_bn=False)
        "pred_w1": _randn(k0, (dim, mlp_dim)),
        "pred_g1": jnp.ones((1, mlp_dim), jnp.float32),
        "pred_b1": jnp.zeros((1, mlp_dim), jnp.float32),
        "pred_w2": _randn(k1, (mlp_dim, dim)),
    }


_MOM_KEYS = ("backbone_w", "proj_w1", "proj_g1", "proj_b1", "proj_w2")


@partial(jax.jit, static_argnames=("temperature",))
def moco_forward(base_params, momentum_params, pred_params, x1, x2, m, temperature):
    n = x1.shape[0]
    # Batch both views into one (2N, feat) slab -> single M=2N matmul per layer,
    # weights DMA'd once; bf16 activations at the kernel boundary (f32 accum inside).
    x = jnp.concatenate([x1.reshape(n, -1), x2.reshape(n, -1)], axis=0).astype(jnp.bfloat16)
    m_arr = jnp.asarray(m, jnp.float32).reshape(1)

    args = (
        x,
        base_params["backbone_w"], base_params["proj_w1"],
        base_params["proj_g1"], base_params["proj_b1"], base_params["proj_w2"],
        momentum_params["backbone_w"], momentum_params["proj_w1"],
        momentum_params["proj_g1"], momentum_params["proj_b1"], momentum_params["proj_w2"],
        pred_params["pred_w1"].astype(jnp.bfloat16), pred_params["pred_g1"],
        pred_params["pred_b1"], pred_params["pred_w2"].astype(jnp.bfloat16),
        m_arr,
    )

    vmem = pl.BlockSpec(memory_space=pltpu.MemorySpace.VMEM)
    smem = pl.BlockSpec(memory_space=pltpu.MemorySpace.SMEM)
    in_specs = [vmem] * 15 + [smem]

    mom_out_shapes = tuple(
        jax.ShapeDtypeStruct(momentum_params[k].shape, jnp.float32) for k in _MOM_KEYS)
    out_shape = (jax.ShapeDtypeStruct((1, 1), jnp.float32),) + mom_out_shapes
    out_specs = (vmem,) * len(out_shape)

    kern = partial(_moco_forward_kernel, n=n, temperature=temperature)
    # No grid: single block, everything resident in VMEM for these shapes.
    # Momentum params (inputs 6..10) are aliased to outputs 1..5 so the EMA
    # update is done in-kernel (no wrapper-side HBM passes over the weights).
    results = pl.pallas_call(
        kern,
        out_shape=out_shape,
        in_specs=in_specs,
        out_specs=out_specs,
        input_output_aliases={6: 1, 7: 2, 8: 3, 9: 4, 10: 5},
    )(*args)

    loss = results[0]
    new_momentum = dict(zip(_MOM_KEYS, results[1:]))
    return loss[0, 0], new_momentum


if __name__ == "__main__":
    N, C, H, W = 8, 4, 8, 8                   # small image batch (NCHW)
    hidden_dim, mlp_dim, dim = 256, 256, 256  # lane-dense dims; dim=256 = MoCo default
    T = 1.0
    m = 0.99

    key = jax.random.PRNGKey(0)
    k_enc, k_pred, k_x1, k_x2 = jax.random.split(key, 4)

    base_params = init_encoder_params(k_enc, C * H * W, hidden_dim, mlp_dim, dim)
    # param_m.data.copy_(param_b.data)
    momentum_params = jax.tree.map(lambda p: p, base_params)
    pred_params = init_predictor_params(k_pred, dim, mlp_dim)

    x1 = jax.random.normal(k_x1, (N, C, H, W), dtype=jnp.float32)
    x2 = jax.random.normal(k_x2, (N, C, H, W), dtype=jnp.float32)

    loss, new_momentum = moco_forward(base_params, momentum_params, pred_params,
                                      x1, x2, m, temperature=T)
    jax.block_until_ready(loss)
    assert loss.shape == () and bool(jnp.isfinite(loss))
    assert new_momentum["backbone_w"].shape == base_params["backbone_w"].shape
    print("KERNEL_OK")
</pallas_src>

<mosaic_0001>
module attributes {stable_mosaic.version = 11 : i64} {
  func.func @_moco_forward_kernel(%arg0: memref<16x256xbf16, #tpu.memory_space<vmem>>, %arg1: memref<256x256xf32, #tpu.memory_space<vmem>>, %arg2: memref<256x256xf32, #tpu.memory_space<vmem>>, %arg3: memref<1x256xf32, #tpu.memory_space<vmem>>, %arg4: memref<1x256xf32, #tpu.memory_space<vmem>>, %arg5: memref<256x256xf32, #tpu.memory_space<vmem>>, %arg6: memref<256x256xf32, #tpu.memory_space<vmem>>, %arg7: memref<256x256xf32, #tpu.memory_space<vmem>>, %arg8: memref<1x256xf32, #tpu.memory_space<vmem>>, %arg9: memref<1x256xf32, #tpu.memory_space<vmem>>, %arg10: memref<256x256xf32, #tpu.memory_space<vmem>>, %arg11: memref<256x256xbf16, #tpu.memory_space<vmem>>, %arg12: memref<1x256xf32, #tpu.memory_space<vmem>>, %arg13: memref<1x256xf32, #tpu.memory_space<vmem>>, %arg14: memref<256x256xbf16, #tpu.memory_space<vmem>>, %arg15: memref<1xf32, #tpu.memory_space<smem>>, %arg16: memref<1x1xf32, #tpu.memory_space<vmem>>, %arg17: memref<256x256xf32, #tpu.memory_space<vmem>>, %arg18: memref<256x256xf32, #tpu.memory_space<vmem>>, %arg19: memref<1x256xf32, #tpu.memory_space<vmem>>, %arg20: memref<1x256xf32, #tpu.memory_space<vmem>>, %arg21: memref<256x256xf32, #tpu.memory_space<vmem>>) attributes {dimension_semantics = [], scalar_prefetch = 0 : i64, scratch_operands = 0 : i64, tpu.core_type = #tpu.core_type<tc>} {
    %c0 = arith.constant 0 : index
    %c0_0 = arith.constant 0 : index
    %0 = vector.load %arg0[%c0, %c0_0] : memref<16x256xbf16, #tpu.memory_space<vmem>>, vector<16x256xbf16>
    %c0_1 = arith.constant 0 : index
    %1 = memref.load %arg15[%c0_1] : memref<1xf32, #tpu.memory_space<smem>>
    %cst = arith.constant 1.000000e+00 : f32
    %2 = arith.subf %cst, %1 : f32
    %c0_2 = arith.constant 0 : index
    %c0_3 = arith.constant 0 : index
    %3 = vector.load %arg6[%c0_2, %c0_3] : memref<256x256xf32, #tpu.memory_space<vmem>>, vector<256x256xf32>
    %4 = vector.broadcast %1 : f32 to vector<256x256xf32>
    %5 = arith.mulf %3, %4 : vector<256x256xf32>
    %c0_4 = arith.constant 0 : index
    %c0_5 = arith.constant 0 : index
    %6 = vector.load %arg1[%c0_4, %c0_5] : memref<256x256xf32, #tpu.memory_space<vmem>>, vector<256x256xf32>
    %7 = vector.broadcast %2 : f32 to vector<256x256xf32>
    %8 = arith.mulf %6, %7 : vector<256x256xf32>
    %9 = arith.addf %5, %8 : vector<256x256xf32>
    %c0_6 = arith.constant 0 : index
    %c0_7 = arith.constant 0 : index
    %10 = vector.load %arg17[%c0_6, %c0_7] : memref<256x256xf32, #tpu.memory_space<vmem>>, vector<256x256xf32>
    tpu.vector_store %arg17[%c0_6, %c0_7], %9 {strides = array<i32>} : memref<256x256xf32, #tpu.memory_space<vmem>>, vector<256x256xf32>,
    %c0_8 = arith.constant 0 : index
    %c0_9 = arith.constant 0 : index
    %11 = vector.load %arg7[%c0_8, %c0_9] : memref<256x256xf32, #tpu.memory_space<vmem>>, vector<256x256xf32>
    %12 = vector.broadcast %1 : f32 to vector<256x256xf32>
    %13 = arith.mulf %11, %12 : vector<256x256xf32>
    %c0_10 = arith.constant 0 : index
    %c0_11 = arith.constant 0 : index
    %14 = vector.load %arg2[%c0_10, %c0_11] : memref<256x256xf32, #tpu.memory_space<vmem>>, vector<256x256xf32>
    %15 = vector.broadcast %2 : f32 to vector<256x256xf32>
    %16 = arith.mulf %14, %15 : vector<256x256xf32>
    %17 = arith.addf %13, %16 : vector<256x256xf32>
    %c0_12 = arith.constant 0 : index
    %c0_13 = arith.constant 0 : index
    %18 = vector.load %arg18[%c0_12, %c0_13] : memref<256x256xf32, #tpu.memory_space<vmem>>, vector<256x256xf32>
    tpu.vector_store %arg18[%c0_12, %c0_13], %17 {strides = array<i32>} : memref<256x256xf32, #tpu.memory_space<vmem>>, vector<256x256xf32>,
    %c0_14 = arith.constant 0 : index
    %c0_15 = arith.constant 0 : index
    %19 = vector.load %arg8[%c0_14, %c0_15] : memref<1x256xf32, #tpu.memory_space<vmem>>, vector<1x256xf32>
    %20 = vector.broadcast %1 : f32 to vector<1x256xf32>
    %21 = arith.mulf %19, %20 : vector<1x256xf32>
    %c0_16 = arith.constant 0 : index
    %c0_17 = arith.constant 0 : index
    %22 = vector.load %arg3[%c0_16, %c0_17] : memref<1x256xf32, #tpu.memory_space<vmem>>, vector<1x256xf32>
    %23 = vector.broadcast %2 : f32 to vector<1x256xf32>
    %24 = arith.mulf %22, %23 : vector<1x256xf32>
    %25 = arith.addf %21, %24 : vector<1x256xf32>
    %c0_18 = arith.constant 0 : index
    %c0_19 = arith.constant 0 : index
    %26 = vector.load %arg19[%c0_18, %c0_19] : memref<1x256xf32, #tpu.memory_space<vmem>>, vector<1x256xf32>
    tpu.vector_store %arg19[%c0_18, %c0_19], %25 {strides = array<i32>} : memref<1x256xf32, #tpu.memory_space<vmem>>, vector<1x256xf32>,
    %c0_20 = arith.constant 0 : index
    %c0_21 = arith.constant 0 : index
    %27 = vector.load %arg9[%c0_20, %c0_21] : memref<1x256xf32, #tpu.memory_space<vmem>>, vector<1x256xf32>
    %28 = vector.broadcast %1 : f32 to vector<1x256xf32>
    %29 = arith.mulf %27, %28 : vector<1x256xf32>
    %c0_22 = arith.constant 0 : index
    %c0_23 = arith.constant 0 : index
    %30 = vector.load %arg4[%c0_22, %c0_23] : memref<1x256xf32, #tpu.memory_space<vmem>>, vector<1x256xf32>
    %31 = vector.broadcast %2 : f32 to vector<1x256xf32>
    %32 = arith.mulf %30, %31 : vector<1x256xf32>
    %33 = arith.addf %29, %32 : vector<1x256xf32>
    %c0_24 = arith.constant 0 : index
    %c0_25 = arith.constant 0 : index
    %34 = vector.load %arg20[%c0_24, %c0_25] : memref<1x256xf32, #tpu.memory_space<vmem>>, vector<1x256xf32>
    tpu.vector_store %arg20[%c0_24, %c0_25], %33 {strides = array<i32>} : memref<1x256xf32, #tpu.memory_space<vmem>>, vector<1x256xf32>,
    %c0_26 = arith.constant 0 : index
    %c0_27 = arith.constant 0 : index
    %35 = vector.load %arg10[%c0_26, %c0_27] : memref<256x256xf32, #tpu.memory_space<vmem>>, vector<256x256xf32>
    %36 = vector.broadcast %1 : f32 to vector<256x256xf32>
    %37 = arith.mulf %35, %36 : vector<256x256xf32>
    %c0_28 = arith.constant 0 : index
    %c0_29 = arith.constant 0 : index
    %38 = vector.load %arg5[%c0_28, %c0_29] : memref<256x256xf32, #tpu.memory_space<vmem>>, vector<256x256xf32>
    %39 = vector.broadcast %2 : f32 to vector<256x256xf32>
    %40 = arith.mulf %38, %39 : vector<256x256xf32>
    %41 = arith.addf %37, %40 : vector<256x256xf32>
    %c0_30 = arith.constant 0 : index
    %c0_31 = arith.constant 0 : index
    %42 = vector.load %arg21[%c0_30, %c0_31] : memref<256x256xf32, #tpu.memory_space<vmem>>, vector<256x256xf32>
    tpu.vector_store %arg21[%c0_30, %c0_31], %41 {strides = array<i32>} : memref<256x256xf32, #tpu.memory_space<vmem>>, vector<256x256xf32>,
    %c0_32 = arith.constant 0 : index
    %c0_33 = arith.constant 0 : index
    %43 = vector.load %arg1[%c0_32, %c0_33] : memref<256x256xf32, #tpu.memory_space<vmem>>, vector<256x256xf32>
    %c0_34 = arith.constant 0 : index
    %c0_35 = arith.constant 0 : index
    %44 = vector.load %arg2[%c0_34, %c0_35] : memref<256x256xf32, #tpu.memory_space<vmem>>, vector<256x256xf32>
    %c0_36 = arith.constant 0 : index
    %c0_37 = arith.constant 0 : index
    %45 = vector.load %arg3[%c0_36, %c0_37] : memref<1x256xf32, #tpu.memory_space<vmem>>, vector<1x256xf32>
    %c0_38 = arith.constant 0 : index
    %c0_39 = arith.constant 0 : index
    %46 = vector.load %arg4[%c0_38, %c0_39] : memref<1x256xf32, #tpu.memory_space<vmem>>, vector<1x256xf32>
    %c0_40 = arith.constant 0 : index
    %c0_41 = arith.constant 0 : index
    %47 = vector.load %arg5[%c0_40, %c0_41] : memref<256x256xf32, #tpu.memory_space<vmem>>, vector<256x256xf32>
    %48 = arith.truncf %43 : vector<256x256xf32> to vector<256x256xbf16>
    %cst_42 = arith.constant dense<0.000000e+00> : vector<16x256xf32>
    %49 = tpu.matmul %0, %48, %cst_42 {dimension_numbers = #tpu.dot_dimension_numbers<[1], [0], [0], [1], [0, 0, 1, 1], [], []>} : vector<16x256xbf16>, vector<256x256xbf16>, vector<16x256xf32> -> vector<16x256xf32>
    %cst_43 = arith.constant 0.000000e+00 : f32
    %50 = vector.broadcast %cst_43 : f32 to vector<16x256xf32>
    %51 = arith.maximumf %49, %50 : vector<16x256xf32>
    %52 = arith.truncf %51 : vector<16x256xf32> to vector<16x256xbf16>
    %53 = arith.truncf %44 : vector<256x256xf32> to vector<256x256xbf16>
    %cst_44 = arith.constant dense<0.000000e+00> : vector<16x256xf32>
    %54 = tpu.matmul %52, %53, %cst_44 {dimension_numbers = #tpu.dot_dimension_numbers<[1], [0], [0], [1], [0, 0, 1, 1], [], []>} : vector<16x256xbf16>, vector<256x256xbf16>, vector<16x256xf32> -> vector<16x256xf32>
    %55 = vector.shape_cast %54 : vector<16x256xf32> to vector<2x8x256xf32>
    %cst_45 = arith.constant dense<0.000000e+00> : vector<2x256xf32>
    %56 = vector.multi_reduction <add>, %55, %cst_45 [1] : vector<2x8x256xf32> to vector<2x256xf32>
    %57 = vector.shape_cast %56 : vector<2x256xf32> to vector<2x1x256xf32>
    %cst_46 = arith.constant 8.000000e+00 : f32
    %58 = vector.broadcast %cst_46 : f32 to vector<2x1x256xf32>
    %59 = arith.divf %57, %58 : vector<2x1x256xf32>
    %60 = vector.broadcast %59 : vector<2x1x256xf32> to vector<2x8x256xf32>
    %61 = arith.subf %55, %60 : vector<2x8x256xf32>
    %62 = arith.mulf %61, %61 : vector<2x8x256xf32>
    %cst_47 = arith.constant dense<0.000000e+00> : vector<2x256xf32>
    %63 = vector.multi_reduction <add>, %62, %cst_47 [1] : vector<2x8x256xf32> to vector<2x256xf32>
    %64 = vector.shape_cast %63 : vector<2x256xf32> to vector<2x1x256xf32>
    %cst_48 = arith.constant 8.000000e+00 : f32
    %65 = vector.broadcast %cst_48 : f32 to vector<2x1x256xf32>
    %66 = arith.divf %64, %65 : vector<2x1x256xf32>
    %cst_49 = arith.constant 9.99999974E-6 : f32
    %67 = vector.broadcast %cst_49 : f32 to vector<2x1x256xf32>
    %68 = arith.addf %66, %67 : vector<2x1x256xf32>
    %69 = math.rsqrt %68 : vector<2x1x256xf32>
    %70 = vector.broadcast %69 : vector<2x1x256xf32> to vector<2x8x256xf32>
    %71 = arith.mulf %61, %70 : vector<2x8x256xf32>
    %72 = vector.shape_cast %71 : vector<2x8x256xf32> to vector<16x256xf32>
    %73 = vector.broadcast %45 : vector<1x256xf32> to vector<16x256xf32>
    %74 = arith.mulf %72, %73 : vector<16x256xf32>
    %75 = vector.broadcast %46 : vector<1x256xf32> to vector<16x256xf32>
    %76 = arith.addf %74, %75 : vector<16x256xf32>
    %cst_50 = arith.constant 0.000000e+00 : f32
    %77 = vector.broadcast %cst_50 : f32 to vector<16x256xf32>
    %78 = arith.maximumf %76, %77 : vector<16x256xf32>
    %79 = arith.truncf %78 : vector<16x256xf32> to vector<16x256xbf16>
    %80 = arith.truncf %47 : vector<256x256xf32> to vector<256x256xbf16>
    %cst_51 = arith.constant dense<0.000000e+00> : vector<16x256xf32>
    %81 = tpu.matmul %79, %80, %cst_51 {dimension_numbers = #tpu.dot_dimension_numbers<[1], [0], [0], [1], [0, 0, 1, 1], [], []>} : vector<16x256xbf16>, vector<256x256xbf16>, vector<16x256xf32> -> vector<16x256xf32>
    %82 = vector.shape_cast %81 : vector<16x256xf32> to vector<2x8x256xf32>
    %cst_52 = arith.constant dense<0.000000e+00> : vector<2x256xf32>
    %83 = vector.multi_reduction <add>, %82, %cst_52 [1] : vector<2x8x256xf32> to vector<2x256xf32>
    %84 = vector.shape_cast %83 : vector<2x256xf32> to vector<2x1x256xf32>
    %cst_53 = arith.constant 8.000000e+00 : f32
    %85 = vector.broadcast %cst_53 : f32 to vector<2x1x256xf32>
    %86 = arith.divf %84, %85 : vector<2x1x256xf32>
    %87 = vector.broadcast %86 : vector<2x1x256xf32> to vector<2x8x256xf32>
    %88 = arith.subf %82, %87 : vector<2x8x256xf32>
    %89 = arith.mulf %88, %88 : vector<2x8x256xf32>
    %cst_54 = arith.constant dense<0.000000e+00> : vector<2x256xf32>
    %90 = vector.multi_reduction <add>, %89, %cst_54 [1] : vector<2x8x256xf32> to vector<2x256xf32>
    %91 = vector.shape_cast %90 : vector<2x256xf32> to vector<2x1x256xf32>
    %cst_55 = arith.constant 8.000000e+00 : f32
    %92 = vector.broadcast %cst_55 : f32 to vector<2x1x256xf32>
    %93 = arith.divf %91, %92 : vector<2x1x256xf32>
    %cst_56 = arith.constant 9.99999974E-6 : f32
    %94 = vector.broadcast %cst_56 : f32 to vector<2x1x256xf32>
    %95 = arith.addf %93, %94 : vector<2x1x256xf32>
    %96 = math.rsqrt %95 : vector<2x1x256xf32>
    %97 = vector.broadcast %96 : vector<2x1x256xf32> to vector<2x8x256xf32>
    %98 = arith.mulf %88, %97 : vector<2x8x256xf32>
    %99 = vector.shape_cast %98 : vector<2x8x256xf32> to vector<16x256xf32>
    %100 = arith.truncf %99 : vector<16x256xf32> to vector<16x256xbf16>
    %c0_57 = arith.constant 0 : index
    %c0_58 = arith.constant 0 : index
    %101 = vector.load %arg11[%c0_57, %c0_58] : memref<256x256xbf16, #tpu.memory_space<vmem>>, vector<256x256xbf16>
    %cst_59 = arith.constant dense<0.000000e+00> : vector<16x256xf32>
    %102 = tpu.matmul %100, %101, %cst_59 {dimension_numbers = #tpu.dot_dimension_numbers<[1], [0], [0], [1], [0, 0, 1, 1], [], []>} : vector<16x256xbf16>, vector<256x256xbf16>, vector<16x256xf32> -> vector<16x256xf32>
    %c0_60 = arith.constant 0 : index
    %c0_61 = arith.constant 0 : index
    %103 = vector.load %arg12[%c0_60, %c0_61] : memref<1x256xf32, #tpu.memory_space<vmem>>, vector<1x256xf32>
    %c0_62 = arith.constant 0 : index
    %c0_63 = arith.constant 0 : index
    %104 = vector.load %arg13[%c0_62, %c0_63] : memref<1x256xf32, #tpu.memory_space<vmem>>, vector<1x256xf32>
    %105 = vector.shape_cast %102 : vector<16x256xf32> to vector<2x8x256xf32>
    %cst_64 = arith.constant dense<0.000000e+00> : vector<2x256xf32>
    %106 = vector.multi_reduction <add>, %105, %cst_64 [1] : vector<2x8x256xf32> to vector<2x256xf32>
    %107 = vector.shape_cast %106 : vector<2x256xf32> to vector<2x1x256xf32>
    %cst_65 = arith.constant 8.000000e+00 : f32
    %108 = vector.broadcast %cst_65 : f32 to vector<2x1x256xf32>
    %109 = arith.divf %107, %108 : vector<2x1x256xf32>
    %110 = vector.broadcast %109 : vector<2x1x256xf32> to vector<2x8x256xf32>
    %111 = arith.subf %105, %110 : vector<2x8x256xf32>
    %112 = arith.mulf %111, %111 : vector<2x8x256xf32>
    %cst_66 = arith.constant dense<0.000000e+00> : vector<2x256xf32>
    %113 = vector.multi_reduction <add>, %112, %cst_66 [1] : vector<2x8x256xf32> to vector<2x256xf32>
    %114 = vector.shape_cast %113 : vector<2x256xf32> to vector<2x1x256xf32>
    %cst_67 = arith.constant 8.000000e+00 : f32
    %115 = vector.broadcast %cst_67 : f32 to vector<2x1x256xf32>
    %116 = arith.divf %114, %115 : vector<2x1x256xf32>
    %cst_68 = arith.constant 9.99999974E-6 : f32
    %117 = vector.broadcast %cst_68 : f32 to vector<2x1x256xf32>
    %118 = arith.addf %116, %117 : vector<2x1x256xf32>
    %119 = math.rsqrt %118 : vector<2x1x256xf32>
    %120 = vector.broadcast %119 : vector<2x1x256xf32> to vector<2x8x256xf32>
    %121 = arith.mulf %111, %120 : vector<2x8x256xf32>
    %122 = vector.shape_cast %121 : vector<2x8x256xf32> to vector<16x256xf32>
    %123 = vector.broadcast %103 : vector<1x256xf32> to vector<16x256xf32>
    %124 = arith.mulf %122, %123 : vector<16x256xf32>
    %125 = vector.broadcast %104 : vector<1x256xf32> to vector<16x256xf32>
    %126 = arith.addf %124, %125 : vector<16x256xf32>
    %cst_69 = arith.constant 0.000000e+00 : f32
    %127 = vector.broadcast %cst_69 : f32 to vector<16x256xf32>
    %128 = arith.maximumf %126, %127 : vector<16x256xf32>
    %129 = arith.truncf %128 : vector<16x256xf32> to vector<16x256xbf16>
    %c0_70 = arith.constant 0 : index
    %c0_71 = arith.constant 0 : index
    %130 = vector.load %arg14[%c0_70, %c0_71] : memref<256x256xbf16, #tpu.memory_space<vmem>>, vector<256x256xbf16>
    %cst_72 = arith.constant dense<0.000000e+00> : vector<16x256xf32>
    %131 = tpu.matmul %129, %130, %cst_72 {dimension_numbers = #tpu.dot_dimension_numbers<[1], [0], [0], [1], [0, 0, 1, 1], [], []>} : vector<16x256xbf16>, vector<256x256xbf16>, vector<16x256xf32> -> vector<16x256xf32>
    %132 = arith.truncf %9 : vector<256x256xf32> to vector<256x256xbf16>
    %cst_73 = arith.constant dense<0.000000e+00> : vector<16x256xf32>
    %133 = tpu.matmul %0, %132, %cst_73 {dimension_numbers = #tpu.dot_dimension_numbers<[1], [0], [0], [1], [0, 0, 1, 1], [], []>} : vector<16x256xbf16>, vector<256x256xbf16>, vector<16x256xf32> -> vector<16x256xf32>
    %cst_74 = arith.constant 0.000000e+00 : f32
    %134 = vector.broadcast %cst_74 : f32 to vector<16x256xf32>
    %135 = arith.maximumf %133, %134 : vector<16x256xf32>
    %136 = arith.truncf %135 : vector<16x256xf32> to vector<16x256xbf16>
    %137 = arith.truncf %17 : vector<256x256xf32> to vector<256x256xbf16>
    %cst_75 = arith.constant dense<0.000000e+00> : vector<16x256xf32>
    %138 = tpu.matmul %136, %137, %cst_75 {dimension_numbers = #tpu.dot_dimension_numbers<[1], [0], [0], [1], [0, 0, 1, 1], [], []>} : vector<16x256xbf16>, vector<256x256xbf16>, vector<16x256xf32> -> vector<16x256xf32>
    %139 = vector.shape_cast %138 : vector<16x256xf32> to vector<2x8x256xf32>
    %cst_76 = arith.constant dense<0.000000e+00> : vector<2x256xf32>
    %140 = vector.multi_reduction <add>, %139, %cst_76 [1] : vector<2x8x256xf32> to vector<2x256xf32>
    %141 = vector.shape_cast %140 : vector<2x256xf32> to vector<2x1x256xf32>
    %cst_77 = arith.constant 8.000000e+00 : f32
    %142 = vector.broadcast %cst_77 : f32 to vector<2x1x256xf32>
    %143 = arith.divf %141, %142 : vector<2x1x256xf32>
    %144 = vector.broadcast %143 : vector<2x1x256xf32> to vector<2x8x256xf32>
    %145 = arith.subf %139, %144 : vector<2x8x256xf32>
    %146 = arith.mulf %145, %145 : vector<2x8x256xf32>
    %cst_78 = arith.constant dense<0.000000e+00> : vector<2x256xf32>
    %147 = vector.multi_reduction <add>, %146, %cst_78 [1] : vector<2x8x256xf32> to vector<2x256xf32>
    %148 = vector.shape_cast %147 : vector<2x256xf32> to vector<2x1x256xf32>
    %cst_79 = arith.constant 8.000000e+00 : f32
    %149 = vector.broadcast %cst_79 : f32 to vector<2x1x256xf32>
    %150 = arith.divf %148, %149 : vector<2x1x256xf32>
    %cst_80 = arith.constant 9.99999974E-6 : f32
    %151 = vector.broadcast %cst_80 : f32 to vector<2x1x256xf32>
    %152 = arith.addf %150, %151 : vector<2x1x256xf32>
    %153 = math.rsqrt %152 : vector<2x1x256xf32>
    %154 = vector.broadcast %153 : vector<2x1x256xf32> to vector<2x8x256xf32>
    %155 = arith.mulf %145, %154 : vector<2x8x256xf32>
    %156 = vector.shape_cast %155 : vector<2x8x256xf32> to vector<16x256xf32>
    %157 = vector.broadcast %25 : vector<1x256xf32> to vector<16x256xf32>
    %158 = arith.mulf %156, %157 : vector<16x256xf32>
    %159 = vector.broadcast %33 : vector<1x256xf32> to vector<16x256xf32>
    %160 = arith.addf %158, %159 : vector<16x256xf32>
    %cst_81 = arith.constant 0.000000e+00 : f32
    %161 = vector.broadcast %cst_81 : f32 to vector<16x256xf32>
    %162 = arith.maximumf %160, %161 : vector<16x256xf32>
    %163 = arith.truncf %162 : vector<16x256xf32> to vector<16x256xbf16>
    %164 = arith.truncf %41 : vector<256x256xf32> to vector<256x256xbf16>
    %cst_82 = arith.constant dense<0.000000e+00> : vector<16x256xf32>
    %165 = tpu.matmul %163, %164, %cst_82 {dimension_numbers = #tpu.dot_dimension_numbers<[1], [0], [0], [1], [0, 0, 1, 1], [], []>} : vector<16x256xbf16>, vector<256x256xbf16>, vector<16x256xf32> -> vector<16x256xf32>
    %166 = vector.shape_cast %165 : vector<16x256xf32> to vector<2x8x256xf32>
    %cst_83 = arith.constant dense<0.000000e+00> : vector<2x256xf32>
    %167 = vector.multi_reduction <add>, %166, %cst_83 [1] : vector<2x8x256xf32> to vector<2x256xf32>
    %168 = vector.shape_cast %167 : vector<2x256xf32> to vector<2x1x256xf32>
    %cst_84 = arith.constant 8.000000e+00 : f32
    %169 = vector.broadcast %cst_84 : f32 to vector<2x1x256xf32>
    %170 = arith.divf %168, %169 : vector<2x1x256xf32>
    %171 = vector.broadcast %170 : vector<2x1x256xf32> to vector<2x8x256xf32>
    %172 = arith.subf %166, %171 : vector<2x8x256xf32>
    %173 = arith.mulf %172, %172 : vector<2x8x256xf32>
    %cst_85 = arith.constant dense<0.000000e+00> : vector<2x256xf32>
    %174 = vector.multi_reduction <add>, %173, %cst_85 [1] : vector<2x8x256xf32> to vector<2x256xf32>
    %175 = vector.shape_cast %174 : vector<2x256xf32> to vector<2x1x256xf32>
    %cst_86 = arith.constant 8.000000e+00 : f32
    %176 = vector.broadcast %cst_86 : f32 to vector<2x1x256xf32>
    %177 = arith.divf %175, %176 : vector<2x1x256xf32>
    %cst_87 = arith.constant 9.99999974E-6 : f32
    %178 = vector.broadcast %cst_87 : f32 to vector<2x1x256xf32>
    %179 = arith.addf %177, %178 : vector<2x1x256xf32>
    %180 = math.rsqrt %179 : vector<2x1x256xf32>
    %181 = vector.broadcast %180 : vector<2x1x256xf32> to vector<2x8x256xf32>
    %182 = arith.mulf %172, %181 : vector<2x8x256xf32>
    %183 = vector.shape_cast %182 : vector<2x8x256xf32> to vector<16x256xf32>
    %184 = vector.extract_strided_slice %131 {offsets = [0, 0], sizes = [8, 256], strides = [1, 1]} : vector<16x256xf32> to vector<8x256xf32>
    %185 = vector.extract_strided_slice %131 {offsets = [8, 0], sizes = [8, 256], strides = [1, 1]} : vector<16x256xf32> to vector<8x256xf32>
    %186 = vector.extract_strided_slice %183 {offsets = [0, 0], sizes = [8, 256], strides = [1, 1]} : vector<16x256xf32> to vector<8x256xf32>
    %187 = vector.extract_strided_slice %183 {offsets = [8, 0], sizes = [8, 256], strides = [1, 1]} : vector<16x256xf32> to vector<8x256xf32>
    %188 = arith.mulf %184, %184 : vector<8x256xf32>
    %cst_88 = arith.constant dense<0.000000e+00> : vector<8xf32>
    %189 = vector.multi_reduction <add>, %188, %cst_88 [1] : vector<8x256xf32> to vector<8xf32>
    %190 = vector.shape_cast %189 : vector<8xf32> to vector<8x1xf32>
    %cst_89 = arith.constant 1.000000e-24 : f32
    %191 = vector.broadcast %cst_89 : f32 to vector<8x1xf32>
    %192 = arith.maximumf %190, %191 : vector<8x1xf32>
    %193 = math.rsqrt %192 : vector<8x1xf32>
    %194 = vector.broadcast %193 : vector<8x1xf32> to vector<8x256xf32>
    %195 = arith.mulf %184, %194 : vector<8x256xf32>
    %196 = arith.mulf %187, %187 : vector<8x256xf32>
    %cst_90 = arith.constant dense<0.000000e+00> : vector<8xf32>
    %197 = vector.multi_reduction <add>, %196, %cst_90 [1] : vector<8x256xf32> to vector<8xf32>
    %198 = vector.shape_cast %197 : vector<8xf32> to vector<8x1xf32>
    %cst_91 = arith.constant 1.000000e-24 : f32
    %199 = vector.broadcast %cst_91 : f32 to vector<8x1xf32>
    %200 = arith.maximumf %198, %199 : vector<8x1xf32>
    %201 = math.rsqrt %200 : vector<8x1xf32>
    %202 = vector.broadcast %201 : vector<8x1xf32> to vector<8x256xf32>
    %203 = arith.mulf %187, %202 : vector<8x256xf32>
    %cst_92 = arith.constant 1.000000e+00 : f32
    %204 = vector.broadcast %cst_92 : f32 to vector<8x256xf32>
    %205 = arith.mulf %195, %204 : vector<8x256xf32>
    %206 = arith.mulf %205, %203 : vector<8x256xf32>
    %cst_93 = arith.constant dense<0.000000e+00> : vector<8xf32>
    %207 = vector.multi_reduction <add>, %206, %cst_93 [1] : vector<8x256xf32> to vector<8xf32>
    %208 = vector.shape_cast %207 : vector<8xf32> to vector<8x1xf32>
    %209 = arith.truncf %205 : vector<8x256xf32> to vector<8x256xbf16>
    %210 = arith.truncf %203 : vector<8x256xf32> to vector<8x256xbf16>
    "tpu.trace_start"() <{level = 10 : i32, message = "nc,mc->nm"}> : () -> ()
    %cst_94 = arith.constant dense<0.000000e+00> : vector<8x8xf32>
    %211 = tpu.matmul %209, %210, %cst_94 {dimension_numbers = #tpu.dot_dimension_numbers<[1], [1], [0], [0], [0, 0, 1, 0], [], []>} : vector<8x256xbf16>, vector<8x256xbf16>, vector<8x8xf32> -> vector<8x8xf32>
    "tpu.trace_stop"() : () -> ()
    %cst_95 = arith.constant dense<0xFF800000> : vector<8xf32>
    %212 = vector.multi_reduction <maximumf>, %211, %cst_95 [1] : vector<8x8xf32> to vector<8xf32>
    %213 = vector.shape_cast %212 : vector<8xf32> to vector<8x1xf32>
    %214 = vector.broadcast %213 : vector<8x1xf32> to vector<8x8xf32>
    %215 = arith.subf %211, %214 : vector<8x8xf32>
    %216 = math.exp %215 : vector<8x8xf32>
    %cst_96 = arith.constant dense<0.000000e+00> : vector<8xf32>
    %217 = vector.multi_reduction <add>, %216, %cst_96 [1] : vector<8x8xf32> to vector<8xf32>
    %218 = vector.shape_cast %217 : vector<8xf32> to vector<8x1xf32>
    %219 = math.log %218 : vector<8x1xf32>
    %220 = arith.addf %219, %213 : vector<8x1xf32>
    %221 = arith.subf %220, %208 : vector<8x1xf32>
    %222 = vector.shape_cast %221 : vector<8x1xf32> to vector<1x8x1xf32>
    %cst_97 = arith.constant dense<0.000000e+00> : vector<1xf32>
    %223 = vector.multi_reduction <add>, %222, %cst_97 [1, 2] : vector<1x8x1xf32> to vector<1xf32>
    %224 = vector.shape_cast %223 : vector<1xf32> to vector<1x1x1xf32>
    %225 = vector.extract %224[0, 0, 0] : f32 from vector<1x1x1xf32>
    %226 = vector.broadcast %225 : f32 to vector<1x1xf32>
    %227 = arith.mulf %185, %185 : vector<8x256xf32>
    %cst_98 = arith.constant dense<0.000000e+00> : vector<8xf32>
    %228 = vector.multi_reduction <add>, %227, %cst_98 [1] : vector<8x256xf32> to vector<8xf32>
    %229 = vector.shape_cast %228 : vector<8xf32> to vector<8x1xf32>
    %cst_99 = arith.constant 1.000000e-24 : f32
    %230 = vector.broadcast %cst_99 : f32 to vector<8x1xf32>
    %231 = arith.maximumf %229, %230 : vector<8x1xf32>
    %232 = math.rsqrt %231 : vector<8x1xf32>
    %233 = vector.broadcast %232 : vector<8x1xf32> to vector<8x256xf32>
    %234 = arith.mulf %185, %233 : vector<8x256xf32>
    %235 = arith.mulf %186, %186 : vector<8x256xf32>
    %cst_100 = arith.constant dense<0.000000e+00> : vector<8xf32>
    %236 = vector.multi_reduction <add>, %235, %cst_100 [1] : vector<8x256xf32> to vector<8xf32>
    %237 = vector.shape_cast %236 : vector<8xf32> to vector<8x1xf32>
    %cst_101 = arith.constant 1.000000e-24 : f32
    %238 = vector.broadcast %cst_101 : f32 to vector<8x1xf32>
    %239 = arith.maximumf %237, %238 : vector<8x1xf32>
    %240 = math.rsqrt %239 : vector<8x1xf32>
    %241 = vector.broadcast %240 : vector<8x1xf32> to vector<8x256xf32>
    %242 = arith.mulf %186, %241 : vector<8x256xf32>
    %cst_102 = arith.constant 1.000000e+00 : f32
    %243 = vector.broadcast %cst_102 : f32 to vector<8x256xf32>
    %244 = arith.mulf %234, %243 : vector<8x256xf32>
    %245 = arith.mulf %244, %242 : vector<8x256xf32>
    %cst_103 = arith.constant dense<0.000000e+00> : vector<8xf32>
    %246 = vector.multi_reduction <add>, %245, %cst_103 [1] : vector<8x256xf32> to vector<8xf32>
    %247 = vector.shape_cast %246 : vector<8xf32> to vector<8x1xf32>
    %248 = arith.truncf %244 : vector<8x256xf32> to vector<8x256xbf16>
    %249 = arith.truncf %242 : vector<8x256xf32> to vector<8x256xbf16>
    "tpu.trace_start"() <{level = 10 : i32, message = "nc,mc->nm"}> : () -> ()
    %cst_104 = arith.constant dense<0.000000e+00> : vector<8x8xf32>
    %250 = tpu.matmul %248, %249, %cst_104 {dimension_numbers = #tpu.dot_dimension_numbers<[1], [1], [0], [0], [0, 0, 1, 0], [], []>} : vector<8x256xbf16>, vector<8x256xbf16>, vector<8x8xf32> -> vector<8x8xf32>
    "tpu.trace_stop"() : () -> ()
    %cst_105 = arith.constant dense<0xFF800000> : vector<8xf32>
    %251 = vector.multi_reduction <maximumf>, %250, %cst_105 [1] : vector<8x8xf32> to vector<8xf32>
    %252 = vector.shape_cast %251 : vector<8xf32> to vector<8x1xf32>
    %253 = vector.broadcast %252 : vector<8x1xf32> to vector<8x8xf32>
    %254 = arith.subf %250, %253 : vector<8x8xf32>
    %255 = math.exp %254 : vector<8x8xf32>
    %cst_106 = arith.constant dense<0.000000e+00> : vector<8xf32>
    %256 = vector.multi_reduction <add>, %255, %cst_106 [1] : vector<8x8xf32> to vector<8xf32>
    %257 = vector.shape_cast %256 : vector<8xf32> to vector<8x1xf32>
    %258 = math.log %257 : vector<8x1xf32>
    %259 = arith.addf %258, %252 : vector<8x1xf32>
    %260 = arith.subf %259, %247 : vector<8x1xf32>
    %261 = vector.shape_cast %260 : vector<8x1xf32> to vector<1x8x1xf32>
    %cst_107 = arith.constant dense<0.000000e+00> : vector<1xf32>
    %262 = vector.multi_reduction <add>, %261, %cst_107 [1, 2] : vector<1x8x1xf32> to vector<1xf32>
    %263 = vector.shape_cast %262 : vector<1xf32> to vector<1x1x1xf32>
    %264 = vector.extract %263[0, 0, 0] : f32 from vector<1x1x1xf32>
    %265 = vector.broadcast %264 : f32 to vector<1x1xf32>
    %266 = arith.addf %226, %265 : vector<1x1xf32>
    %cst_108 = arith.constant 2.500000e-01 : f32
    %267 = vector.broadcast %cst_108 : f32 to vector<1x1xf32>
    %268 = arith.mulf %266, %267 : vector<1x1xf32>
    %c0_109 = arith.constant 0 : index
    %c0_110 = arith.constant 0 : index
    %269 = vector.load %arg16[%c0_109, %c0_110] : memref<1x1xf32, #tpu.memory_space<vmem>>, vector<1x1xf32>
    tpu.vector_store %arg16[%c0_109, %c0_110], %268 {strides = array<i32>} : memref<1x1xf32, #tpu.memory_space<vmem>>, vector<1x1xf32>,
    return
  }
}

</mosaic_0001>

<bundles_post_ra>
// kernel: moco_forward.1
= control target key start
LH: loop header
LB: loop body
LE: loop exit
PB: predicated region body
PF: predicated region fallthrough
CT: control target
= control target key end

     0   :  { %s7152_s0 = inlined_call_operand.vmem [shape: bf16[16,256], index: 0, kind: input, shape index: {}]   ;;  %s7153_s1 = inlined_call_operand.vmem [shape: f32[256,256], index: 1, kind: input, shape index: {}]   ;;  %s7154_s2 = inlined_call_operand.vmem [shape: f32[256,256], index: 2, kind: input, shape index: {}]   ;;  %s7155_s3 = inlined_call_operand.vmem [shape: f32[1,256], index: 3, kind: input, shape index: {}]   ;;  %s7156_s4 = inlined_call_operand.vmem [shape: f32[1,256], index: 4, kind: input, shape index: {}]   ;;  %s7157_s5 = inlined_call_operand.vmem [shape: f32[256,256], index: 5, kind: input, shape index: {}]   ;;  %s7158_s6 = inlined_call_operand.vmem [shape: f32[256,256], index: 6, kind: input, shape index: {}, may-alias: {6,17}]   ;;  %s7159_s7 = inlined_call_operand.vmem [shape: f32[256,256], index: 7, kind: input, shape index: {}, may-alias: {7,18}]   ;;  %s7160_s8 = inlined_call_operand.vmem [shape: f32[1,256], index: 8, kind: input, shape index: {}, may-alias: {8,19}]   ;;  %s7161_s9 = inlined_call_operand.vmem [shape: f32[1,256], index: 9, kind: input, shape index: {}, may-alias: {9,20}]   ;;  %s7162_s10 = inlined_call_operand.vmem [shape: f32[256,256], index: 10, kind: input, shape index: {}, may-alias: {10,21}]   ;;  %s7163_s11 = inlined_call_operand.vmem [shape: bf16[256,256], index: 11, kind: input, shape index: {}]   ;;  %s7164_s12 = inlined_call_operand.vmem [shape: f32[1,256], index: 12, kind: input, shape index: {}]   ;;  %s7165_s13 = inlined_call_operand.vmem [shape: f32[1,256], index: 13, kind: input, shape index: {}]   ;;  %s7166_s14 = inlined_call_operand.vmem [shape: bf16[256,256], index: 14, kind: input, shape index: {}]   ;;  %s7167_s15 = inlined_call_operand.<no memory space> [shape: f32[1], index: 15, kind: input, shape index: {}]   ;;  %s7168_s16 = inlined_call_operand.hbm [shape: f32[1,1], index: 16, kind: output, shape index: {0}]   ;;  %s7169_s17 = inlined_call_operand.vmem [shape: f32[256,256], index: 17, kind: output, shape index: {1}, may-alias: {6,17}]   ;;  %s7170_s18 = inlined_call_operand.vmem [shape: f32[256,256], index: 18, kind: output, shape index: {2}, may-alias: {7,18}]   ;;  %s7171_s19 = inlined_call_operand.vmem [shape: f32[1,256], index: 19, kind: output, shape index: {3}, may-alias: {8,19}]   ;;  %s7172_s20 = inlined_call_operand.vmem [shape: f32[1,256], index: 20, kind: output, shape index: {4}, may-alias: {9,20}]   ;;  %s7173_s21 = inlined_call_operand.vmem [shape: f32[256,256], index: 21, kind: output, shape index: {5}, may-alias: {10,21}]  }
   0x1   :  { %7250 = sst [smem:[#allocation39_spill]] %s7152_s0 }
   0x2   :  { %7251 = sst [smem:[#allocation40_spill]] %s7153_s1 }
   0x3   :  { %7252 = sst [smem:[#allocation41_spill]] %s7154_s2 }
   0x4   :  { %7253 = sst [smem:[#allocation42_spill]] %s7155_s3 }
   0x5   :  { %7254 = sst [smem:[#allocation43_spill]] %s7156_s4 }
   0x6   :  { %7255 = sst [smem:[#allocation44_spill]] %s7157_s5 }
   0x7   :  { %7256 = sst [smem:[#allocation45_spill]] %s7168_s16 }
   0x8   :  { %7257 = sst [smem:[#allocation46_spill]] %s7172_s20 }
   0x9   :  { %s7258_s26 = sld [smem:[#allocation40_spill]]  ;;  %s7259_s0 = sld [smem:[#allocation39_spill]] }
   0xa   :  { %s7260_s5 = sld [smem:[#allocation41_spill]] }
   0xf   :  { %v1237_v0 = vld [vmem:[%s7258_s26 + $0x8] sm:$0xff]  ;;  %v1239_v1 = vld [vmem:[%s7258_s26 + $0x18] sm:$0xff]  ;;  %v1236_v2 = vld [vmem:[%s7258_s26] sm:$0xff] }
  0x10   :  { %v1431_v3 = vpack.c.bf16 %v1239_v1, %v1237_v0  ;;  %v1238_v4 = vld [vmem:[%s7258_s26 + $0x10] sm:$0xff]  ;;  %v1241_v5 = vld [vmem:[%s7258_s26 + $0x28] sm:$0xff]  ;;  %v1243_v6 = vld [vmem:[%s7258_s26 + $0x38] sm:$0xff] }
  0x11   :  { %v1430_v7 = vpack.c.bf16 %v1238_v4, %v1236_v2  ;;  %v1433_v8 = vpack.c.bf16 %v1243_v6, %v1241_v5  ;;  %v1240_v9 = vld [vmem:[%s7258_s26 + $0x20] sm:$0xff]  ;;  %v1242_v10 = vld [vmem:[%s7258_s26 + $0x30] sm:$0xff]  ;;  %v1245_v11 = vld [vmem:[%s7258_s26 + $0x48] sm:$0xff] }
  0x12   :  { %1472 = vmatprep.subr.bf16.mxu0 %v1431_v3  ;;  %v1247_v12 = vld [vmem:[%s7258_s26 + $0x58] sm:$0xff]  ;;  %v1432_v13 = vpack.c.bf16 %v1242_v10, %v1240_v9  ;;  %v1244_v15 = vld [vmem:[%s7258_s26 + $0x40] sm:$0xff]  ;;  %v1246_v16 = vld [vmem:[%s7258_s26 + $0x50] sm:$0xff] }
  0x13   :  { %1473 = vmatpush1.bf16.msra.mxu0 %v1430_v7  ;;  %v1435_v14 = vpack.c.bf16 %v1247_v12, %v1245_v11  ;;  %v1249_v17 = vld [vmem:[%s7258_s26 + $0x68] sm:$0xff]  ;;  %v1251_v18 = vld [vmem:[%s7258_s26 + $0x78] sm:$0xff]  ;;  %v1434_v19 = vpack.c.bf16 %v1246_v16, %v1244_v15  ;;  %v1248_v21 = vld [vmem:[%s7258_s26 + $0x60] sm:$0xff] }
  0x14   :  { %1474 = vmatprep.subr.bf16.mxu0 %v1433_v8  ;;  %v1437_v20 = vpack.c.bf16 %v1251_v18, %v1249_v17  ;;  %v1250_v22 = vld [vmem:[%s7258_s26 + $0x70] sm:$0xff]  ;;  %v1253_v23 = vld [vmem:[%s7258_s26 + $0x88] sm:$0xff]  ;;  %v1255_v24 = vld [vmem:[%s7258_s26 + $0x98] sm:$0xff] }
  0x15   :  { %v1436_v25 = vpack.c.bf16 %v1250_v22, %v1248_v21  ;;  %v1439_v26 = vpack.c.bf16 %v1255_v24, %v1253_v23  ;;  %v1252_v27 = vld [vmem:[%s7258_s26 + $0x80] sm:$0xff]  ;;  %v1254_v28 = vld [vmem:[%s7258_s26 + $0x90] sm:$0xff]  ;;  %v1257_v29 = vld [vmem:[%s7258_s26 + $0xa8] sm:$0xff] }
  0x16   :  { %v1259_v30 = vld [vmem:[%s7258_s26 + $0xb8] sm:$0xff]  ;;  %v1438_v31 = vpack.c.bf16 %v1254_v28, %v1252_v27  ;;  %v1256_v33 = vld [vmem:[%s7258_s26 + $0xa0] sm:$0xff]  ;;  %v1258_v34 = vld [vmem:[%s7258_s26 + $0xb0] sm:$0xff] }
  0x17   :  { %1475 = vmatpush1.bf16.msra.mxu0 %v1432_v13  ;;  %v1441_v32 = vpack.c.bf16 %v1259_v30, %v1257_v29  ;;  %v1261_v35 = vld [vmem:[%s7258_s26 + $0xc8] sm:$0xff]  ;;  %v1263_v36 = vld [vmem:[%s7258_s26 + $0xd8] sm:$0xff]  ;;  %v1440_v37 = vpack.c.bf16 %v1258_v34, %v1256_v33  ;;  %v1260_v38 = vld [vmem:[%s7258_s26 + $0xc0] sm:$0xff] }
  0x18   :  { %1476 = vmatprep.subr.bf16.mxu0 %v1435_v14  ;;  %v1262_v39 = vld [vmem:[%s7258_s26 + $0xd0] sm:$0xff]  ;;  %v1443_v40 = vpack.c.bf16 %v1263_v36, %v1261_v35  ;;  %v1265_v41 = vld [vmem:[%s7258_s26 + $0xe8] sm:$0xff]  ;;  %v1267_v42 = vld [vmem:[%s7258_s26 + $0xf8] sm:$0xff] }
  0x19   :  { %v3160_v43 = vld [vmem:[%s7259_s0 + $0x4] ss:$8 sps:$4 sm:$0xff]   ;;  %v1266_v46 = vld [vmem:[%s7258_s26 + $0xf0] sm:$0xff]  ;;  %v1303_v47 = vld [vmem:[%s7260_s5 + $0x18] sm:$0xff]  ;;  %v1442_v50 = vpack.c.bf16 %v1262_v39, %v1260_v38  ;;  %v1445_v56 = vpack.c.bf16 %v1267_v42, %v1265_v41 }
  0x1a   :  { %v1301_v44 = vld [vmem:[%s7260_s5 + $0x8] sm:$0xff]  ;;  %v1264_v45 = vld [vmem:[%s7258_s26 + $0xe0] sm:$0xff]  ;;  %v1302_v49 = vld [vmem:[%s7260_s5 + $0x10] sm:$0xff]  ;;  %1504 = vmatprep.mubr.bf16.mxu0 %v3160_v43 }
  0x1b   :  { %1477 = vmatpush1.bf16.msra.mxu0 %v1434_v19  ;;  %v1300_v48 = vld [vmem:[%s7260_s5] sm:$0xff]  ;;  %v1522_v51 = vpack.c.bf16 %v1303_v47, %v1301_v44  ;;  %v1305_v53 = vld [vmem:[%s7260_s5 + $0x28] sm:$0xff]  ;;  %v1307_v54 = vld [vmem:[%s7260_s5 + $0x38] sm:$0xff]  ;;  %v1444_v0 = vpack.c.bf16 %v1266_v46, %v1264_v45 }
  0x1c   :  { %1478 = vmatprep.subr.bf16.mxu0 %v1437_v20  ;;  %v1521_v52 = vpack.c.bf16 %v1302_v49, %v1300_v48  ;;  %v1304_v55 = vld [vmem:[%s7260_s5 + $0x20] sm:$0xff]  ;;  %v1524_v57 = vpack.c.bf16 %v1307_v54, %v1305_v53  ;;  %v1306_v58 = vld [vmem:[%s7260_s5 + $0x30] sm:$0xff]  ;;  %v1309_v59 = vld [vmem:[%s7260_s5 + $0x48] sm:$0xff] }
  0x1d   :  { %v1311_v60 = vld [vmem:[%s7260_s5 + $0x58] sm:$0xff]  ;;  %v1269_v61 = vld [vmem:[%s7258_s26 + $0x108] sm:$0xff]  ;;  %1553 = vmatprep.subr.bf16.mxu1 %v1522_v51  ;;  %v1523_v63 = vpack.c.bf16 %v1306_v58, %v1304_v55  ;;  %v1268_v1 = vld [vmem:[%s7258_s26 + $0x100] sm:$0xff] }
  0x1e   :  { %v1271_v62 = vld [vmem:[%s7258_s26 + $0x118] sm:$0xff]  ;;  %1554 = vmatpush1.bf16.msra.mxu1 %v1521_v52  ;;  %v1526_v2 = vpack.c.bf16 %v1311_v60, %v1309_v59  ;;  %v1308_v3 = vld [vmem:[%s7260_s5 + $0x40] sm:$0xff]  ;;  %v1310_v4 = vld [vmem:[%s7260_s5 + $0x50] sm:$0xff] }
  0x1f   :  { %1479 = vmatpush1.bf16.msra.mxu0 %v1436_v25  ;;  %1555 = vmatprep.subr.bf16.mxu1 %v1524_v57  ;;  %v1447_v5 = vpack.c.bf16 %v1271_v62, %v1269_v61  ;;  %v1270_v6 = vld [vmem:[%s7258_s26 + $0x110] sm:$0xff]  ;;  %v1313_v7 = vld [vmem:[%s7260_s5 + $0x68] sm:$0xff]  ;;  %v1315_v8 = vld [vmem:[%s7260_s5 + $0x78] sm:$0xff]  ;;  %v1525_v11 = vpack.c.bf16 %v1310_v4, %v1308_v3 }
  0x20   :  { %1480 = vmatprep.subr.bf16.mxu0 %v1439_v26  ;;  %v1273_v9 = vld [vmem:[%s7258_s26 + $0x128] sm:$0xff]  ;;  %v1275_v10 = vld [vmem:[%s7258_s26 + $0x138] sm:$0xff]  ;;  %v1446_v12 = vpack.c.bf16 %v1270_v6, %v1268_v1  ;;  %v1272_v13 = vld [vmem:[%s7258_s26 + $0x120] sm:$0xff]  ;;  %v1528_v14 = vpack.c.bf16 %v1315_v8, %v1313_v7 }
  0x21   :  { %v1312_v15 = vld [vmem:[%s7260_s5 + $0x60] sm:$0xff]  ;;  %v1314_v16 = vld [vmem:[%s7260_s5 + $0x70] sm:$0xff]  ;;  %v1449_v17 = vpack.c.bf16 %v1275_v10, %v1273_v9  ;;  %v1317_v19 = vld [vmem:[%s7260_s5 + $0x88] sm:$0xff] }
  0x22   :  { %1556 = vmatpush1.bf16.msra.mxu1 %v1523_v63  ;;  %v1274_v18 = vld [vmem:[%s7258_s26 + $0x130] sm:$0xff]  ;;  %v1319_v20 = vld [vmem:[%s7260_s5 + $0x98] sm:$0xff]  ;;  %v1277_v21 = vld [vmem:[%s7258_s26 + $0x148] sm:$0xff]  ;;  %v1527_v23 = vpack.c.bf16 %v1314_v16, %v1312_v15 }
  0x23   :  { %1481 = vmatpush1.bf16.msra.mxu0 %v1438_v31  ;;  %1557 = vmatprep.subr.bf16.mxu1 %v1526_v2  ;;  %v1279_v22 = vld [vmem:[%s7258_s26 + $0x158] sm:$0xff]  ;;  %v1448_v24 = vpack.c.bf16 %v1274_v18, %v1272_v13  ;;  %v1276_v25 = vld [vmem:[%s7258_s26 + $0x140] sm:$0xff]  ;;  %v1530_v26 = vpack.c.bf16 %v1319_v20, %v1317_v19  ;;  %v1318_v28 = vld [vmem:[%s7260_s5 + $0x90] sm:$0xff] }
  0x24   :  { %1482 = vmatprep.subr.bf16.mxu0 %v1441_v32  ;;  %v1316_v27 = vld [vmem:[%s7260_s5 + $0x80] sm:$0xff]  ;;  %v1451_v29 = vpack.c.bf16 %v1279_v22, %v1277_v21  ;;  %v1278_v30 = vld [vmem:[%s7258_s26 + $0x150] sm:$0xff]  ;;  %v1321_v31 = vld [vmem:[%s7260_s5 + $0xa8] sm:$0xff] }
  0x25   :  { %v1323_v32 = vld [vmem:[%s7260_s5 + $0xb8] sm:$0xff]  ;;  %v1281_v33 = vld [vmem:[%s7258_s26 + $0x168] sm:$0xff]  ;;  %v1280_v35 = vld [vmem:[%s7258_s26 + $0x160] sm:$0xff]  ;;  %v1450_v38 = vpack.c.bf16 %v1278_v30, %v1276_v25 }
  0x26   :  { %1558 = vmatpush1.bf16.msra.mxu1 %v1525_v11  ;;  %v1283_v34 = vld [vmem:[%s7258_s26 + $0x178] sm:$0xff]  ;;  %v1282_v36 = vld [vmem:[%s7258_s26 + $0x170] sm:$0xff]  ;;  %v1285_v39 = vld [vmem:[%s7258_s26 + $0x188] sm:$0xff]  ;;  %v1532_v41 = vpack.c.bf16 %v1323_v32, %v1321_v31 }
  0x27   :  { %1483 = vmatpush1.bf16.msra.mxu0 %v1440_v37  ;;  %1559 = vmatprep.subr.bf16.mxu1 %v1528_v14  ;;  %v1529_v37 = vpack.c.bf16 %v1318_v28, %v1316_v27  ;;  %v1320_v42 = vld [vmem:[%s7260_s5 + $0xa0] sm:$0xff]  ;;  %v1322_v43 = vld [vmem:[%s7260_s5 + $0xb0] sm:$0xff]  ;;  %v1325_v44 = vld [vmem:[%s7260_s5 + $0xc8] sm:$0xff]  ;;  %v1453_v45 = vpack.c.bf16 %v1283_v34, %v1281_v33  ;;  %v1452_v54 = vpack.c.bf16 %v1282_v36, %v1280_v35 }
  0x28   :  { %1484 = vmatprep.subr.bf16.mxu0 %v1443_v40  ;;  %v1287_v40 = vld [vmem:[%s7258_s26 + $0x198] sm:$0xff]  ;;  %v1324_v47 = vld [vmem:[%s7260_s5 + $0xc0] sm:$0xff]  ;;  %v1326_v48 = vld [vmem:[%s7260_s5 + $0xd0] sm:$0xff]  ;;  %v1531_v51 = vpack.c.bf16 %v1322_v43, %v1320_v42 }
  0x29   :  { %v1327_v46 = vld [vmem:[%s7260_s5 + $0xd8] sm:$0xff]  ;;  %v1284_v49 = vld [vmem:[%s7258_s26 + $0x180] sm:$0xff]  ;;  %v1329_v52 = vld [vmem:[%s7260_s5 + $0xe8] sm:$0xff]  ;;  %v1455_v58 = vpack.c.bf16 %v1287_v40, %v1285_v39  ;;  %v1533_v63 = vpack.c.bf16 %v1326_v48, %v1324_v47 }
  0x2a   :  { %1560 = vmatpush1.bf16.msra.mxu1 %v1527_v23  ;;  %v1331_v53 = vld [vmem:[%s7260_s5 + $0xf8] sm:$0xff]  ;;  %v1289_v55 = vld [vmem:[%s7258_s26 + $0x1a8] sm:$0xff]  ;;  %v1534_v57 = vpack.c.bf16 %v1327_v46, %v1325_v44  ;;  %v1328_v59 = vld [vmem:[%s7260_s5 + $0xe0] sm:$0xff] }
  0x2b   :  { %1485 = vmatpush1.bf16.msra.mxu0 %v1442_v50  ;;  %1561 = vmatprep.subr.bf16.mxu1 %v1530_v26  ;;  %v1286_v50 = vld [vmem:[%s7258_s26 + $0x190] sm:$0xff]  ;;  %v1288_v61 = vld [vmem:[%s7258_s26 + $0x1a0] sm:$0xff]  ;;  %v1335_v1 = vld [vmem:[%s7260_s5 + $0x118] sm:$0xff] }
  0x2c   :  { %1486 = vmatprep.subr.bf16.mxu0 %v1445_v56  ;;  %v1291_v56 = vld [vmem:[%s7258_s26 + $0x1b8] sm:$0xff]  ;;  %v1330_v60 = vld [vmem:[%s7260_s5 + $0xf0] sm:$0xff]  ;;  %v1454_v2 = vpack.c.bf16 %v1286_v50, %v1284_v49  ;;  %v1293_v3 = vld [vmem:[%s7258_s26 + $0x1c8] sm:$0xff] }
  0x2d   :  { %v1290_v62 = vld [vmem:[%s7258_s26 + $0x1b0] sm:$0xff]  ;;  %v1295_v4 = vld [vmem:[%s7258_s26 + $0x1d8] sm:$0xff]  ;;  %v1457_v6 = vpack.c.bf16 %v1291_v56, %v1289_v55  ;;  %v1332_v7 = vld [vmem:[%s7260_s5 + $0x100] sm:$0xff]  ;;  %v1535_v11 = vpack.c.bf16 %v1330_v60, %v1328_v59 }
  0x2e   :  { %1562 = vmatpush1.bf16.msra.mxu1 %v1529_v37  ;;  %v1334_v8 = vld [vmem:[%s7260_s5 + $0x110] sm:$0xff]  ;;  %v1292_v9 = vld [vmem:[%s7258_s26 + $0x1c0] sm:$0xff]  ;;  %v1339_v13 = vld [vmem:[%s7260_s5 + $0x138] sm:$0xff]  ;;  %v1456_v14 = vpack.c.bf16 %v1290_v62, %v1288_v61  ;;  %v1459_v18 = vpack.c.bf16 %v1295_v4, %v1293_v3 }
  0x2f   :  { %1487 = vmatpush1.bf16.msra.mxu0 %v1444_v0  ;;  %1563 = vmatprep.subr.bf16.mxu1 %v1532_v41  ;;  %v1333_v0 = vld [vmem:[%s7260_s5 + $0x108] sm:$0xff]  ;;  %v1294_v10 = vld [vmem:[%s7258_s26 + $0x1d0] sm:$0xff]  ;;  %v1299_v16 = vld [vmem:[%s7258_s26 + $0x1f8] sm:$0xff]  ;;  %v1537_v23 = vpack.c.bf16 %v1334_v8, %v1332_v7 }
  0x30   :  { %1488 = vmatprep.subr.bf16.mxu0 %v1447_v5  ;;  %v1536_v5 = vpack.c.bf16 %v1331_v53, %v1329_v52  ;;  %v1297_v15 = vld [vmem:[%s7258_s26 + $0x1e8] sm:$0xff]  ;;  %v1336_v19 = vld [vmem:[%s7260_s5 + $0x120] sm:$0xff]  ;;  %v1338_v20 = vld [vmem:[%s7260_s5 + $0x130] sm:$0xff]  ;;  %v1458_v26 = vpack.c.bf16 %v1294_v10, %v1292_v9 }
  0x31   :  { %v1296_v21 = vld [vmem:[%s7258_s26 + $0x1e0] sm:$0xff]  ;;  %v1298_v22 = vld [vmem:[%s7258_s26 + $0x1f0] sm:$0xff]  ;;  %v1343_v25 = vld [vmem:[%s7260_s5 + $0x158] sm:$0xff]  ;;  %v1461_v28 = vpack.c.bf16 %v1299_v16, %v1297_v15  ;;  %v1539_v31 = vpack.c.bf16 %v1338_v20, %v1336_v19 }
  0x32   :  { %1564 = vmatpush1.bf16.msra.mxu1 %v1531_v51  ;;  %v1342_v30 = vld [vmem:[%s7260_s5 + $0x150] sm:$0xff]  ;;  %v1345_v32 = vld [vmem:[%s7260_s5 + $0x168] sm:$0xff]  ;;  %v1347_v33 = vld [vmem:[%s7260_s5 + $0x178] sm:$0xff]  ;;  %v1460_v34 = vpack.c.bf16 %v1298_v22, %v1296_v21 }
  0x33   :  { %1489 = vmatpush1.bf16.msra.mxu0 %v1446_v12  ;;  %1565 = vmatprep.subr.bf16.mxu1 %v1534_v57  ;;  %v1337_v12 = vld [vmem:[%s7260_s5 + $0x128] sm:$0xff] }
  0x34   :  { %1490 = vmatprep.subr.bf16.mxu0 %v1449_v17  ;;  %v1538_v17 = vpack.c.bf16 %v1335_v1, %v1333_v0  ;;  %v1540_v27 = vpack.c.bf16 %v1339_v13, %v1337_v12 }
  0x36   :  { %1566 = vmatpush1.bf16.msra.mxu1 %v1533_v63 }
  0x37   :  { %1491 = vmatpush1.bf16.msra.mxu0 %v1448_v24  ;;  %1567 = vmatprep.subr.bf16.mxu1 %v1536_v5  ;;  %v1341_v24 = vld [vmem:[%s7260_s5 + $0x148] sm:$0xff] }
  0x38   :  { %1492 = vmatprep.subr.bf16.mxu0 %v1451_v29  ;;  %v1340_v29 = vld [vmem:[%s7260_s5 + $0x140] sm:$0xff]  ;;  %v1542_v35 = vpack.c.bf16 %v1343_v25, %v1341_v24 }
  0x3a   :  { %1568 = vmatpush1.bf16.msra.mxu1 %v1535_v11 }
  0x3b   :  { %1493 = vmatpush1.bf16.msra.mxu0 %v1450_v38  ;;  %1569 = vmatprep.subr.bf16.mxu1 %v1538_v17 }
  0x3c   :  { %1494 = vmatprep.subr.bf16.mxu0 %v1453_v45 }
  0x3e   :  { %1570 = vmatpush1.bf16.msra.mxu1 %v1537_v23 }
  0x3f   :  { %1495 = vmatpush1.bf16.msra.mxu0 %v1452_v54  ;;  %1571 = vmatprep.subr.bf16.mxu1 %v1540_v27 }
  0x40   :  { %1496 = vmatprep.subr.bf16.mxu0 %v1455_v58 }
  0x43   :  { %1497 = vmatpush1.bf16.msra.mxu0 %v1454_v2 }
  0x44   :  { %1498 = vmatprep.subr.bf16.mxu0 %v1457_v6 }
  0x47   :  { %1499 = vmatpush1.bf16.msra.mxu0 %v1456_v14 }
  0x48   :  { %1500 = vmatprep.subr.bf16.mxu0 %v1459_v18 }
  0x4b   :  { %1501 = vmatpush1.bf16.msra.mxu0 %v1458_v26 }
  0x4c   :  { %1502 = vmatprep.subr.bf16.mxu0 %v1461_v28 }
  0x4d   :  { %28 = vsyncpa [#allocation4], 0  ;;  %v3158_v36 = vld [vmem:[%s7259_s0] ss:$8 sps:$4 sm:$0xff]   ;;  %1572 = vmatpush1.bf16.msra.mxu1 %v1539_v31  ;;  %v1541_v37 = vpack.c.bf16 %v1342_v30, %v1340_v29  ;;  %v1544_v38 = vpack.c.bf16 %v1347_v33, %v1345_v32  ;;  %v1346_v40 = vld [vmem:[%s7260_s5 + $0x170] sm:$0xff]  ;;  %s7261_s27 = sld [smem:[#allocation44_spill]] }
  0x4e   :  { %1573 = vmatprep.subr.bf16.mxu1 %v1542_v35  ;;  %v1344_v39 = vld [vmem:[%s7260_s5 + $0x160] sm:$0xff]  ;;  %v1349_v41 = vld [vmem:[%s7260_s5 + $0x188] sm:$0xff]  ;;  %v1351_v42 = vld [vmem:[%s7260_s5 + $0x198] sm:$0xff]  ;;  %s7263_s24 = sld [smem:[#allocation42_spill]]  ;;  %s7265_s3 = sld [smem:[#allocation43_spill]]  ;;  %vm2932_vm1 = vcmask 64512  }
  0x4f   :  { %1503 = vmatpush1.bf16.msra.mxu0 %v1460_v34  ;;  %v1543_v43 = vpack.c.bf16 %v1346_v40, %v1344_v39  ;;  %v1546_v44 = vpack.c.bf16 %v1351_v42, %v1349_v41  ;;  %v1348_v45 = vld [vmem:[%s7260_s5 + $0x180] sm:$0xff]  ;;  %v1350_v46 = vld [vmem:[%s7260_s5 + $0x190] sm:$0xff]  ;;  %v1353_v47 = vld [vmem:[%s7260_s5 + $0x1a8] sm:$0xff]  ;;  %s65_s22 = ssub.f32 1.0, %s7167_s15  ;;  %s7453_s16 = sld [smem:[#allocation46_spill]]  ;;  %vm2946_vm2 = vcmask 7168  }
  0x50   :  { %v1355_v48 = vld [vmem:[%s7260_s5 + $0x1b8] sm:$0xff]  ;;  %v1545_v49 = vpack.c.bf16 %v1350_v46, %v1348_v45  ;;  %v1352_v51 = vld [vmem:[%s7260_s5 + $0x1a0] sm:$0xff]  ;;  %v1354_v52 = vld [vmem:[%s7260_s5 + $0x1b0] sm:$0xff]  ;;  %vm3051_vm3 = vcmask 0  }
  0x51   :  { %1574 = vmatpush1.bf16.msra.mxu1 %v1541_v37  ;;  %v1548_v50 = vpack.c.bf16 %v1355_v48, %v1353_v47  ;;  %v1547_v53 = vpack.c.bf16 %v1354_v52, %v1352_v51  ;;  %v1357_v54 = vld [vmem:[%s7260_s5 + $0x1c8] sm:$0xff]  ;;  %v1359_v55 = vld [vmem:[%s7260_s5 + $0x1d8] sm:$0xff]  ;;  %v1356_v57 = vld [vmem:[%s7260_s5 + $0x1c0] sm:$0xff] }
  0x52   :  { %1505 = vmatmul.mubr.bf16.vlgmr.msra.gmra.mrb[0].mxu0 %v3158_v36  ;;  %1575 = vmatprep.subr.bf16.mxu1 %v1544_v38  ;;  %v1550_v56 = vpack.c.bf16 %v1359_v55, %v1357_v54  ;;  %v1358_v58 = vld [vmem:[%s7260_s5 + $0x1d0] sm:$0xff]  ;;  %v1361_v60 = vld [vmem:[%s7260_s5 + $0x1e8] sm:$0xff]  ;;  %v1363_v61 = vld [vmem:[%s7260_s5 + $0x1f8] sm:$0xff] }
  0x53   :  { %v1549_v59 = vpack.c.bf16 %v1358_v58, %v1356_v57  ;;  %v1552_v62 = vpack.c.bf16 %v1363_v61, %v1361_v60  ;;  %v1360_v63 = vld [vmem:[%s7260_s5 + $0x1e0] sm:$0xff]  ;;  %v1362_v0 = vld [vmem:[%s7260_s5 + $0x1f0] sm:$0xff]  ;;  %v1367_v2 = vld [vmem:[%s7261_s27 + $0x8] sm:$0xff] }
  0x54   :  { %v1551_v1 = vpack.c.bf16 %v1362_v0, %v1360_v63  ;;  %v1369_v3 = vld [vmem:[%s7261_s27 + $0x18] sm:$0xff]  ;;  %v1366_v4 = vld [vmem:[%s7261_s27] sm:$0xff]  ;;  %v1368_v6 = vld [vmem:[%s7261_s27 + $0x10] sm:$0xff] }
  0x55   :  { %1576 = vmatpush1.bf16.msra.mxu1 %v1543_v43  ;;  %v1710_v5 = vpack.c.bf16 %v1369_v3, %v1367_v2  ;;  %v1709_v7 = vpack.c.bf16 %v1368_v6, %v1366_v4  ;;  %v1371_v18 = vld [vmem:[%s7261_s27 + $0x28] sm:$0xff]  ;;  %v1373_v19 = vld [vmem:[%s7261_s27 + $0x38] sm:$0xff]  ;;  %v1370_v21 = vld [vmem:[%s7261_s27 + $0x20] sm:$0xff] }
  0x56   :  { %1577 = vmatprep.subr.bf16.mxu1 %v1546_v44  ;;  %v1712_v20 = vpack.c.bf16 %v1373_v19, %v1371_v18  ;;  %v1372_v22 = vld [vmem:[%s7261_s27 + $0x30] sm:$0xff]  ;;  %v1375_v24 = vld [vmem:[%s7261_s27 + $0x48] sm:$0xff]  ;;  %v1377_v25 = vld [vmem:[%s7261_s27 + $0x58] sm:$0xff] }
  0x57   :  { %1741 = vmatprep.subr.bf16.mxu0 %v1710_v5  ;;  %v1711_v23 = vpack.c.bf16 %v1372_v22, %v1370_v21  ;;  %v1714_v26 = vpack.c.bf16 %v1377_v25, %v1375_v24  ;;  %v1374_v27 = vld [vmem:[%s7261_s27 + $0x40] sm:$0xff]  ;;  %v1376_v28 = vld [vmem:[%s7261_s27 + $0x50] sm:$0xff]  ;;  %v1379_v30 = vld [vmem:[%s7261_s27 + $0x68] sm:$0xff] }
  0x58   :  { %1742 = vmatpush1.bf16.msra.mxu0 %v1709_v7  ;;  %v1713_v29 = vpack.c.bf16 %v1376_v28, %v1374_v27  ;;  %v1381_v31 = vld [vmem:[%s7261_s27 + $0x78] sm:$0xff]  ;;  %v1378_v33 = vld [vmem:[%s7261_s27 + $0x60] sm:$0xff]  ;;  %v1380_v34 = vld [vmem:[%s7261_s27 + $0x70] sm:$0xff] }
  0x59   :  { %1578 = vmatpush1.bf16.msra.mxu1 %v1545_v49  ;;  %1743 = vmatprep.subr.bf16.mxu0 %v1712_v20  ;;  %v1716_v32 = vpack.c.bf16 %v1381_v31, %v1379_v30  ;;  %v1715_v35 = vpack.c.bf16 %v1380_v34, %v1378_v33  ;;  %v1383_v36 = vld [vmem:[%s7261_s27 + $0x88] sm:$0xff]  ;;  %v1385_v37 = vld [vmem:[%s7261_s27 + $0x98] sm:$0xff]  ;;  %v1382_v39 = vld [vmem:[%s7261_s27 + $0x80] sm:$0xff] }
  0x5a   :  { %1579 = vmatprep.subr.bf16.mxu1 %v1548_v50  ;;  %v1718_v38 = vpack.c.bf16 %v1385_v37, %v1383_v36  ;;  %v1384_v40 = vld [vmem:[%s7261_s27 + $0x90] sm:$0xff]  ;;  %v1387_v42 = vld [vmem:[%s7261_s27 + $0xa8] sm:$0xff]  ;;  %v1389_v43 = vld [vmem:[%s7261_s27 + $0xb8] sm:$0xff] }
  0x5b   :  { %v1717_v41 = vpack.c.bf16 %v1384_v40, %v1382_v39  ;;  %v1720_v44 = vpack.c.bf16 %v1389_v43, %v1387_v42  ;;  %v1386_v45 = vld [vmem:[%s7261_s27 + $0xa0] sm:$0xff]  ;;  %v1388_v46 = vld [vmem:[%s7261_s27 + $0xb0] sm:$0xff]  ;;  %v1391_v48 = vld [vmem:[%s7261_s27 + $0xc8] sm:$0xff] }
  0x5c   :  { %1744 = vmatpush1.bf16.msra.mxu0 %v1711_v23  ;;  %v1719_v47 = vpack.c.bf16 %v1388_v46, %v1386_v45  ;;  %v1393_v49 = vld [vmem:[%s7261_s27 + $0xd8] sm:$0xff]  ;;  %v1390_v51 = vld [vmem:[%s7261_s27 + $0xc0] sm:$0xff]  ;;  %v1392_v52 = vld [vmem:[%s7261_s27 + $0xd0] sm:$0xff] }
  0x5d   :  { %1580 = vmatpush1.bf16.msra.mxu1 %v1547_v53  ;;  %1745 = vmatprep.subr.bf16.mxu0 %v1714_v26  ;;  %v1722_v50 = vpack.c.bf16 %v1393_v49, %v1391_v48  ;;  %v1721_v53 = vpack.c.bf16 %v1392_v52, %v1390_v51  ;;  %v1395_v54 = vld [vmem:[%s7261_s27 + $0xe8] sm:$0xff]  ;;  %v1397_v55 = vld [vmem:[%s7261_s27 + $0xf8] sm:$0xff]  ;;  %v1394_v57 = vld [vmem:[%s7261_s27 + $0xe0] sm:$0xff] }
  0x5e   :  { %1581 = vmatprep.subr.bf16.mxu1 %v1550_v56  ;;  %v1724_v56 = vpack.c.bf16 %v1397_v55, %v1395_v54  ;;  %v1396_v58 = vld [vmem:[%s7261_s27 + $0xf0] sm:$0xff]  ;;  %v1399_v60 = vld [vmem:[%s7261_s27 + $0x108] sm:$0xff]  ;;  %v1401_v61 = vld [vmem:[%s7261_s27 + $0x118] sm:$0xff] }
  0x5f   :  { %v1398_v63 = vld [vmem:[%s7261_s27 + $0x100] sm:$0xff]  ;;  %v1400_v0 = vld [vmem:[%s7261_s27 + $0x110] sm:$0xff]  ;;  %v1403_v2 = vld [vmem:[%s7261_s27 + $0x128] sm:$0xff] }
  0x60   :  { %1746 = vmatpush1.bf16.msra.mxu0 %v1713_v29  ;;  %v1405_v3 = vld [vmem:[%s7261_s27 + $0x138] sm:$0xff]  ;;  %v1402_v5 = vld [vmem:[%s7261_s27 + $0x120] sm:$0xff]  ;;  %v1404_v6 = vld [vmem:[%s7261_s27 + $0x130] sm:$0xff] }
  0x61   :  { %1582 = vmatpush1.bf16.msra.mxu1 %v1549_v59  ;;  %1747 = vmatprep.subr.bf16.mxu0 %v1716_v32  ;;  %v1723_v59 = vpack.c.bf16 %v1396_v58, %v1394_v57  ;;  %v1728_v4 = vpack.c.bf16 %v1405_v3, %v1403_v2  ;;  %v1727_v7 = vpack.c.bf16 %v1404_v6, %v1402_v5  ;;  %v1412_v18 = vld [vmem:[%s7261_s27 + $0x170] sm:$0xff]  ;;  %v1415_v20 = vld [vmem:[%s7261_s27 + $0x188] sm:$0xff]  ;;  %v1417_v21 = vld [vmem:[%s7261_s27 + $0x198] sm:$0xff] }
  0x62   :  { %1583 = vmatprep.subr.bf16.mxu1 %v1552_v62  ;;  %v1726_v62 = vpack.c.bf16 %v1401_v61, %v1399_v60  ;;  %v1734_v22 = vpack.c.bf16 %v1417_v21, %v1415_v20  ;;  %v1414_v23 = vld [vmem:[%s7261_s27 + $0x180] sm:$0xff]  ;;  %v1416_v24 = vld [vmem:[%s7261_s27 + $0x190] sm:$0xff]  ;;  %v1419_v26 = vld [vmem:[%s7261_s27 + $0x1a8] sm:$0xff] }
  0x63   :  { %v1733_v25 = vpack.c.bf16 %v1416_v24, %v1414_v23  ;;  %v1421_v27 = vld [vmem:[%s7261_s27 + $0x1b8] sm:$0xff]  ;;  %v1418_v29 = vld [vmem:[%s7261_s27 + $0x1a0] sm:$0xff]  ;;  %v1420_v30 = vld [vmem:[%s7261_s27 + $0x1b0] sm:$0xff] }
  0x64   :  { %1748 = vmatpush1.bf16.msra.mxu0 %v1715_v35  ;;  %v1736_v28 = vpack.c.bf16 %v1421_v27, %v1419_v26  ;;  %v1735_v31 = vpack.c.bf16 %v1420_v30, %v1418_v29  ;;  %v1423_v32 = vld [vmem:[%s7261_s27 + $0x1c8] sm:$0xff]  ;;  %v1425_v33 = vld [vmem:[%s7261_s27 + $0x1d8] sm:$0xff]  ;;  %v1422_v35 = vld [vmem:[%s7261_s27 + $0x1c0] sm:$0xff] }
  0x65   :  { %1584 = vmatpush1.bf16.msra.mxu1 %v1551_v1  ;;  %1749 = vmatprep.subr.bf16.mxu0 %v1718_v38  ;;  %v1725_v1 = vpack.c.bf16 %v1400_v0, %v1398_v63  ;;  %v1738_v34 = vpack.c.bf16 %v1425_v33, %v1423_v32  ;;  %v1424_v36 = vld [vmem:[%s7261_s27 + $0x1d0] sm:$0xff]  ;;  %v1427_v38 = vld [vmem:[%s7261_s27 + $0x1e8] sm:$0xff]  ;;  %v1429_v39 = vld [vmem:[%s7261_s27 + $0x1f8] sm:$0xff] }
  0x66   :  { %v1737_v37 = vpack.c.bf16 %v1424_v36, %v1422_v35  ;;  %v1426_v40 = vld [vmem:[%s7261_s27 + $0x1e0] sm:$0xff]  ;;  %v1428_v42 = vld [vmem:[%s7261_s27 + $0x1f0] sm:$0xff] }
  0x67   :  { %v1739_v43 = vpack.c.bf16 %v1428_v42, %v1426_v40  ;;  %v3163_v45 = vld [vmem:[%s7163_s11 + $0x4] ss:$8 sps:$4 sm:$0xff]   ;;  %v3166_v46 = vld [vmem:[%s7163_s11 + $0x14] ss:$8 sps:$4 sm:$0xff]   ;;  %v3167_v49 = vld [vmem:[%s7163_s11 + $0x20] ss:$8 sps:$4 sm:$0xff]  }
  0x68   :  { %1750 = vmatpush1.bf16.msra.mxu0 %v1717_v41  ;;  %v1740_v41 = vpack.c.bf16 %v1429_v39, %v1427_v38  ;;  %2054 = vmatprep.subr.bf16.mxu1 %v3163_v45  ;;  %v3169_v48 = vld [vmem:[%s7163_s11 + $0x24] ss:$8 sps:$4 sm:$0xff]  }
  0x69   :  { %1751 = vmatprep.subr.bf16.mxu0 %v1720_v44  ;;  %v3161_v44 = vld [vmem:[%s7163_s11] ss:$8 sps:$4 sm:$0xff]  }
  0x6c   :  { %1752 = vmatpush1.bf16.msra.mxu0 %v1719_v47  ;;  %v3164_v47 = vld [vmem:[%s7163_s11 + $0x10] ss:$8 sps:$4 sm:$0xff]  }
  0x6d   :  { %1753 = vmatprep.subr.bf16.mxu0 %v1722_v50 }
  0x70   :  { %1754 = vmatpush1.bf16.msra.mxu0 %v1721_v53 }
  0x71   :  { %1755 = vmatprep.subr.bf16.mxu0 %v1724_v56 }
  0x74   :  { %1756 = vmatpush1.bf16.msra.mxu0 %v1723_v59 }
  0x75   :  { %1757 = vmatprep.subr.bf16.mxu0 %v1726_v62 }
  0x78   :  { %1758 = vmatpush1.bf16.msra.mxu0 %v1725_v1 }
  0x79   :  { %1759 = vmatprep.subr.bf16.mxu0 %v1728_v4 }
  0x7c   :  { %1760 = vmatpush1.bf16.msra.mxu0 %v1727_v7 }
 0x125   :  { %v1506_v8 = vpop.f32.mrb[0].mxu0 }
 0x126   :  { %v1508_v9 = vpop.f32.mrb[1].mxu0  ;;  %v1515_v11 = vmax.f32 %v1506_v8, 0.0  ;;  %v1407_v8 = vld [vmem:[%s7261_s27 + $0x148] sm:$0xff] }
 0x127   :  { %v1510_v10 = vpop.f32.mrb[2].mxu0  ;;  %v1516_v14 = vmax.f32 %v1508_v9, 0.0  ;;  %v1409_v9 = vld [vmem:[%s7261_s27 + $0x158] sm:$0xff] }
 0x128   :  { %v1517_v12 = vmax.f32 %v1510_v10, 0.0  ;;  %v1512_v13 = vpop.f32.mrb[3].mxu0  ;;  %v1730_v10 = vpack.c.bf16 %v1409_v9, %v1407_v8 }
 0x129   :  { %v1518_v15 = vmax.f32 %v1512_v13, 0.0 }
 0x12a   :  { %v1519_v16 = vpack.c.bf16 %v1517_v12, %v1515_v11  ;;  %v1406_v11 = vld [vmem:[%s7261_s27 + $0x140] sm:$0xff]  ;;  %v1408_v12 = vld [vmem:[%s7261_s27 + $0x150] sm:$0xff]  ;;  %1761 = vmatprep.subr.bf16.mxu0 %v1730_v10 }
 0x12b   :  { %v1520_v17 = vpack.c.bf16 %v1518_v15, %v1516_v14  ;;  %v1729_v13 = vpack.c.bf16 %v1408_v12, %v1406_v11  ;;  %v1411_v14 = vld [vmem:[%s7261_s27 + $0x168] sm:$0xff]  ;;  %v1413_v15 = vld [vmem:[%s7261_s27 + $0x178] sm:$0xff] }
 0x12d   :  { %1585 = vmatprep.mubr.bf16.mxu1 %v1520_v17  ;;  %1762 = vmatpush1.bf16.msra.mxu0 %v1729_v13  ;;  %v1410_v17 = vld [vmem:[%s7261_s27 + $0x160] sm:$0xff] }
 0x12e   :  { %1586 = vmatmul.mubr.bf16.vlgmr.msra.gmra.mrb[0].mxu1 %v1519_v16  ;;  %v1732_v16 = vpack.c.bf16 %v1413_v15, %v1411_v14  ;;  %v1731_v19 = vpack.c.bf16 %v1412_v18, %v1410_v17 }
 0x12f   :  { %2055 = vmatpush1.bf16.msra.mxu1 %v3161_v44 }
 0x130   :  { %1763 = vmatprep.subr.bf16.mxu0 %v1732_v16  ;;  %2056 = vmatprep.subr.bf16.mxu1 %v3166_v46 }
 0x131   :  { %1764 = vmatpush1.bf16.msra.mxu0 %v1731_v19 }
 0x132   :  { %1765 = vmatprep.subr.bf16.mxu0 %v1734_v22 }
 0x133   :  { %2057 = vmatpush1.bf16.msra.mxu1 %v3164_v47 }
 0x134   :  { %2058 = vmatprep.subr.bf16.mxu1 %v3169_v48 }
 0x135   :  { %1766 = vmatpush1.bf16.msra.mxu0 %v1733_v25 }
 0x136   :  { %1767 = vmatprep.subr.bf16.mxu0 %v1736_v28 }
 0x137   :  { %2059 = vmatpush1.bf16.msra.mxu1 %v3167_v49 }
 0x139   :  { %1768 = vmatpush1.bf16.msra.mxu0 %v1735_v31 }
 0x13a   :  { %1769 = vmatprep.subr.bf16.mxu0 %v1738_v34 }
 0x13d   :  { %1770 = vmatpush1.bf16.msra.mxu0 %v1737_v37 }
 0x13e   :  { %1771 = vmatprep.subr.bf16.mxu0 %v1740_v41 }
 0x141   :  { %1772 = vmatpush1.bf16.msra.mxu0 %v1739_v43 }
 0x201   :  { %v1587_v50 = vpop.f32.mrb[0].mxu1 }
 0x202   :  { %v1596_v51 = vrot.slane %v1587_v50, 4  ;;  %v1589_v52 = vpop.f32.mrb[1].mxu1 }
 0x203   :  { %v1602_v53 = vrot.slane %v1589_v52, 4  ;;  %v1591_v54 = vpop.f32.mrb[2].mxu1 }
 0x204   :  { %v1597_v55 = vadd.f32 %v1596_v51, %v1587_v50  ;;  %v1608_v56 = vrot.slane %v1591_v54, 4  ;;  %v1593_v57 = vpop.f32.mrb[3].mxu1 }
 0x205   :  { %v1603_v58 = vadd.f32 %v1602_v53, %v1589_v52  ;;  %v1614_v59 = vrot.slane %v1593_v57, 4 }
 0x206   :  { %v1598_v60 = vrot.slane %v1597_v55, 2  ;;  %v1609_v61 = vadd.f32 %v1608_v56, %v1591_v54 }
 0x207   :  { %v1604_v62 = vrot.slane %v1603_v58, 2  ;;  %v1615_v63 = vadd.f32 %v1614_v59, %v1593_v57 }
 0x208   :  { %v1599_v0 = vadd.f32 %v1598_v60, %v1597_v55  ;;  %v1610_v1 = vrot.slane %v1609_v61, 2 }
 0x209   :  { %v1605_v2 = vadd.f32 %v1604_v62, %v1603_v58  ;;  %v1616_v3 = vrot.slane %v1615_v63, 2 }
 0x20a   :  { %v1600_v4 = vrot.slane %v1599_v0, 1  ;;  %v1611_v5 = vadd.f32 %v1610_v1, %v1609_v61  ;;  %v1364_v61 = vld [vmem:[%s7263_s24] sm:$0x3] }
 0x20b   :  { %v1606_v6 = vrot.slane %v1605_v2, 1  ;;  %v1617_v7 = vadd.f32 %v1616_v3, %v1615_v63  ;;  %v1365_v63 = vld [vmem:[%s7265_s3] sm:$0x3] }
 0x20c   :  { %v1601_v8 = vadd.f32 %v1600_v4, %v1599_v0  ;;  %v1612_v9 = vrot.slane %v1611_v5, 1 }
 0x20d   :  { %v1607_v10 = vadd.f32 %v1606_v6, %v1605_v2  ;;  %v1618_v11 = vrot.slane %v1617_v7, 1 }
 0x20e   :  { %v1621_v12 = vmul.f32 0.125, %v1601_v8  ;;  %v1613_v13 = vadd.f32 %v1612_v9, %v1611_v5 }
 0x20f   :  { %v1622_v14 = vmul.f32 0.125, %v1607_v10  ;;  %v1619_v15 = vadd.f32 %v1618_v11, %v1617_v7 }
 0x210   :  { %v1625_v16 = vsub.f32 %v1587_v50, %v1621_v12  ;;  %v1623_v17 = vmul.f32 0.125, %v1613_v13  ;;  %v7181_v50 = vlaneseq }
 0x211   :  { %v1626_v18 = vsub.f32 %v1589_v52, %v1622_v14  ;;  %v1624_v19 = vmul.f32 0.125, %v1619_v15 }
 0x212   :  { %v1629_v20 = vmul.f32 %v1625_v16, %v1625_v16  ;;  %v1627_v21 = vsub.f32 %v1591_v54, %v1623_v17  ;;  %v1675_v58 = vshrl.u32 %v7181_v50, 7 }
 0x213   :  { %v1630_v22 = vmul.f32 %v1626_v18, %v1626_v18  ;;  %v1628_v23 = vsub.f32 %v1593_v57, %v1624_v19 }
 0x214   :  { %v1633_v24 = vrot.slane %v1629_v20, 4  ;;  %v1631_v25 = vmul.f32 %v1627_v21, %v1627_v21  ;;  %v4051_v60 = vsub.s32 0, %v1675_v58  ;;  %v4056_v62 = vsub.s32 1, %v1675_v58 }
 0x215   :  { %v1639_v26 = vrot.slane %v1630_v22, 4  ;;  %v1632_v27 = vmul.f32 %v1628_v23, %v1628_v23 }
 0x216   :  { %v1634_v28 = vadd.f32 %v1633_v24, %v1629_v20  ;;  %v1645_v29 = vrot.slane %v1631_v25, 4  ;;  %7262 = vst [vmem:[#allocation6_spill] sm:$0xff] %v4051_v60  ;;  %7264 = vst [vmem:[#allocation7_spill] sm:$0xff] %v4056_v62  ;;  %v1677_v0 = vrot.slane %v1364_v61, %v4051_v60  ;;  %v1681_v2 = vrot.slane %v1364_v61, %v4056_v62  ;;  %v66_v61 = vld [vmem:[%s7158_s6] sm:$0xff] }
 0x217   :  { %v1640_v30 = vadd.f32 %v1639_v26, %v1630_v22  ;;  %v1651_v31 = vrot.slane %v1632_v27, 4  ;;  %v1692_v5 = vrot.slane %v1365_v63, %v4051_v60  ;;  %v1696_v8 = vrot.slane %v1365_v63, %v4056_v62  ;;  %v68_v63 = vld [vmem:[%s7158_s6 + $0x10] sm:$0xff] }
 0x218   :  { %v1635_v32 = vrot.slane %v1634_v28, 2  ;;  %v1646_v33 = vadd.f32 %v1645_v29, %v1631_v25  ;;  %v3173_v29 = vld [vmem:[%s7163_s11 + $0x40] ss:$8 sps:$4 sm:$0xff]  }
 0x219   :  { %v1641_v34 = vrot.slane %v1640_v30, 2  ;;  %v1652_v35 = vadd.f32 %v1651_v31, %v1632_v27  ;;  %v3176_v31 = vld [vmem:[%s7163_s11 + $0x50] ss:$8 sps:$4 sm:$0xff]  }
 0x21a   :  { %v1636_v36 = vadd.f32 %v1635_v32, %v1634_v28  ;;  %v1647_v37 = vrot.slane %v1646_v33, 2  ;;  %v3181_v32 = vld [vmem:[%s7163_s11 + $0x64] ss:$8 sps:$4 sm:$0xff]  }
 0x21b   :  { %v1642_v38 = vadd.f32 %v1641_v34, %v1640_v30  ;;  %v1653_v39 = vrot.slane %v1652_v35, 2  ;;  %v3178_v30 = vld [vmem:[%s7163_s11 + $0x54] ss:$8 sps:$4 sm:$0xff]  }
 0x21c   :  { %v1637_v40 = vrot.slane %v1636_v36, 1  ;;  %v1648_v41 = vadd.f32 %v1647_v37, %v1646_v33  ;;  %v3179_v33 = vld [vmem:[%s7163_s11 + $0x60] ss:$8 sps:$4 sm:$0xff]   ;;  %v3184_v34 = vld [vmem:[%s7163_s11 + $0x74] ss:$8 sps:$4 sm:$0xff]  }
 0x21d   :  { %v1643_v42 = vrot.slane %v1642_v38, 1  ;;  %v1654_v43 = vadd.f32 %v1653_v39, %v1652_v35  ;;  %v3182_v35 = vld [vmem:[%s7163_s11 + $0x70] ss:$8 sps:$4 sm:$0xff]   ;;  %v3185_v37 = vld [vmem:[%s7163_s11 + $0x80] ss:$8 sps:$4 sm:$0xff]  }
 0x21e   :  { %v1638_v44 = vadd.f32 %v1637_v40, %v1636_v36  ;;  %v1649_v45 = vrot.slane %v1648_v41, 1  ;;  %v3187_v36 = vld [vmem:[%s7163_s11 + $0x84] ss:$8 sps:$4 sm:$0xff]   ;;  %v3188_v39 = vld [vmem:[%s7163_s11 + $0x90] ss:$8 sps:$4 sm:$0xff]  }
 0x21f   :  { %v1644_v46 = vadd.f32 %v1643_v42, %v1642_v38  ;;  %v1655_v47 = vrot.slane %v1654_v43, 1  ;;  %v3190_v38 = vld [vmem:[%s7163_s11 + $0x94] ss:$8 sps:$4 sm:$0xff]   ;;  %v3193_v40 = vld [vmem:[%s7163_s11 + $0xa4] ss:$8 sps:$4 sm:$0xff]  }
 0x220   :  { %v1657_v48 = vmul.f32 0.125, %v1638_v44  ;;  %v1650_v49 = vadd.f32 %v1649_v45, %v1648_v41  ;;  %v3191_v41 = vld [vmem:[%s7163_s11 + $0xa0] ss:$8 sps:$4 sm:$0xff]   ;;  %v3196_v42 = vld [vmem:[%s7163_s11 + $0xb4] ss:$8 sps:$4 sm:$0xff]  }
 0x221   :  { %v1658_v51 = vmul.f32 0.125, %v1644_v46  ;;  %v1656_v52 = vadd.f32 %v1655_v47, %v1654_v43  ;;  %v3194_v43 = vld [vmem:[%s7163_s11 + $0xb0] ss:$8 sps:$4 sm:$0xff]   ;;  %v3199_v44 = vld [vmem:[%s7163_s11 + $0xc4] ss:$8 sps:$4 sm:$0xff]  }
 0x222   :  { %v1661_v53 = vadd.f32 1e-05, %v1657_v48  ;;  %v1659_v54 = vmul.f32 0.125, %v1650_v49  ;;  %v3197_v45 = vld [vmem:[%s7163_s11 + $0xc0] ss:$8 sps:$4 sm:$0xff]  }
 0x223   :  { %v1662_v55 = vadd.f32 1e-05, %v1658_v51  ;;  %v1660_v56 = vmul.f32 0.125, %v1656_v52  ;;  %v3202_v46 = vld [vmem:[%s7163_s11 + $0xd4] ss:$8 sps:$4 sm:$0xff]  }
 0x224   :  { %3257 = vrsqrt.f32 %v1661_v53  ;;  %v1663_v57 = vadd.f32 1e-05, %v1659_v54  ;;  %v3200_v47 = vld [vmem:[%s7163_s11 + $0xd0] ss:$8 sps:$4 sm:$0xff]   ;;  %v3205_v48 = vld [vmem:[%s7163_s11 + $0xe4] ss:$8 sps:$4 sm:$0xff]  }
 0x225   :  { %3259 = vrsqrt.f32 %v1662_v55  ;;  %v1664_v59 = vadd.f32 1e-05, %v1660_v56  ;;  %v3203_v49 = vld [vmem:[%s7163_s11 + $0xe0] ss:$8 sps:$4 sm:$0xff]   ;;  %v3208_v51 = vld [vmem:[%s7163_s11 + $0xf4] ss:$8 sps:$4 sm:$0xff]   ;;  %v4155_v55 = vstv %s7167_s15 }
 0x226   :  { %3261 = vrsqrt.f32 %v1663_v57  ;;  %v3206_v52 = vld [vmem:[%s7163_s11 + $0xf0] ss:$8 sps:$4 sm:$0xff]   ;;  %v67_v53 = vld [vmem:[%s7158_s6 + $0x8] sm:$0xff]  ;;  %7266 = vst [vmem:[#allocation8_spill] sm:$0xff] %v4155_v55 }
 0x227   :  { %3263 = vrsqrt.f32 %v1664_v59  ;;  %v69_v54 = vld [vmem:[%s7158_s6 + $0x18] sm:$0xff]  ;;  %v196_v56 = vld [vmem:[%s7258_s26 + $0x8] sm:$0xff]  ;;  %v132_v57 = vmul.f32 %v4155_v55, %v67_v53 }
 0x228   :  { %v134_v58 = vmul.f32 %v4155_v55, %v69_v54  ;;  %v198_v59 = vld [vmem:[%s7258_s26 + $0x18] sm:$0xff] }
 0x22e   :  { %v3258_v1 = vpop.eup %3257 }
 0x22f   :  { %v3260_v3 = vpop.eup %3259  ;;  %v1669_v4 = vmul.f32 %v3258_v1, %v1625_v16  ;;  %v131_v1 = vmul.f32 %v4155_v55, %v66_v61 }
 0x230   :  { %v3262_v6 = vpop.eup %3261  ;;  %v1670_v7 = vmul.f32 %v3260_v3, %v1626_v18  ;;  %v3172_v18 = vld [vmem:[%s7163_s11 + $0x34] ss:$8 sps:$4 sm:$0xff]   ;;  %v195_v3 = vld [vmem:[%s7258_s26] sm:$0xff] }
 0x231   :  { %v3264_v9 = vpop.eup %3263  ;;  %v1684_v10 = vmul.f32 %v1677_v0, %v1669_v4  ;;  %v1671_v11 = vmul.f32 %v3262_v6, %v1627_v21  ;;  %v3170_v21 = vld [vmem:[%s7163_s11 + $0x30] ss:$8 sps:$4 sm:$0xff]   ;;  %2060 = vmatprep.subr.bf16.mxu1 %v3172_v18 }
 0x232   :  { %v1685_v12 = vmul.f32 %v1681_v2, %v1670_v7  ;;  %v1672_v13 = vmul.f32 %v3264_v9, %v1628_v23  ;;  %2061 = vmatpush1.bf16.msra.mxu1 %v3170_v21  ;;  %v3175_v23 = vld [vmem:[%s7163_s11 + $0x44] ss:$8 sps:$4 sm:$0xff]   ;;  %v197_v4 = vld [vmem:[%s7258_s26 + $0x10] sm:$0xff]  ;;  %v77_v18 = vld [vmem:[%s7158_s6 + $0x58] sm:$0xff] }
 0x233   :  { %v1699_v14 = vadd.f32 %v1692_v5, %v1684_v10  ;;  %v1686_v15 = vmul.f32 %v1677_v0, %v1671_v11  ;;  %2062 = vmatprep.subr.bf16.mxu1 %v3175_v23  ;;  %v4171_v0 = vstv %s65_s22  ;;  %v73_v10 = vld [vmem:[%s7158_s6 + $0x38] sm:$0xff]  ;;  %v200_v11 = vld [vmem:[%s7258_s26 + $0x28] sm:$0xff] }
 0x234   :  { %v1687_v17 = vmul.f32 %v1681_v2, %v1672_v13  ;;  %v1700_v19 = vadd.f32 %v1696_v8, %v1685_v12  ;;  %7267 = vst [vmem:[#allocation9_spill] sm:$0xff] %v4171_v0  ;;  %v133_v2 = vmul.f32 %v4155_v55, %v68_v63  ;;  %v261_v6 = vmul.f32 %v4171_v0, %v196_v56  ;;  %v202_v12 = vld [vmem:[%s7258_s26 + $0x38] sm:$0xff] }
 0x235   :  { %v1701_v20 = vadd.f32 %v1692_v5, %v1686_v15  ;;  %v1703_v24 = vmax.f32 %v1699_v14, 0.0  ;;  %v71_v5 = vld [vmem:[%s7158_s6 + $0x28] sm:$0xff]  ;;  %v263_v7 = vmul.f32 %v4171_v0, %v198_v59  ;;  %v262_v9 = vmul.f32 %v4171_v0, %v197_v4  ;;  %v207_v4 = vld [vmem:[%s7258_s26 + $0x60] sm:$0xff] }
 0x236   :  { %v1702_v22 = vadd.f32 %v1696_v8, %v1687_v17  ;;  %v1704_v16 = vmax.f32 %v1700_v19, 0.0  ;;  %2063 = vmatpush1.bf16.msra.mxu1 %v3173_v29  ;;  %v260_v8 = vmul.f32 %v4171_v0, %v195_v3  ;;  %v136_v13 = vmul.f32 %v4155_v55, %v71_v5  ;;  %v70_v19 = vld [vmem:[%s7158_s6 + $0x20] sm:$0xff]  ;;  %v209_v5 = vld [vmem:[%s7258_s26 + $0x70] sm:$0xff] }
 0x237   :  { %v1705_v25 = vmax.f32 %v1701_v20, 0.0  ;;  %2064 = vmatprep.subr.bf16.mxu1 %v3178_v30  ;;  %v138_v14 = vmul.f32 %v4155_v55, %v73_v10  ;;  %v265_v15 = vmul.f32 %v4171_v0, %v200_v11  ;;  %v267_v17 = vmul.f32 %v4171_v0, %v202_v12  ;;  %v72_v20 = vld [vmem:[%s7158_s6 + $0x30] sm:$0xff] }
 0x238   :  { %v1706_v26 = vmax.f32 %v1702_v22, 0.0  ;;  %v199_v22 = vld [vmem:[%s7258_s26 + $0x20] sm:$0xff]  ;;  %v135_v29 = vmul.f32 %v4155_v55, %v70_v19  ;;  %v137_v30 = vmul.f32 %v4155_v55, %v72_v20 }
 0x239   :  { %v1707_v27 = vpack.c.bf16 %v1705_v25, %v1703_v24  ;;  %v325_v24 = vadd.f32 %v261_v6, %v132_v57  ;;  %v327_v25 = vadd.f32 %v263_v7, %v134_v58  ;;  %v4223_v21 = vadd.f32 %v265_v15, %v136_v13  ;;  %v210_v58 = vld [vmem:[%s7258_s26 + $0x78] sm:$0xff] }
 0x23a   :  { %v1708_v28 = vpack.c.bf16 %v1706_v26, %v1704_v16  ;;  %2065 = vmatpush1.bf16.msra.mxu1 %v3176_v31  ;;  %v4210_v16 = vadd.f32 %v260_v8, %v131_v1  ;;  %v4212_v26 = vadd.f32 %v262_v9, %v133_v2  ;;  %v4225_v23 = vadd.f32 %v267_v17, %v138_v14  ;;  %v204_v31 = vld [vmem:[%s7258_s26 + $0x48] sm:$0xff] }
 0x23b   :  { %2066 = vmatprep.subr.bf16.mxu1 %v3181_v32  ;;  %v206_v32 = vld [vmem:[%s7258_s26 + $0x58] sm:$0xff]  ;;  %v275_v9 = vmul.f32 %v4171_v0, %v210_v58  ;;  %v272_v13 = vmul.f32 %v4171_v0, %v207_v4  ;;  %v212_v17 = vld [vmem:[%s7258_s26 + $0x88] sm:$0xff]  ;;  %v215_v4 = vld [vmem:[%s7258_s26 + $0xa0] sm:$0xff] }
 0x23c   :  { %1773 = vmatprep.mubr.bf16.mxu0 %v1708_v28  ;;  %v75_v28 = vld [vmem:[%s7158_s6 + $0x48] sm:$0xff] }
 0x23d   :  { %1774 = vmatmul.mubr.bf16.vlgmr.msra.gmra.mrb[4].mxu0 %v1707_v27  ;;  %v201_v27 = vld [vmem:[%s7258_s26 + $0x30] sm:$0xff] }
 0x23e   :  { %2067 = vmatpush1.bf16.msra.mxu1 %v3179_v33  ;;  %v74_v33 = vld [vmem:[%s7158_s6 + $0x40] sm:$0xff] }
 0x23f   :  { %2068 = vmatprep.subr.bf16.mxu1 %v3184_v34  ;;  %389 = vst [vmem:[%s7169_s17 + $0x8] sm:$0xff] %v325_v24  ;;  %391 = vst [vmem:[%s7169_s17 + $0x18] sm:$0xff] %v327_v25  ;;  %v2447_v34 = vpack.c.bf16 %v327_v25, %v325_v24  ;;  %v274_v24 = vmul.f32 %v4171_v0, %v209_v5  ;;  %v214_v25 = vld [vmem:[%s7258_s26 + $0x98] sm:$0xff]  ;;  %v217_v5 = vld [vmem:[%s7258_s26 + $0xb0] sm:$0xff] }
 0x240   :  { %388 = vst [vmem:[%s7169_s17] sm:$0xff] %v4210_v16  ;;  %390 = vst [vmem:[%s7169_s17 + $0x10] sm:$0xff] %v4212_v26 }
 0x242   :  { %2069 = vmatpush1.bf16.msra.mxu1 %v3182_v35 }
 0x243   :  { %2070 = vmatprep.subr.bf16.mxu1 %v3187_v36  ;;  %v264_v36 = vmul.f32 %v4171_v0, %v199_v22 }
 0x246   :  { %2071 = vmatpush1.bf16.msra.mxu1 %v3185_v37  ;;  %v266_v37 = vmul.f32 %v4171_v0, %v201_v27 }
 0x247   :  { %2072 = vmatprep.subr.bf16.mxu1 %v3190_v38  ;;  %v76_v38 = vld [vmem:[%s7158_s6 + $0x50] sm:$0xff] }
 0x248   :  { %393 = vst [vmem:[%s7169_s17 + $0x28] sm:$0xff] %v4223_v21  ;;  %395 = vst [vmem:[%s7169_s17 + $0x38] sm:$0xff] %v4225_v23  ;;  %v141_v54 = vmul.f32 %v4155_v55, %v76_v38 }
 0x24a   :  { %2073 = vmatpush1.bf16.msra.mxu1 %v3188_v39  ;;  %v203_v39 = vld [vmem:[%s7258_s26 + $0x40] sm:$0xff] }
 0x24b   :  { %2074 = vmatprep.subr.bf16.mxu1 %v3193_v40  ;;  %v205_v40 = vld [vmem:[%s7258_s26 + $0x50] sm:$0xff]  ;;  %v268_v56 = vmul.f32 %v4171_v0, %v203_v39 }
 0x24c   :  { %v270_v57 = vmul.f32 %v4171_v0, %v205_v40 }
 0x24e   :  { %2075 = vmatpush1.bf16.msra.mxu1 %v3191_v41  ;;  %v4333_v7 = vadd.f32 %v270_v57, %v141_v54 }
 0x24f   :  { %2076 = vmatprep.subr.bf16.mxu1 %v3196_v42  ;;  %v140_v42 = vmul.f32 %v4155_v55, %v75_v28  ;;  %v78_v59 = vld [vmem:[%s7158_s6 + $0x60] sm:$0xff]  ;;  %v80_v61 = vld [vmem:[%s7158_s6 + $0x70] sm:$0xff] }
 0x250   :  { %v143_v11 = vmul.f32 %v4155_v55, %v78_v59  ;;  %v145_v12 = vmul.f32 %v4155_v55, %v80_v61 }
 0x252   :  { %2077 = vmatpush1.bf16.msra.mxu1 %v3194_v43  ;;  %v142_v43 = vmul.f32 %v4155_v55, %v77_v18  ;;  %v4379_v18 = vadd.f32 %v272_v13, %v143_v11 }
 0x253   :  { %2078 = vmatprep.subr.bf16.mxu1 %v3199_v44  ;;  %v269_v44 = vmul.f32 %v4171_v0, %v204_v31  ;;  %v277_v31 = vmul.f32 %v4171_v0, %v212_v17  ;;  %v282_v17 = vmul.f32 %v4171_v0, %v217_v5 }
 0x255   :  { %v4293_v53 = vadd.f32 %v269_v44, %v140_v42 }
 0x256   :  { %2079 = vmatpush1.bf16.msra.mxu1 %v3197_v45  ;;  %v4278_v45 = vadd.f32 %v264_v36, %v135_v29  ;;  %v4400_v36 = vadd.f32 %v274_v24, %v145_v12  ;;  %v280_v12 = vmul.f32 %v4171_v0, %v215_v4  ;;  %v224_v4 = vld [vmem:[%s7258_s26 + $0xe8] sm:$0xff] }
 0x257   :  { %2080 = vmatprep.subr.bf16.mxu1 %v3202_v46  ;;  %v4280_v46 = vadd.f32 %v266_v37, %v137_v30  ;;  %v279_v37 = vmul.f32 %v4171_v0, %v214_v25 }
 0x25a   :  { %2081 = vmatpush1.bf16.msra.mxu1 %v3200_v47  ;;  %v271_v47 = vmul.f32 %v4171_v0, %v206_v32  ;;  %v211_v32 = vld [vmem:[%s7258_s26 + $0x80] sm:$0xff] }
 0x25b   :  { %2082 = vmatprep.subr.bf16.mxu1 %v3205_v48  ;;  %v139_v48 = vmul.f32 %v4155_v55, %v74_v33  ;;  %v213_v33 = vld [vmem:[%s7258_s26 + $0x90] sm:$0xff]  ;;  %v276_v42 = vmul.f32 %v4171_v0, %v211_v32 }
 0x25c   :  { %v4317_v1 = vadd.f32 %v271_v47, %v142_v43  ;;  %v278_v43 = vmul.f32 %v4171_v0, %v213_v33 }
 0x25d   :  { %v4331_v6 = vadd.f32 %v268_v56, %v139_v48  ;;  %v216_v48 = vld [vmem:[%s7258_s26 + $0xa8] sm:$0xff]  ;;  %v218_v56 = vld [vmem:[%s7258_s26 + $0xb8] sm:$0xff] }
 0x25e   :  { %2083 = vmatpush1.bf16.msra.mxu1 %v3203_v49  ;;  %v79_v49 = vld [vmem:[%s7158_s6 + $0x68] sm:$0xff] }
 0x25f   :  { %2084 = vmatprep.subr.bf16.mxu1 %v3208_v51  ;;  %v81_v51 = vld [vmem:[%s7158_s6 + $0x78] sm:$0xff]  ;;  %v144_v2 = vmul.f32 %v4155_v55, %v79_v49 }
 0x260   :  { %392 = vst [vmem:[%s7169_s17 + $0x20] sm:$0xff] %v4278_v45  ;;  %394 = vst [vmem:[%s7169_s17 + $0x30] sm:$0xff] %v4280_v46  ;;  %v146_v3 = vmul.f32 %v4155_v55, %v81_v51 }
 0x261   :  { %397 = vst [vmem:[%s7169_s17 + $0x48] sm:$0xff] %v4293_v53  ;;  %399 = vst [vmem:[%s7169_s17 + $0x58] sm:$0xff] %v4317_v1 }
 0x262   :  { %2085 = vmatpush1.bf16.msra.mxu1 %v3206_v52  ;;  %v208_v52 = vld [vmem:[%s7258_s26 + $0x68] sm:$0xff]  ;;  %v4367_v22 = vadd.f32 %v275_v9, %v146_v3  ;;  %v283_v3 = vmul.f32 %v4171_v0, %v218_v56 }
 0x263   :  { %2478 = vmatprep.subr.bf16.mxu1 %v2447_v34  ;;  %v273_v8 = vmul.f32 %v4171_v0, %v208_v52 }
 0x265   :  { %v4365_v20 = vadd.f32 %v273_v8, %v144_v2  ;;  %v281_v2 = vmul.f32 %v4171_v0, %v216_v48 }
 0x268   :  { %v83_v14 = vld [vmem:[%s7158_s6 + $0x88] sm:$0xff]  ;;  %v85_v15 = vld [vmem:[%s7158_s6 + $0x98] sm:$0xff] }
 0x269   :  { %396 = vst [vmem:[%s7169_s17 + $0x40] sm:$0xff] %v4331_v6  ;;  %398 = vst [vmem:[%s7169_s17 + $0x50] sm:$0xff] %v4333_v7  ;;  %v148_v29 = vmul.f32 %v4155_v55, %v83_v14  ;;  %v150_v30 = vmul.f32 %v4155_v55, %v85_v15 }
 0x26b   :  { %v4408_v39 = vadd.f32 %v277_v31, %v148_v29  ;;  %v4428_v51 = vadd.f32 %v279_v37, %v150_v30  ;;  %v222_v31 = vld [vmem:[%s7258_s26 + $0xd8] sm:$0xff] }
 0x270   :  { %v82_v27 = vld [vmem:[%s7158_s6 + $0x80] sm:$0xff]  ;;  %v84_v28 = vld [vmem:[%s7158_s6 + $0x90] sm:$0xff] }
 0x271   :  { %401 = vst [vmem:[%s7169_s17 + $0x68] sm:$0xff] %v4365_v20  ;;  %403 = vst [vmem:[%s7169_s17 + $0x78] sm:$0xff] %v4367_v22  ;;  %v147_v38 = vmul.f32 %v4155_v55, %v82_v27  ;;  %v149_v40 = vmul.f32 %v4155_v55, %v84_v28  ;;  %v220_v27 = vld [vmem:[%s7258_s26 + $0xc8] sm:$0xff] }
 0x272   :  { %400 = vst [vmem:[%s7169_s17 + $0x60] sm:$0xff] %v4379_v18  ;;  %v285_v32 = vmul.f32 %v4171_v0, %v220_v27 }
 0x273   :  { %v4445_v59 = vadd.f32 %v276_v42, %v147_v38  ;;  %v4447_v61 = vadd.f32 %v278_v43, %v149_v40  ;;  %v287_v42 = vmul.f32 %v4171_v0, %v222_v31 }
 0x279   :  { %v87_v44 = vld [vmem:[%s7158_s6 + $0xa8] sm:$0xff]  ;;  %v89_v47 = vld [vmem:[%s7158_s6 + $0xb8] sm:$0xff] }
 0x27a   :  { %402 = vst [vmem:[%s7169_s17 + $0x70] sm:$0xff] %v4400_v36  ;;  %v152_v52 = vmul.f32 %v4155_v55, %v87_v44  ;;  %v154_v54 = vmul.f32 %v4155_v55, %v89_v47  ;;  %v219_v44 = vld [vmem:[%s7258_s26 + $0xc0] sm:$0xff]  ;;  %v221_v47 = vld [vmem:[%s7258_s26 + $0xd0] sm:$0xff] }
 0x27b   :  { %v286_v56 = vmul.f32 %v4171_v0, %v221_v47 }
 0x27c   :  { %v4476_v14 = vadd.f32 %v281_v2, %v152_v52  ;;  %v4478_v15 = vadd.f32 %v283_v3, %v154_v54  ;;  %v284_v54 = vmul.f32 %v4171_v0, %v219_v44 }
 0x281   :  { %v86_v57 = vld [vmem:[%s7158_s6 + $0xa0] sm:$0xff]  ;;  %v88_v58 = vld [vmem:[%s7158_s6 + $0xb0] sm:$0xff] }
 0x282   :  { %405 = vst [vmem:[%s7169_s17 + $0x88] sm:$0xff] %v4408_v39  ;;  %407 = vst [vmem:[%s7169_s17 + $0x98] sm:$0xff] %v4428_v51  ;;  %v151_v9 = vmul.f32 %v4155_v55, %v86_v57  ;;  %v153_v11 = vmul.f32 %v4155_v55, %v88_v58 }
 0x283   :  { %404 = vst [vmem:[%s7169_s17 + $0x80] sm:$0xff] %v4445_v59  ;;  %406 = vst [vmem:[%s7169_s17 + $0x90] sm:$0xff] %v4447_v61 }
 0x284   :  { %v4490_v28 = vadd.f32 %v280_v12, %v151_v9  ;;  %v4514_v40 = vadd.f32 %v282_v17, %v153_v11  ;;  %v226_v17 = vld [vmem:[%s7258_s26 + $0xf8] sm:$0xff] }
 0x28a   :  { %v91_v24 = vld [vmem:[%s7158_s6 + $0xc8] sm:$0xff]  ;;  %v93_v25 = vld [vmem:[%s7158_s6 + $0xd8] sm:$0xff]  ;;  %v90_v33 = vld [vmem:[%s7158_s6 + $0xc0] sm:$0xff] }
 0x28b   :  { %v156_v29 = vmul.f32 %v4155_v55, %v91_v24  ;;  %v158_v30 = vmul.f32 %v4155_v55, %v93_v25  ;;  %v92_v37 = vld [vmem:[%s7158_s6 + $0xd0] sm:$0xff]  ;;  %v155_v43 = vmul.f32 %v4155_v55, %v90_v33 }
 0x28c   :  { %409 = vst [vmem:[%s7169_s17 + $0xa8] sm:$0xff] %v4476_v14  ;;  %411 = vst [vmem:[%s7169_s17 + $0xb8] sm:$0xff] %v4478_v15  ;;  %v157_v52 = vmul.f32 %v4155_v55, %v92_v37  ;;  %v225_v33 = vld [vmem:[%s7258_s26 + $0xf0] sm:$0xff] }
 0x28d   :  { %408 = vst [vmem:[%s7169_s17 + $0xa0] sm:$0xff] %v4490_v28  ;;  %v4528_v48 = vadd.f32 %v285_v32, %v156_v29  ;;  %410 = vst [vmem:[%s7169_s17 + $0xb0] sm:$0xff] %v4514_v40  ;;  %v4539_v58 = vadd.f32 %v287_v42, %v158_v30  ;;  %v4554_v5 = vadd.f32 %v284_v54, %v155_v43  ;;  %v223_v32 = vld [vmem:[%s7258_s26 + $0xe0] sm:$0xff] }
 0x28e   :  { %v4556_v9 = vadd.f32 %v286_v56, %v157_v52  ;;  %v289_v29 = vmul.f32 %v4171_v0, %v224_v4  ;;  %v291_v30 = vmul.f32 %v4171_v0, %v226_v17  ;;  %v288_v43 = vmul.f32 %v4171_v0, %v223_v32  ;;  %v230_v17 = vld [vmem:[%s7258_s26 + $0x118] sm:$0xff] }
 0x28f   :  { %v290_v44 = vmul.f32 %v4171_v0, %v225_v33  ;;  %v227_v33 = vld [vmem:[%s7258_s26 + $0x100] sm:$0xff] }
 0x294   :  { %v95_v2 = vld [vmem:[%s7158_s6 + $0xe8] sm:$0xff]  ;;  %v97_v3 = vld [vmem:[%s7158_s6 + $0xf8] sm:$0xff] }
 0x295   :  { %413 = vst [vmem:[%s7169_s17 + $0xc8] sm:$0xff] %v4528_v48  ;;  %v160_v11 = vmul.f32 %v4155_v55, %v95_v2  ;;  %v162_v12 = vmul.f32 %v4155_v55, %v97_v3  ;;  %v228_v2 = vld [vmem:[%s7258_s26 + $0x108] sm:$0xff] }
 0x297   :  { %v4597_v47 = vadd.f32 %v289_v29, %v160_v11  ;;  %v4599_v52 = vadd.f32 %v291_v30, %v162_v12  ;;  %v293_v30 = vmul.f32 %v4171_v0, %v228_v2 }
 0x29c   :  { %v94_v24 = vld [vmem:[%s7158_s6 + $0xe0] sm:$0xff]  ;;  %v96_v25 = vld [vmem:[%s7158_s6 + $0xf0] sm:$0xff] }
 0x29d   :  { %415 = vst [vmem:[%s7169_s17 + $0xd8] sm:$0xff] %v4539_v58  ;;  %v159_v31 = vmul.f32 %v4155_v55, %v94_v24  ;;  %412 = vst [vmem:[%s7169_s17 + $0xc0] sm:$0xff] %v4554_v5  ;;  %v161_v42 = vmul.f32 %v4155_v55, %v96_v25 }
 0x29e   :  { %414 = vst [vmem:[%s7169_s17 + $0xd0] sm:$0xff] %v4556_v9 }
 0x29f   :  { %v4610_v3 = vadd.f32 %v288_v43, %v159_v31  ;;  %v4612_v4 = vadd.f32 %v290_v44, %v161_v42  ;;  %v295_v31 = vmul.f32 %v4171_v0, %v230_v17  ;;  %v229_v42 = vld [vmem:[%s7258_s26 + $0x110] sm:$0xff] }
 0x2a5   :  { %v99_v54 = vld [vmem:[%s7158_s6 + $0x108] sm:$0xff]  ;;  %v101_v56 = vld [vmem:[%s7158_s6 + $0x118] sm:$0xff]  ;;  %v98_v24 = vld [vmem:[%s7158_s6 + $0x100] sm:$0xff] }
 0x2a6   :  { %v164_v11 = vmul.f32 %v4155_v55, %v99_v54  ;;  %v166_v12 = vmul.f32 %v4155_v55, %v101_v56  ;;  %v100_v25 = vld [vmem:[%s7158_s6 + $0x110] sm:$0xff]  ;;  %v163_v32 = vmul.f32 %v4155_v55, %v98_v24  ;;  %v292_v54 = vmul.f32 %v4171_v0, %v227_v33 }
 0x2a7   :  { %417 = vst [vmem:[%s7169_s17 + $0xe8] sm:$0xff] %v4597_v47  ;;  %419 = vst [vmem:[%s7169_s17 + $0xf8] sm:$0xff] %v4599_v52  ;;  %v165_v44 = vmul.f32 %v4155_v55, %v100_v25  ;;  %v294_v56 = vmul.f32 %v4171_v0, %v229_v42  ;;  %v232_v25 = vld [vmem:[%s7258_s26 + $0x128] sm:$0xff] }
 0x2a8   :  { %416 = vst [vmem:[%s7169_s17 + $0xe0] sm:$0xff] %v4610_v3  ;;  %418 = vst [vmem:[%s7169_s17 + $0xf0] sm:$0xff] %v4612_v4  ;;  %v4657_v2 = vadd.f32 %v293_v30, %v164_v11  ;;  %v4659_v17 = vadd.f32 %v295_v31, %v166_v12  ;;  %v4670_v43 = vadd.f32 %v292_v54, %v163_v32  ;;  %v234_v30 = vld [vmem:[%s7258_s26 + $0x138] sm:$0xff] }
 0x2a9   :  { %v4672_v33 = vadd.f32 %v294_v56, %v165_v44  ;;  %v297_v32 = vmul.f32 %v4171_v0, %v232_v25  ;;  %v299_v44 = vmul.f32 %v4171_v0, %v234_v30  ;;  %v231_v56 = vld [vmem:[%s7258_s26 + $0x120] sm:$0xff] }
 0x2aa   :  { %7268 = vst [vmem:[#allocation10_spill] sm:$0xff] %v4670_v43 }
 0x2af   :  { %v103_v24 = vld [vmem:[%s7158_s6 + $0x128] sm:$0xff]  ;;  %v105_v50 = vld [vmem:[%s7158_s6 + $0x138] sm:$0xff]  ;;  %v102_v31 = vld [vmem:[%s7158_s6 + $0x120] sm:$0xff] }
 0x2b0   :  { %v168_v11 = vmul.f32 %v4155_v55, %v103_v24  ;;  %v170_v12 = vmul.f32 %v4155_v55, %v105_v50  ;;  %v104_v42 = vld [vmem:[%s7158_s6 + $0x130] sm:$0xff]  ;;  %v167_v54 = vmul.f32 %v4155_v55, %v102_v31  ;;  %v296_v31 = vmul.f32 %v4171_v0, %v231_v56 }
 0x2b1   :  { %421 = vst [vmem:[%s7169_s17 + $0x108] sm:$0xff] %v4657_v2  ;;  %423 = vst [vmem:[%s7169_s17 + $0x118] sm:$0xff] %v4659_v17  ;;  %v233_v24 = vld [vmem:[%s7258_s26 + $0x130] sm:$0xff]  ;;  %v169_v30 = vmul.f32 %v4155_v55, %v104_v42  ;;  %v236_v42 = vld [vmem:[%s7258_s26 + $0x148] sm:$0xff] }
 0x2b2   :  { %420 = vst [vmem:[%s7169_s17 + $0x100] sm:$0xff] %v4670_v43  ;;  %422 = vst [vmem:[%s7169_s17 + $0x110] sm:$0xff] %v4672_v33  ;;  %v298_v50 = vmul.f32 %v4171_v0, %v233_v24  ;;  %v4717_v29 = vadd.f32 %v297_v32, %v168_v11  ;;  %v4719_v37 = vadd.f32 %v299_v44, %v170_v12  ;;  %v238_v32 = vld [vmem:[%s7258_s26 + $0x158] sm:$0xff] }
 0x2b3   :  { %v4730_v25 = vadd.f32 %v296_v31, %v167_v54  ;;  %v237_v31 = vld [vmem:[%s7258_s26 + $0x150] sm:$0xff] }
 0x2b4   :  { %7269 = vst [vmem:[#allocation11_spill] sm:$0xff] %v4717_v29  ;;  %7270 = vst [vmem:[#allocation12_spill] sm:$0xff] %v4719_v37  ;;  %v4732_v56 = vadd.f32 %v298_v50, %v169_v30  ;;  %v303_v50 = vmul.f32 %v4171_v0, %v238_v32  ;;  %v235_v30 = vld [vmem:[%s7258_s26 + $0x140] sm:$0xff] }
 0x2b5   :  { %7271 = vst [vmem:[#allocation13_spill] sm:$0xff] %v4730_v25 }
 0x2b6   :  { %7272 = vst [vmem:[#allocation14_spill] sm:$0xff] %v4732_v56 }
 0x2b9   :  { %v107_v27 = vld [vmem:[%s7158_s6 + $0x148] sm:$0xff]  ;;  %v109_v57 = vld [vmem:[%s7158_s6 + $0x158] sm:$0xff]  ;;  %v106_v44 = vld [vmem:[%s7158_s6 + $0x140] sm:$0xff] }
 0x2ba   :  { %v172_v11 = vmul.f32 %v4155_v55, %v107_v27  ;;  %v174_v12 = vmul.f32 %v4155_v55, %v109_v57  ;;  %v108_v24 = vld [vmem:[%s7158_s6 + $0x150] sm:$0xff]  ;;  %v301_v27 = vmul.f32 %v4171_v0, %v236_v42  ;;  %v171_v54 = vmul.f32 %v4155_v55, %v106_v44 }
 0x2bb   :  { %425 = vst [vmem:[%s7169_s17 + $0x128] sm:$0xff] %v4717_v29  ;;  %427 = vst [vmem:[%s7169_s17 + $0x138] sm:$0xff] %v4719_v37  ;;  %v173_v32 = vmul.f32 %v4155_v55, %v108_v24  ;;  %v300_v44 = vmul.f32 %v4171_v0, %v235_v30  ;;  %v302_v57 = vmul.f32 %v4171_v0, %v237_v31  ;;  %v240_v24 = vld [vmem:[%s7258_s26 + $0x168] sm:$0xff] }
 0x2bc   :  { %424 = vst [vmem:[%s7169_s17 + $0x120] sm:$0xff] %v4730_v25  ;;  %426 = vst [vmem:[%s7169_s17 + $0x130] sm:$0xff] %v4732_v56  ;;  %v4777_v38 = vadd.f32 %v301_v27, %v172_v11  ;;  %v4779_v13 = vadd.f32 %v303_v50, %v174_v12  ;;  %v242_v27 = vld [vmem:[%s7258_s26 + $0x178] sm:$0xff] }
 0x2bd   :  { %v4790_v42 = vadd.f32 %v300_v44, %v171_v54  ;;  %v4792_v30 = vadd.f32 %v302_v57, %v173_v32  ;;  %v307_v57 = vmul.f32 %v4171_v0, %v242_v27  ;;  %v239_v32 = vld [vmem:[%s7258_s26 + $0x160] sm:$0xff]  ;;  %v241_v44 = vld [vmem:[%s7258_s26 + $0x170] sm:$0xff] }
 0x2be   :  { %7273 = vst [vmem:[#allocation15_spill] sm:$0xff] %v4777_v38  ;;  %7274 = vst [vmem:[#allocation16_spill] sm:$0xff] %v4779_v13 }
 0x2bf   :  { %7275 = vst [vmem:[#allocation17_spill] sm:$0xff] %v4790_v42  ;;  %7276 = vst [vmem:[#allocation18_spill] sm:$0xff] %v4792_v30 }
 0x2c3   :  { %v111_v8 = vld [vmem:[%s7158_s6 + $0x168] sm:$0xff]  ;;  %v113_v49 = vld [vmem:[%s7158_s6 + $0x178] sm:$0xff]  ;;  %v110_v50 = vld [vmem:[%s7158_s6 + $0x160] sm:$0xff] }
 0x2c4   :  { %v176_v11 = vmul.f32 %v4155_v55, %v111_v8  ;;  %v178_v12 = vmul.f32 %v4155_v55, %v113_v49  ;;  %v112_v31 = vld [vmem:[%s7158_s6 + $0x170] sm:$0xff]  ;;  %v305_v8 = vmul.f32 %v4171_v0, %v240_v24  ;;  %v175_v54 = vmul.f32 %v4155_v55, %v110_v50 }
 0x2c5   :  { %429 = vst [vmem:[%s7169_s17 + $0x148] sm:$0xff] %v4777_v38  ;;  %431 = vst [vmem:[%s7169_s17 + $0x158] sm:$0xff] %v4779_v13  ;;  %v177_v27 = vmul.f32 %v4155_v55, %v112_v31  ;;  %v304_v50 = vmul.f32 %v4171_v0, %v239_v32  ;;  %v306_v49 = vmul.f32 %v4171_v0, %v241_v44  ;;  %v244_v31 = vld [vmem:[%s7258_s26 + $0x188] sm:$0xff] }
 0x2c6   :  { %428 = vst [vmem:[%s7169_s17 + $0x140] sm:$0xff] %v4790_v42  ;;  %430 = vst [vmem:[%s7169_s17 + $0x150] sm:$0xff] %v4792_v30  ;;  %v4837_v34 = vadd.f32 %v305_v8, %v176_v11  ;;  %v4839_v19 = vadd.f32 %v307_v57, %v178_v12  ;;  %v246_v8 = vld [vmem:[%s7258_s26 + $0x198] sm:$0xff] }
 0x2c7   :  { %v4850_v24 = vadd.f32 %v304_v50, %v175_v54  ;;  %v4852_v32 = vadd.f32 %v306_v49, %v177_v27  ;;  %v311_v49 = vmul.f32 %v4171_v0, %v246_v8  ;;  %v243_v27 = vld [vmem:[%s7258_s26 + $0x180] sm:$0xff]  ;;  %v245_v50 = vld [vmem:[%s7258_s26 + $0x190] sm:$0xff] }
 0x2c8   :  { %7277 = vst [vmem:[#allocation19_spill] sm:$0xff] %v4837_v34  ;;  %7278 = vst [vmem:[#allocation20_spill] sm:$0xff] %v4839_v19 }
 0x2c9   :  { %7279 = vst [vmem:[#allocation21_spill] sm:$0xff] %v4850_v24  ;;  %7280 = vst [vmem:[#allocation22_spill] sm:$0xff] %v4852_v32 }
 0x2cd   :  { %v115_v10 = vld [vmem:[%s7158_s6 + $0x188] sm:$0xff]  ;;  %v117_v63 = vld [vmem:[%s7158_s6 + $0x198] sm:$0xff]  ;;  %v114_v57 = vld [vmem:[%s7158_s6 + $0x180] sm:$0xff] }
 0x2ce   :  { %v180_v11 = vmul.f32 %v4155_v55, %v115_v10  ;;  %v182_v12 = vmul.f32 %v4155_v55, %v117_v63  ;;  %v116_v44 = vld [vmem:[%s7158_s6 + $0x190] sm:$0xff]  ;;  %v309_v10 = vmul.f32 %v4171_v0, %v244_v31  ;;  %v179_v54 = vmul.f32 %v4155_v55, %v114_v57 }
 0x2cf   :  { %433 = vst [vmem:[%s7169_s17 + $0x168] sm:$0xff] %v4837_v34  ;;  %435 = vst [vmem:[%s7169_s17 + $0x178] sm:$0xff] %v4839_v19  ;;  %v181_v8 = vmul.f32 %v4155_v55, %v116_v44  ;;  %v308_v57 = vmul.f32 %v4171_v0, %v243_v27  ;;  %v310_v63 = vmul.f32 %v4171_v0, %v245_v50  ;;  %v248_v44 = vld [vmem:[%s7258_s26 + $0x1a8] sm:$0xff] }
 0x2d0   :  { %432 = vst [vmem:[%s7169_s17 + $0x160] sm:$0xff] %v4850_v24  ;;  %434 = vst [vmem:[%s7169_s17 + $0x170] sm:$0xff] %v4852_v32  ;;  %v4897_v41 = vadd.f32 %v309_v10, %v180_v11  ;;  %v4899_v35 = vadd.f32 %v311_v49, %v182_v12  ;;  %v250_v10 = vld [vmem:[%s7258_s26 + $0x1b8] sm:$0xff] }
 0x2d1   :  { %v4910_v31 = vadd.f32 %v308_v57, %v179_v54  ;;  %v4912_v27 = vadd.f32 %v310_v63, %v181_v8  ;;  %v315_v63 = vmul.f32 %v4171_v0, %v250_v10  ;;  %v247_v8 = vld [vmem:[%s7258_s26 + $0x1a0] sm:$0xff]  ;;  %v249_v57 = vld [vmem:[%s7258_s26 + $0x1b0] sm:$0xff] }
 0x2d2   :  { %7281 = vst [vmem:[#allocation23_spill] sm:$0xff] %v4897_v41  ;;  %7282 = vst [vmem:[#allocation24_spill] sm:$0xff] %v4899_v35 }
 0x2d3   :  { %7283 = vst [vmem:[#allocation25_spill] sm:$0xff] %v4910_v31  ;;  %7284 = vst [vmem:[#allocation26_spill] sm:$0xff] %v4912_v27 }
 0x2d7   :  { %v119_v62 = vld [vmem:[%s7158_s6 + $0x1a8] sm:$0xff]  ;;  %v121_v60 = vld [vmem:[%s7158_s6 + $0x1b8] sm:$0xff]  ;;  %v118_v49 = vld [vmem:[%s7158_s6 + $0x1a0] sm:$0xff] }
 0x2d8   :  { %v184_v11 = vmul.f32 %v4155_v55, %v119_v62  ;;  %v186_v12 = vmul.f32 %v4155_v55, %v121_v60  ;;  %v120_v50 = vld [vmem:[%s7158_s6 + $0x1b0] sm:$0xff]  ;;  %v313_v62 = vmul.f32 %v4171_v0, %v248_v44  ;;  %v183_v54 = vmul.f32 %v4155_v55, %v118_v49 }
 0x2d9   :  { %437 = vst [vmem:[%s7169_s17 + $0x188] sm:$0xff] %v4897_v41  ;;  %439 = vst [vmem:[%s7169_s17 + $0x198] sm:$0xff] %v4899_v35  ;;  %v185_v10 = vmul.f32 %v4155_v55, %v120_v50  ;;  %v312_v49 = vmul.f32 %v4171_v0, %v247_v8  ;;  %v314_v60 = vmul.f32 %v4171_v0, %v249_v57  ;;  %v252_v50 = vld [vmem:[%s7258_s26 + $0x1c8] sm:$0xff] }
 0x2da   :  { %436 = vst [vmem:[%s7169_s17 + $0x180] sm:$0xff] %v4910_v31  ;;  %438 = vst [vmem:[%s7169_s17 + $0x190] sm:$0xff] %v4912_v27  ;;  %v4957_v41 = vadd.f32 %v313_v62, %v184_v11  ;;  %v4959_v35 = vadd.f32 %v315_v63, %v186_v12  ;;  %v254_v62 = vld [vmem:[%s7258_s26 + $0x1d8] sm:$0xff] }
 0x2db   :  { %v4970_v44 = vadd.f32 %v312_v49, %v183_v54  ;;  %v4972_v8 = vadd.f32 %v314_v60, %v185_v10  ;;  %v319_v60 = vmul.f32 %v4171_v0, %v254_v62  ;;  %v251_v10 = vld [vmem:[%s7258_s26 + $0x1c0] sm:$0xff]  ;;  %v253_v49 = vld [vmem:[%s7258_s26 + $0x1d0] sm:$0xff] }
 0x2dc   :  { %7285 = vst [vmem:[#allocation27_spill] sm:$0xff] %v4957_v41  ;;  %7286 = vst [vmem:[#allocation28_spill] sm:$0xff] %v4959_v35 }
 0x2dd   :  { %7287 = vst [vmem:[#allocation29_spill] sm:$0xff] %v4970_v44  ;;  %7288 = vst [vmem:[#allocation30_spill] sm:$0xff] %v4972_v8 }
 0x2e1   :  { %v123_v24 = vld [vmem:[%s7158_s6 + $0x1c8] sm:$0xff]  ;;  %v125_v32 = vld [vmem:[%s7158_s6 + $0x1d8] sm:$0xff]  ;;  %v122_v63 = vld [vmem:[%s7158_s6 + $0x1c0] sm:$0xff] }
 0x2e2   :  { %v188_v11 = vmul.f32 %v4155_v55, %v123_v24  ;;  %v190_v12 = vmul.f32 %v4155_v55, %v125_v32  ;;  %v124_v57 = vld [vmem:[%s7158_s6 + $0x1d0] sm:$0xff]  ;;  %v317_v32 = vmul.f32 %v4171_v0, %v252_v50  ;;  %v187_v54 = vmul.f32 %v4155_v55, %v122_v63 }
 0x2e3   :  { %441 = vst [vmem:[%s7169_s17 + $0x1a8] sm:$0xff] %v4957_v41  ;;  %443 = vst [vmem:[%s7169_s17 + $0x1b8] sm:$0xff] %v4959_v35  ;;  %v189_v62 = vmul.f32 %v4155_v55, %v124_v57  ;;  %v316_v63 = vmul.f32 %v4171_v0, %v251_v10  ;;  %v318_v24 = vmul.f32 %v4171_v0, %v253_v49  ;;  %v256_v57 = vld [vmem:[%s7258_s26 + $0x1e8] sm:$0xff] }
 0x2e4   :  { %440 = vst [vmem:[%s7169_s17 + $0x1a0] sm:$0xff] %v4970_v44  ;;  %442 = vst [vmem:[%s7169_s17 + $0x1b0] sm:$0xff] %v4972_v8  ;;  %v5017_v41 = vadd.f32 %v317_v32, %v188_v11  ;;  %v5019_v35 = vadd.f32 %v319_v60, %v190_v12  ;;  %v258_v32 = vld [vmem:[%s7258_s26 + $0x1f8] sm:$0xff] }
 0x2e5   :  { %v5030_v50 = vadd.f32 %v316_v63, %v187_v54  ;;  %v5032_v10 = vadd.f32 %v318_v24, %v189_v62  ;;  %v323_v24 = vmul.f32 %v4171_v0, %v258_v32  ;;  %v255_v62 = vld [vmem:[%s7258_s26 + $0x1e0] sm:$0xff]  ;;  %v257_v63 = vld [vmem:[%s7258_s26 + $0x1f0] sm:$0xff] }
 0x2e6   :  { %7289 = vst [vmem:[#allocation31_spill] sm:$0xff] %v5017_v41  ;;  %7290 = vst [vmem:[#allocation32_spill] sm:$0xff] %v5019_v35 }
 0x2e7   :  { %7291 = vst [vmem:[#allocation33_spill] sm:$0xff] %v5030_v50  ;;  %7292 = vst [vmem:[#allocation34_spill] sm:$0xff] %v5032_v10 }
 0x2eb   :  { %v127_v31 = vld [vmem:[%s7158_s6 + $0x1e8] sm:$0xff]  ;;  %v129_v27 = vld [vmem:[%s7158_s6 + $0x1f8] sm:$0xff]  ;;  %v126_v60 = vld [vmem:[%s7158_s6 + $0x1e0] sm:$0xff] }
 0x2ec   :  { %v192_v11 = vmul.f32 %v4155_v55, %v127_v31  ;;  %v194_v12 = vmul.f32 %v4155_v55, %v129_v27  ;;  %v128_v49 = vld [vmem:[%s7158_s6 + $0x1f0] sm:$0xff]  ;;  %v321_v27 = vmul.f32 %v4171_v0, %v256_v57  ;;  %v191_v54 = vmul.f32 %v4155_v55, %v126_v60 }
 0x2ed   :  { %445 = vst [vmem:[%s7169_s17 + $0x1c8] sm:$0xff] %v5017_v41  ;;  %447 = vst [vmem:[%s7169_s17 + $0x1d8] sm:$0xff] %v5019_v35  ;;  %v193_v32 = vmul.f32 %v4155_v55, %v128_v49  ;;  %v320_v60 = vmul.f32 %v4171_v0, %v255_v62  ;;  %v322_v31 = vmul.f32 %v4171_v0, %v257_v63  ;;  %v3209_v49 = vld [vmem:[%s7166_s14] ss:$8 sps:$4 sm:$0xff]  }
 0x2ee   :  { %444 = vst [vmem:[%s7169_s17 + $0x1c0] sm:$0xff] %v5030_v50  ;;  %446 = vst [vmem:[%s7169_s17 + $0x1d0] sm:$0xff] %v5032_v10  ;;  %v5077_v41 = vadd.f32 %v321_v27, %v192_v11  ;;  %v5079_v35 = vadd.f32 %v323_v24, %v194_v12  ;;  %v3214_v27 = vld [vmem:[%s7166_s14 + $0x14] ss:$8 sps:$4 sm:$0xff]   ;;  %v3212_v24 = vld [vmem:[%s7166_s14 + $0x10] ss:$8 sps:$4 sm:$0xff]  }
 0x2ef   :  { %v5081_v44 = vadd.f32 %v320_v60, %v191_v54  ;;  %v5083_v8 = vadd.f32 %v322_v31, %v193_v32  ;;  %v3211_v31 = vld [vmem:[%s7166_s14 + $0x4] ss:$8 sps:$4 sm:$0xff]  }
 0x2f0   :  { %7293 = vst [vmem:[#allocation35_spill] sm:$0xff] %v5077_v41  ;;  %7294 = vst [vmem:[#allocation36_spill] sm:$0xff] %v5079_v35  ;;  %2403 = vmatprep.subr.bf16.mxu0 %v3211_v31 }
 0x2f1   :  { %7295 = vst [vmem:[#allocation37_spill] sm:$0xff] %v5081_v44  ;;  %7296 = vst [vmem:[#allocation38_spill] sm:$0xff] %v5083_v8  ;;  %2404 = vmatpush1.bf16.msra.mxu0 %v3209_v49 }
 0x2f2   :  { %449 = vst [vmem:[%s7169_s17 + $0x1e8] sm:$0xff] %v5077_v41  ;;  %451 = vst [vmem:[%s7169_s17 + $0x1f8] sm:$0xff] %v5079_v35  ;;  %2405 = vmatprep.subr.bf16.mxu0 %v3214_v27 }
 0x2f3   :  { %448 = vst [vmem:[%s7169_s17 + $0x1e0] sm:$0xff] %v5081_v44  ;;  %450 = vst [vmem:[%s7169_s17 + $0x1f0] sm:$0xff] %v5083_v8  ;;  %s3339_s17 = smov [#allocation3]  }
 0x2f4   :  { %s3059_s1 = sshll.u32 %s3339_s17, 4  ;;  %s3060_s1 = int_to_ptr.vmem [resolvable:$true] %s3059_s1 }
 0x2f5   :  { %2406 = vmatpush1.bf16.msra.mxu0 %v3212_v24  ;;  %s3315_s15 = scalar_lea.vmem %s3060_s1, 16  ;;  %s3319_s2 = scalar_lea.vmem %s3060_s1, 32 }
 0x2f6   :  { %p3316_p0 = scmp.ne.s32.totalorder %s3060_s1, %s3315_s15  ;;  %p3320_p1 = scmp.lt.s32.totalorder %s3060_s1, %s3060_s1 }
 0x2f7   :  { %p3321_p2 = scmp.lt.s32.totalorder %s3319_s2, %s3315_s15 }
 0x2f9   :  { %p3322_p3 = por %p3321_p2, %p3320_p1 }
 0x2fb   :  { %p3323_p4 = pnand %p3322_p3, %p3316_p0 }
 0x310   :  { %v1775_v54 = vpop.f32.mrb[4].mxu0 }
 0x311   :  { %v1784_v62 = vrot.slane %v1775_v54, 4  ;;  %v1777_v63 = vpop.f32.mrb[5].mxu0 }
 0x312   :  { %v1790_v32 = vrot.slane %v1777_v63, 4  ;;  %v1779_v60 = vpop.f32.mrb[6].mxu0 }
 0x313   :  { %v1785_v12 = vadd.f32 %v1784_v62, %v1775_v54  ;;  %v1796_v11 = vrot.slane %v1779_v60, 4  ;;  %v1781_v57 = vpop.f32.mrb[7].mxu0 }
 0x314   :  { %v1791_v0 = vadd.f32 %v1790_v32, %v1777_v63  ;;  %v1802_v55 = vrot.slane %v1781_v57, 4 }
 0x315   :  { %v1786_v44 = vrot.slane %v1785_v12, 2  ;;  %v1797_v8 = vadd.f32 %v1796_v11, %v1779_v60 }
 0x316   :  { %v1792_v31 = vrot.slane %v1791_v0, 2  ;;  %v1803_v49 = vadd.f32 %v1802_v55, %v1781_v57 }
 0x317   :  { %v1787_v41 = vadd.f32 %v1786_v44, %v1785_v12  ;;  %v1798_v35 = vrot.slane %v1797_v8, 2 }
 0x318   :  { %v1793_v50 = vadd.f32 %v1792_v31, %v1791_v0  ;;  %v1804_v10 = vrot.slane %v1803_v49, 2 }
 0x319   :  { %v1788_v27 = vrot.slane %v1787_v41, 1  ;;  %v1799_v24 = vadd.f32 %v1798_v35, %v1797_v8 }
 0x31a   :  { %v1794_v34 = vrot.slane %v1793_v50, 1  ;;  %v1805_v19 = vadd.f32 %v1804_v10, %v1803_v49 }
 0x31b   :  { %v1789_v42 = vadd.f32 %v1788_v27, %v1787_v41  ;;  %v1800_v30 = vrot.slane %v1799_v24, 1 }
 0x31c   :  { %v1795_v38 = vadd.f32 %v1794_v34, %v1793_v50  ;;  %v1806_v62 = vrot.slane %v1805_v19, 1 }
 0x31d   :  { %v1808_v13 = vmul.f32 0.125, %v1789_v42  ;;  %v1801_v25 = vadd.f32 %v1800_v30, %v1799_v24 }
 0x31e   :  { %v1809_v32 = vmul.f32 0.125, %v1795_v38  ;;  %v1807_v56 = vadd.f32 %v1806_v62, %v1805_v19 }
 0x31f   :  { %v1812_v29 = vsub.f32 %v1775_v54, %v1808_v13  ;;  %v1810_v11 = vmul.f32 0.125, %v1801_v25 }
 0x320   :  { %v1813_v37 = vsub.f32 %v1777_v63, %v1809_v32  ;;  %v1811_v55 = vmul.f32 0.125, %v1807_v56 }
 0x321   :  { %v1816_v44 = vmul.f32 %v1812_v29, %v1812_v29  ;;  %v1814_v12 = vsub.f32 %v1779_v60, %v1810_v11 }
 0x322   :  { %v1817_v0 = vmul.f32 %v1813_v37, %v1813_v37  ;;  %v1815_v31 = vsub.f32 %v1781_v57, %v1811_v55 }
 0x323   :  { %v1820_v43 = vrot.slane %v1816_v44, 4  ;;  %v1818_v35 = vmul.f32 %v1814_v12, %v1814_v12 }
 0x324   :  { %v1826_v8 = vrot.slane %v1817_v0, 4  ;;  %v1819_v10 = vmul.f32 %v1815_v31, %v1815_v31 }
 0x325   :  { %v1821_v41 = vadd.f32 %v1820_v43, %v1816_v44  ;;  %v1832_v49 = vrot.slane %v1818_v35, 4 }
 0x326   :  { %v1827_v34 = vadd.f32 %v1826_v8, %v1817_v0  ;;  %v1838_v50 = vrot.slane %v1819_v10, 4 }
 0x327   :  { %v1822_v42 = vrot.slane %v1821_v41, 2  ;;  %v1833_v30 = vadd.f32 %v1832_v49, %v1818_v35 }
 0x328   :  { %v1828_v38 = vrot.slane %v1827_v34, 2  ;;  %v1839_v19 = vadd.f32 %v1838_v50, %v1819_v10 }
 0x329   :  { %v1823_v13 = vadd.f32 %v1822_v42, %v1821_v41  ;;  %v1834_v25 = vrot.slane %v1833_v30, 2 }
 0x32a   :  { %v1829_v54 = vadd.f32 %v1828_v38, %v1827_v34  ;;  %v1840_v56 = vrot.slane %v1839_v19, 2 }
 0x32b   :  { %v1824_v63 = vrot.slane %v1823_v13, 1  ;;  %v1835_v60 = vadd.f32 %v1834_v25, %v1833_v30 }
 0x32c   :  { %v1830_v27 = vrot.slane %v1829_v54, 1  ;;  %v1841_v57 = vadd.f32 %v1840_v56, %v1839_v19 }
 0x32d   :  { %v1825_v24 = vadd.f32 %v1824_v63, %v1823_v13  ;;  %v1836_v62 = vrot.slane %v1835_v60, 1 }
 0x32e   :  { %v1831_v32 = vadd.f32 %v1830_v27, %v1829_v54  ;;  %v1842_v11 = vrot.slane %v1841_v57, 1  ;;  %v3313_v27 = vld [vmem:[%s7259_s0 + $0x4] ss:$8 sps:$4 sm:$0xff]  }
 0x32f   :  { %v1844_v43 = vmul.f32 0.125, %v1825_v24  ;;  %v1837_v55 = vadd.f32 %v1836_v62, %v1835_v60  ;;  %v7297_v60 = vpack.c.bf16 %v4212_v26, %v4210_v16  ;;  %v7301_v16 = vpack.c.bf16 %v4333_v7, %v4331_v6  ;;  %v7336_v24 = vld [vmem:[#allocation26_spill] sm:$0xff]  ;;  %v7337_v62 = vld [vmem:[#allocation25_spill] sm:$0xff] }
 0x330   :  { %v1845_v44 = vmul.f32 0.125, %v1831_v32  ;;  %v1843_v0 = vadd.f32 %v1842_v11, %v1841_v57  ;;  %v7298_v57 = vpack.c.bf16 %v4225_v23, %v4223_v21  ;;  %v7302_v26 = vpack.c.bf16 %v4367_v22, %v4365_v20  ;;  %v7339_v11 = vld [vmem:[#allocation28_spill] sm:$0xff] }
 0x331   :  { %v1848_v8 = vadd.f32 1e-05, %v1844_v43  ;;  %v1846_v35 = vmul.f32 0.125, %v1837_v55  ;;  %v7303_v21 = vpack.c.bf16 %v4400_v36, %v4379_v18  ;;  %v7304_v23 = vpack.c.bf16 %v4428_v51, %v4408_v39  ;;  %v7313_v18 = vld [vmem:[#allocation10_spill] sm:$0xff]  ;;  %v7315_v39 = vld [vmem:[#allocation12_spill] sm:$0xff]  ;;  %v7316_v51 = vld [vmem:[#allocation11_spill] sm:$0xff] }
 0x332   :  { %v1849_v49 = vadd.f32 1e-05, %v1845_v44  ;;  %v1847_v10 = vmul.f32 0.125, %v1843_v0  ;;  %v7309_v6 = vpack.c.bf16 %v4556_v9, %v4554_v5  ;;  %v7310_v7 = vpack.c.bf16 %v4599_v52, %v4597_v47  ;;  %v7325_v5 = vld [vmem:[#allocation17_spill] sm:$0xff]  ;;  %v7327_v47 = vld [vmem:[#allocation20_spill] sm:$0xff]  ;;  %v7328_v52 = vld [vmem:[#allocation19_spill] sm:$0xff] }
 0x333   :  { %3265 = vrsqrt.f32 %v1848_v8  ;;  %v1850_v41 = vadd.f32 1e-05, %v1846_v35  ;;  %v7311_v20 = vpack.c.bf16 %v4612_v4, %v4610_v3  ;;  %v7312_v22 = vpack.c.bf16 %v4659_v17, %v4657_v2  ;;  %v7330_v4 = vld [vmem:[#allocation22_spill] sm:$0xff]  ;;  %v7331_v2 = vld [vmem:[#allocation21_spill] sm:$0xff]  ;;  %v7340_v43 = vld [vmem:[#allocation27_spill] sm:$0xff] }
 0x334   :  { %3267 = vrsqrt.f32 %v1849_v49  ;;  %v1851_v34 = vadd.f32 1e-05, %v1847_v10  ;;  %v7314_v36 = vpack.c.bf16 %v4672_v33, %v7313_v18  ;;  %v7329_v3 = vpack.c.bf16 %v7327_v47, %v7328_v52  ;;  %v7333_v33 = vld [vmem:[#allocation24_spill] sm:$0xff]  ;;  %v7342_v44 = vld [vmem:[#allocation30_spill] sm:$0xff]  ;;  %v7343_v0 = vld [vmem:[#allocation29_spill] sm:$0xff] }
 0x335   :  { %3269 = vrsqrt.f32 %v1850_v41  ;;  %v7332_v17 = vpack.c.bf16 %v7330_v4, %v7331_v2  ;;  %v7338_v32 = vpack.c.bf16 %v7336_v24, %v7337_v62  ;;  %v7341_v55 = vpack.c.bf16 %v7339_v11, %v7340_v43  ;;  %v7345_v35 = vld [vmem:[#allocation32_spill] sm:$0xff]  ;;  %v7346_v49 = vld [vmem:[#allocation31_spill] sm:$0xff]  ;;  %v7348_v41 = vld [vmem:[#allocation34_spill] sm:$0xff] }
 0x336   :  { %3271 = vrsqrt.f32 %v1851_v34  ;;  %v7344_v8 = vpack.c.bf16 %v7342_v44, %v7343_v0  ;;  %v7347_v10 = vpack.c.bf16 %v7345_v35, %v7346_v49  ;;  %v7349_v34 = vld [vmem:[#allocation33_spill] sm:$0xff]  ;;  %v582_v62 = vld [vmem:[%s7260_s5 + $0x10] sm:$0xff]  ;;  %v457_v0 = vld [vmem:[%s7159_s7 + $0x28] sm:$0xff] }
 0x337   :  { %v3242_v18 = vld [vmem:[%s7166_s14 + $0xb0] ss:$8 sps:$4 sm:$0xff]   ;;  %v585_v35 = vld [vmem:[%s7260_s5 + $0x28] sm:$0xff] }
 0x338   :  { %v583_v47 = vld [vmem:[%s7260_s5 + $0x18] sm:$0xff] }
 0x33d   :  { %v3266_v50 = vpop.eup %3265 }
 0x33e   :  { %v3268_v42 = vpop.eup %3267  ;;  %v1856_v19 = vmul.f32 %v3266_v50, %v1812_v29  ;;  %v7300_v29 = vpack.c.bf16 %v4317_v1, %v4293_v53  ;;  %v7307_v53 = vpack.c.bf16 %v4514_v40, %v4490_v28  ;;  %v7308_v1 = vpack.c.bf16 %v4539_v58, %v4528_v48  ;;  %v7321_v28 = vld [vmem:[#allocation16_spill] sm:$0xff]  ;;  %v7322_v40 = vld [vmem:[#allocation15_spill] sm:$0xff]  ;;  %v7324_v58 = vld [vmem:[#allocation18_spill] sm:$0xff] }
 0x33f   :  { %v3270_v30 = vpop.eup %3269  ;;  %v1857_v25 = vmul.f32 %v3268_v42, %v1813_v37  ;;  %v7299_v37 = vpack.c.bf16 %v4280_v46, %v4278_v45  ;;  %v7305_v45 = vpack.c.bf16 %v4447_v61, %v4445_v59  ;;  %v7306_v46 = vpack.c.bf16 %v4478_v15, %v4476_v14  ;;  %v7318_v61 = vld [vmem:[#allocation14_spill] sm:$0xff]  ;;  %v7319_v14 = vld [vmem:[#allocation13_spill] sm:$0xff]  ;;  %v7351_v42 = vld [vmem:[#allocation36_spill] sm:$0xff] }
 0x340   :  { %v3272_v38 = vpop.eup %3271  ;;  %v1858_v13 = vmul.f32 %v3270_v30, %v1814_v12  ;;  %v7317_v59 = vpack.c.bf16 %v7315_v39, %v7316_v51  ;;  %v7320_v15 = vpack.c.bf16 %v7318_v61, %v7319_v14  ;;  %v7323_v48 = vpack.c.bf16 %v7321_v28, %v7322_v40  ;;  %v7334_v12 = vld [vmem:[#allocation23_spill] sm:$0xff]  ;;  %v3250_v51 = vld [vmem:[%s7166_s14 + $0xd4] ss:$8 sps:$4 sm:$0xff]  }
 0x341   :  { %v1859_v54 = vmul.f32 %v3272_v38, %v1815_v31  ;;  %v7326_v9 = vpack.c.bf16 %v7324_v58, %v7325_v5  ;;  %v7335_v31 = vpack.c.bf16 %v7333_v33, %v7334_v12  ;;  %v7350_v50 = vpack.c.bf16 %v7348_v41, %v7349_v34  ;;  %v7352_v30 = vld [vmem:[#allocation35_spill] sm:$0xff]  ;;  %v3256_v28 = vld [vmem:[%s7166_s14 + $0xf4] ss:$8 sps:$4 sm:$0xff]   ;;  %v580_v12 = vld [vmem:[%s7260_s5] sm:$0xff] }
 0x342   :  { %v1860_v56 = vpack.c.bf16 %v1858_v13, %v1856_v19  ;;  %v7353_v38 = vpack.c.bf16 %v7351_v42, %v7352_v30  ;;  %v7354_v19 = vld [vmem:[#allocation38_spill] sm:$0xff]  ;;  %v7355_v13 = vld [vmem:[#allocation37_spill] sm:$0xff]  ;;  %v7357_v58 = vld [vmem:[#allocation8_spill] sm:$0xff] }
 0x343   :  { %v1861_v63 = vpack.c.bf16 %v1859_v54, %v1857_v25  ;;  %v7356_v25 = vpack.c.bf16 %v7354_v19, %v7355_v13  ;;  %v3314_v54 = vld [vmem:[%s7259_s0] ss:$8 sps:$4 sm:$0xff]   ;;  %v3253_v61 = vld [vmem:[%s7166_s14 + $0xe4] ss:$8 sps:$4 sm:$0xff]   ;;  %v454_v33 = vld [vmem:[%s7159_s7 + $0x10] sm:$0xff]  ;;  %v521_v41 = vmul.f32 %v457_v0, %v7357_v58 }
 0x344   :  { %v3245_v39 = vld [vmem:[%s7166_s14 + $0xc0] ss:$8 sps:$4 sm:$0xff]   ;;  %v518_v24 = vmul.f32 %v454_v33, %v7357_v58 }
 0x345   :  { %2086 = vmatprep.mubr.bf16.mxu1 %v1861_v63  ;;  %v3215_v63 = vld [vmem:[%s7166_s14 + $0x20] ss:$8 sps:$4 sm:$0xff]  }
 0x346   :  { %2087 = vmatmul.mubr.bf16.vlgmr.msra.gmra.mrb[4].mxu1 %v1860_v56  ;;  %v3217_v56 = vld [vmem:[%s7166_s14 + $0x24] ss:$8 sps:$4 sm:$0xff]   ;;  %v3251_v14 = vld [vmem:[%s7166_s14 + $0xe0] ss:$8 sps:$4 sm:$0xff]  }
 0x347   :  { %2479 = vmatpush1.bf16.msra.mxu1 %v7297_v60  ;;  %2510 = vmatprep.mubr.bf16.mxu1 %v3313_v27  ;;  %v3220_v60 = vld [vmem:[%s7166_s14 + $0x34] ss:$8 sps:$4 sm:$0xff]   ;;  %v3218_v27 = vld [vmem:[%s7166_s14 + $0x30] ss:$8 sps:$4 sm:$0xff]   ;;  %v453_v40 = vld [vmem:[%s7159_s7 + $0x8] sm:$0xff] }
 0x348   :  { %2480 = vmatprep.subr.bf16.mxu1 %v7298_v57  ;;  %2407 = vmatprep.subr.bf16.mxu0 %v3217_v56  ;;  %v3223_v57 = vld [vmem:[%s7166_s14 + $0x44] ss:$8 sps:$4 sm:$0xff]   ;;  %v517_v5 = vmul.f32 %v453_v40, %v7357_v58  ;;  %v586_v56 = vld [vmem:[%s7260_s5 + $0x30] sm:$0xff] }
 0x349   :  { %2408 = vmatpush1.bf16.msra.mxu0 %v3215_v63 }
 0x34a   :  { %2409 = vmatprep.subr.bf16.mxu0 %v3220_v60 }
 0x34b   :  { %2481 = vmatpush1.bf16.msra.mxu1 %v7299_v37  ;;  %v3221_v37 = vld [vmem:[%s7166_s14 + $0x40] ss:$8 sps:$4 sm:$0xff]  }
 0x34c   :  { %2482 = vmatprep.subr.bf16.mxu1 %v7300_v29  ;;  %v3226_v29 = vld [vmem:[%s7166_s14 + $0x54] ss:$8 sps:$4 sm:$0xff]  }
 0x34d   :  { %2410 = vmatpush1.bf16.msra.mxu0 %v3218_v27 }
 0x34e   :  { %2411 = vmatprep.subr.bf16.mxu0 %v3223_v57 }
 0x34f   :  { %2483 = vmatpush1.bf16.msra.mxu1 %v7301_v16  ;;  %v3224_v16 = vld [vmem:[%s7166_s14 + $0x50] ss:$8 sps:$4 sm:$0xff]  }
 0x350   :  { %2484 = vmatprep.subr.bf16.mxu1 %v7302_v26  ;;  %v3229_v26 = vld [vmem:[%s7166_s14 + $0x64] ss:$8 sps:$4 sm:$0xff]  }
 0x351   :  { %2412 = vmatpush1.bf16.msra.mxu0 %v3221_v37 }
 0x352   :  { %2413 = vmatprep.subr.bf16.mxu0 %v3226_v29 }
 0x353   :  { %2485 = vmatpush1.bf16.msra.mxu1 %v7303_v21  ;;  %v3227_v21 = vld [vmem:[%s7166_s14 + $0x60] ss:$8 sps:$4 sm:$0xff]  }
 0x354   :  { %2486 = vmatprep.subr.bf16.mxu1 %v7304_v23  ;;  %v3232_v23 = vld [vmem:[%s7166_s14 + $0x74] ss:$8 sps:$4 sm:$0xff]  }
 0x355   :  { %2414 = vmatpush1.bf16.msra.mxu0 %v3224_v16 }
 0x356   :  { %2415 = vmatprep.subr.bf16.mxu0 %v3229_v26  ;;  %v589_v26 = vld [vmem:[%s7260_s5 + $0x48] sm:$0xff] }
 0x357   :  { %2487 = vmatpush1.bf16.msra.mxu1 %v7305_v45  ;;  %v3230_v45 = vld [vmem:[%s7166_s14 + $0x70] ss:$8 sps:$4 sm:$0xff]  }
 0x358   :  { %2488 = vmatprep.subr.bf16.mxu1 %v7306_v46  ;;  %v3235_v46 = vld [vmem:[%s7166_s14 + $0x84] ss:$8 sps:$4 sm:$0xff]  }
 0x359   :  { %2416 = vmatpush1.bf16.msra.mxu0 %v3227_v21 }
 0x35a   :  { %2417 = vmatprep.subr.bf16.mxu0 %v3232_v23 }
 0x35b   :  { %2489 = vmatpush1.bf16.msra.mxu1 %v7307_v53  ;;  %v3233_v53 = vld [vmem:[%s7166_s14 + $0x80] ss:$8 sps:$4 sm:$0xff]  }
 0x35c   :  { %2490 = vmatprep.subr.bf16.mxu1 %v7308_v1  ;;  %v3238_v1 = vld [vmem:[%s7166_s14 + $0x94] ss:$8 sps:$4 sm:$0xff]  }
 0x35d   :  { %2418 = vmatpush1.bf16.msra.mxu0 %v3230_v45 }
 0x35e   :  { %2419 = vmatprep.subr.bf16.mxu0 %v3235_v46 }
 0x35f   :  { %2491 = vmatpush1.bf16.msra.mxu1 %v7309_v6  ;;  %v3236_v6 = vld [vmem:[%s7166_s14 + $0x90] ss:$8 sps:$4 sm:$0xff]  }
 0x360   :  { %2492 = vmatprep.subr.bf16.mxu1 %v7310_v7  ;;  %v3241_v7 = vld [vmem:[%s7166_s14 + $0xa4] ss:$8 sps:$4 sm:$0xff]  }
 0x361   :  { %2420 = vmatpush1.bf16.msra.mxu0 %v3233_v53  ;;  %v591_v53 = vld [vmem:[%s7260_s5 + $0x58] sm:$0xff] }
 0x362   :  { %2421 = vmatprep.subr.bf16.mxu0 %v3238_v1 }
 0x363   :  { %2493 = vmatpush1.bf16.msra.mxu1 %v7311_v20  ;;  %v3239_v20 = vld [vmem:[%s7166_s14 + $0xa0] ss:$8 sps:$4 sm:$0xff]  }
 0x364   :  { %2494 = vmatprep.subr.bf16.mxu1 %v7312_v22  ;;  %v3244_v22 = vld [vmem:[%s7166_s14 + $0xb4] ss:$8 sps:$4 sm:$0xff]  }
 0x365   :  { %2422 = vmatpush1.bf16.msra.mxu0 %v3236_v6 }
 0x366   :  { %2423 = vmatprep.subr.bf16.mxu0 %v3241_v7 }
 0x367   :  { %2495 = vmatpush1.bf16.msra.mxu1 %v7314_v36  ;;  %v3247_v36 = vld [vmem:[%s7166_s14 + $0xc4] ss:$8 sps:$4 sm:$0xff]  }
 0x368   :  { %2496 = vmatprep.subr.bf16.mxu1 %v7317_v59  ;;  %v3248_v59 = vld [vmem:[%s7166_s14 + $0xd0] ss:$8 sps:$4 sm:$0xff]  }
 0x369   :  { %2424 = vmatpush1.bf16.msra.mxu0 %v3239_v20 }
 0x36a   :  { %2425 = vmatprep.subr.bf16.mxu0 %v3244_v22 }
 0x36b   :  { %2497 = vmatpush1.bf16.msra.mxu1 %v7320_v15  ;;  %v3254_v15 = vld [vmem:[%s7166_s14 + $0xf0] ss:$8 sps:$4 sm:$0xff]  }
 0x36c   :  { %2498 = vmatprep.subr.bf16.mxu1 %v7323_v48  ;;  %v455_v48 = vld [vmem:[%s7159_s7 + $0x18] sm:$0xff] }
 0x36d   :  { %2426 = vmatpush1.bf16.msra.mxu0 %v3242_v18  ;;  %v519_v52 = vmul.f32 %v455_v48, %v7357_v58 }
 0x36e   :  { %2427 = vmatprep.subr.bf16.mxu0 %v3247_v36  ;;  %v588_v36 = vld [vmem:[%s7260_s5 + $0x40] sm:$0xff] }
 0x36f   :  { %2499 = vmatpush1.bf16.msra.mxu1 %v7326_v9  ;;  %v581_v9 = vld [vmem:[%s7260_s5 + $0x8] sm:$0xff] }
 0x370   :  { %2500 = vmatprep.subr.bf16.mxu1 %v7329_v3  ;;  %v7358_v3 = vld [vmem:[#allocation9_spill] sm:$0xff] }
 0x371   :  { %2428 = vmatpush1.bf16.msra.mxu0 %v3245_v39  ;;  %v645_v4 = vmul.f32 %v581_v9, %v7358_v3  ;;  %v647_v2 = vmul.f32 %v583_v47, %v7358_v3  ;;  %v650_v27 = vmul.f32 %v586_v56, %v7358_v3  ;;  %v653_v20 = vmul.f32 %v589_v26, %v7358_v3  ;;  %v590_v39 = vld [vmem:[%s7260_s5 + $0x50] sm:$0xff] }
 0x372   :  { %2429 = vmatprep.subr.bf16.mxu0 %v3250_v51  ;;  %v655_v22 = vmul.f32 %v591_v53, %v7358_v3  ;;  %v598_v26 = vld [vmem:[%s7260_s5 + $0x90] sm:$0xff] }
 0x373   :  { %2501 = vmatpush1.bf16.msra.mxu1 %v7332_v17  ;;  %v452_v17 = vld [vmem:[%s7159_s7] sm:$0xff]  ;;  %v709_v11 = vadd.f32 %v645_v4, %v517_v5  ;;  %v711_v43 = vadd.f32 %v647_v2, %v519_v52  ;;  %v593_v5 = vld [vmem:[%s7260_s5 + $0x68] sm:$0xff]  ;;  %v595_v2 = vld [vmem:[%s7260_s5 + $0x78] sm:$0xff] }
 0x374   :  { %2502 = vmatprep.subr.bf16.mxu1 %v7335_v31  ;;  %v516_v31 = vmul.f32 %v452_v17, %v7357_v58 }
 0x375   :  { %2430 = vmatpush1.bf16.msra.mxu0 %v3248_v59  ;;  %v2528_v49 = vpack.c.bf16 %v711_v43, %v709_v11 }
 0x376   :  { %2431 = vmatprep.subr.bf16.mxu0 %v3253_v61  ;;  %v652_v61 = vmul.f32 %v588_v36, %v7358_v3  ;;  %v601_v36 = vld [vmem:[%s7260_s5 + $0xa8] sm:$0xff] }
 0x377   :  { %2503 = vmatpush1.bf16.msra.mxu1 %v7338_v32  ;;  %v644_v32 = vmul.f32 %v580_v12, %v7358_v3 }
 0x378   :  { %2504 = vmatprep.subr.bf16.mxu1 %v7341_v55  ;;  %v646_v55 = vmul.f32 %v582_v62, %v7358_v3 }
 0x379   :  { %2432 = vmatpush1.bf16.msra.mxu0 %v3251_v14  ;;  %v5332_v44 = vadd.f32 %v644_v32, %v516_v31  ;;  %v654_v14 = vmul.f32 %v590_v39, %v7358_v3  ;;  %v657_v31 = vmul.f32 %v593_v5, %v7358_v3  ;;  %v592_v32 = vld [vmem:[%s7260_s5 + $0x60] sm:$0xff] }
 0x37a   :  { %2433 = vmatprep.subr.bf16.mxu0 %v3256_v28  ;;  %v656_v0 = vmul.f32 %v592_v32, %v7358_v3 }
 0x37b   :  { %2505 = vmatpush1.bf16.msra.mxu1 %v7344_v8  ;;  %v459_v8 = vld [vmem:[%s7159_s7 + $0x38] sm:$0xff] }
 0x37c   :  { %2506 = vmatprep.subr.bf16.mxu1 %v7347_v10  ;;  %773 = vst [vmem:[%s7170_s18 + $0x8] sm:$0xff] %v709_v11  ;;  %775 = vst [vmem:[%s7170_s18 + $0x18] sm:$0xff] %v711_v43  ;;  %v5349_v10 = vadd.f32 %v646_v55, %v518_v24  ;;  %v523_v34 = vmul.f32 %v459_v8, %v7357_v58  ;;  %v659_v24 = vmul.f32 %v595_v2, %v7358_v3  ;;  %v594_v11 = vld [vmem:[%s7260_s5 + $0x70] sm:$0xff] }
 0x37d   :  { %2434 = vmatpush1.bf16.msra.mxu0 %v3254_v15  ;;  %v658_v8 = vmul.f32 %v594_v11, %v7358_v3 }
 0x37e   :  { %2559 = vmatprep.subr.bf16.mxu0 %v2528_v49 }
 0x37f   :  { %2507 = vmatpush1.bf16.msra.mxu1 %v7350_v50  ;;  %v587_v50 = vld [vmem:[%s7260_s5 + $0x38] sm:$0xff] }
 0x380   :  { %2508 = vmatprep.subr.bf16.mxu1 %v7353_v38  ;;  %v649_v38 = vmul.f32 %v585_v35, %v7358_v3  ;;  %v651_v19 = vmul.f32 %v587_v50, %v7358_v3  ;;  %v597_v50 = vld [vmem:[%s7260_s5 + $0x88] sm:$0xff] }
 0x382   :  { %v5384_v57 = vadd.f32 %v649_v38, %v521_v41  ;;  %v5386_v37 = vadd.f32 %v651_v19, %v523_v34 }
 0x383   :  { %2509 = vmatpush1.bf16.msra.mxu1 %v7356_v25  ;;  %v456_v42 = vld [vmem:[%s7159_s7 + $0x20] sm:$0xff]  ;;  %v458_v30 = vld [vmem:[%s7159_s7 + $0x30] sm:$0xff] }
 0x384   :  { %772 = vst [vmem:[%s7170_s18] sm:$0xff] %v5332_v44  ;;  %v520_v13 = vmul.f32 %v456_v42, %v7357_v58  ;;  %v522_v25 = vmul.f32 %v458_v30, %v7357_v58  ;;  %774 = vst [vmem:[%s7170_s18 + $0x10] sm:$0xff] %v5349_v10 }
 0x386   :  { %2511 = vmatmul.mubr.bf16.vlgmr.msra.gmra.mrb[8].mxu1 %v3314_v54  ;;  %v584_v54 = vld [vmem:[%s7260_s5 + $0x20] sm:$0xff]  ;;  %v5399_v23 = vadd.f32 %v650_v27, %v522_v25 }
 0x387   :  { %v648_v60 = vmul.f32 %v584_v54, %v7358_v3 }
 0x389   :  { %v5397_v21 = vadd.f32 %v648_v60, %v520_v13  ;;  %v599_v13 = vld [vmem:[%s7260_s5 + $0x98] sm:$0xff]  ;;  %v661_v60 = vmul.f32 %v597_v50, %v7358_v3 }
 0x38a   :  { %v663_v27 = vmul.f32 %v599_v13, %v7358_v3 }
 0x38b   :  { %v461_v29 = vld [vmem:[%s7159_s7 + $0x48] sm:$0xff]  ;;  %v463_v16 = vld [vmem:[%s7159_s7 + $0x58] sm:$0xff]  ;;  %v460_v1 = vld [vmem:[%s7159_s7 + $0x40] sm:$0xff] }
 0x38c   :  { %v525_v45 = vmul.f32 %v461_v29, %v7357_v58  ;;  %v527_v46 = vmul.f32 %v463_v16, %v7357_v58  ;;  %v462_v6 = vld [vmem:[%s7159_s7 + $0x50] sm:$0xff]  ;;  %v524_v18 = vmul.f32 %v460_v1, %v7357_v58  ;;  %v596_v16 = vld [vmem:[%s7260_s5 + $0x80] sm:$0xff]  ;;  %v662_v1 = vmul.f32 %v598_v26, %v7358_v3 }
 0x38d   :  { %777 = vst [vmem:[%s7170_s18 + $0x28] sm:$0xff] %v5384_v57  ;;  %779 = vst [vmem:[%s7170_s18 + $0x38] sm:$0xff] %v5386_v37  ;;  %v526_v59 = vmul.f32 %v462_v6, %v7357_v58  ;;  %v660_v53 = vmul.f32 %v596_v16, %v7358_v3 }
 0x38e   :  { %776 = vst [vmem:[%s7170_s18 + $0x20] sm:$0xff] %v5397_v21  ;;  %778 = vst [vmem:[%s7170_s18 + $0x30] sm:$0xff] %v5399_v23  ;;  %v5444_v15 = vadd.f32 %v653_v20, %v525_v45  ;;  %v5446_v28 = vadd.f32 %v655_v22, %v527_v46  ;;  %v5457_v9 = vadd.f32 %v652_v61, %v524_v18 }
 0x38f   :  { %v5459_v47 = vadd.f32 %v654_v14, %v526_v59 }
 0x395   :  { %v465_v40 = vld [vmem:[%s7159_s7 + $0x68] sm:$0xff]  ;;  %v467_v48 = vld [vmem:[%s7159_s7 + $0x78] sm:$0xff]  ;;  %v464_v17 = vld [vmem:[%s7159_s7 + $0x60] sm:$0xff] }
 0x396   :  { %v529_v52 = vmul.f32 %v465_v40, %v7357_v58  ;;  %v531_v4 = vmul.f32 %v467_v48, %v7357_v58  ;;  %v466_v33 = vld [vmem:[%s7159_s7 + $0x70] sm:$0xff]  ;;  %v528_v62 = vmul.f32 %v464_v17, %v7357_v58  ;;  %v603_v40 = vld [vmem:[%s7260_s5 + $0xb8] sm:$0xff] }
 0x397   :  { %781 = vst [vmem:[%s7170_s18 + $0x48] sm:$0xff] %v5444_v15  ;;  %783 = vst [vmem:[%s7170_s18 + $0x58] sm:$0xff] %v5446_v28  ;;  %v530_v55 = vmul.f32 %v466_v33, %v7357_v58  ;;  %v667_v2 = vmul.f32 %v603_v40, %v7358_v3  ;;  %v600_v33 = vld [vmem:[%s7260_s5 + $0xa0] sm:$0xff] }
 0x398   :  { %780 = vst [vmem:[%s7170_s18 + $0x40] sm:$0xff] %v5457_v9  ;;  %782 = vst [vmem:[%s7170_s18 + $0x50] sm:$0xff] %v5459_v47  ;;  %v5504_v35 = vadd.f32 %v657_v31, %v529_v52  ;;  %v5506_v49 = vadd.f32 %v659_v24, %v531_v4  ;;  %v5517_v42 = vadd.f32 %v656_v0, %v528_v62  ;;  %v602_v31 = vld [vmem:[%s7260_s5 + $0xb0] sm:$0xff] }
 0x399   :  { %v5519_v30 = vadd.f32 %v658_v8, %v530_v55  ;;  %v665_v4 = vmul.f32 %v601_v36, %v7358_v3  ;;  %v664_v32 = vmul.f32 %v600_v33, %v7358_v3  ;;  %v666_v11 = vmul.f32 %v602_v31, %v7358_v3  ;;  %v611_v31 = vld [vmem:[%s7260_s5 + $0xf8] sm:$0xff] }
 0x39f   :  { %v469_v41 = vld [vmem:[%s7159_s7 + $0x88] sm:$0xff]  ;;  %v471_v34 = vld [vmem:[%s7159_s7 + $0x98] sm:$0xff]  ;;  %v468_v25 = vld [vmem:[%s7159_s7 + $0x80] sm:$0xff] }
 0x3a0   :  { %v533_v38 = vmul.f32 %v469_v41, %v7357_v58  ;;  %v535_v19 = vmul.f32 %v471_v34, %v7357_v58  ;;  %v470_v54 = vld [vmem:[%s7159_s7 + $0x90] sm:$0xff]  ;;  %v532_v29 = vmul.f32 %v468_v25, %v7357_v58  ;;  %v605_v34 = vld [vmem:[%s7260_s5 + $0xc8] sm:$0xff]  ;;  %v607_v25 = vld [vmem:[%s7260_s5 + $0xd8] sm:$0xff] }
 0x3a1   :  { %785 = vst [vmem:[%s7170_s18 + $0x68] sm:$0xff] %v5504_v35  ;;  %787 = vst [vmem:[%s7170_s18 + $0x78] sm:$0xff] %v5506_v49  ;;  %v534_v46 = vmul.f32 %v470_v54, %v7357_v58  ;;  %v671_v16 = vmul.f32 %v607_v25, %v7358_v3 }
 0x3a2   :  { %784 = vst [vmem:[%s7170_s18 + $0x60] sm:$0xff] %v5517_v42  ;;  %786 = vst [vmem:[%s7170_s18 + $0x70] sm:$0xff] %v5519_v30  ;;  %v5564_v6 = vadd.f32 %v661_v60, %v533_v38  ;;  %v5566_v20 = vadd.f32 %v663_v27, %v535_v19  ;;  %v5577_v39 = vadd.f32 %v660_v53, %v532_v29  ;;  %v606_v53 = vld [vmem:[%s7260_s5 + $0xd0] sm:$0xff] }
 0x3a3   :  { %v5579_v59 = vadd.f32 %v662_v1, %v534_v46  ;;  %v669_v29 = vmul.f32 %v605_v34, %v7358_v3  ;;  %v604_v46 = vld [vmem:[%s7260_s5 + $0xc0] sm:$0xff]  ;;  %v670_v36 = vmul.f32 %v606_v53, %v7358_v3 }
 0x3a9   :  { %v473_v22 = vld [vmem:[%s7159_s7 + $0xa8] sm:$0xff]  ;;  %v475_v18 = vld [vmem:[%s7159_s7 + $0xb8] sm:$0xff]  ;;  %v472_v48 = vld [vmem:[%s7159_s7 + $0xa0] sm:$0xff] }
 0x3aa   :  { %v537_v61 = vmul.f32 %v473_v22, %v7357_v58  ;;  %v539_v14 = vmul.f32 %v475_v18, %v7357_v58  ;;  %v474_v5 = vld [vmem:[%s7159_s7 + $0xb0] sm:$0xff]  ;;  %v536_v17 = vmul.f32 %v472_v48, %v7357_v58  ;;  %v668_v18 = vmul.f32 %v604_v46, %v7358_v3 }
 0x3ab   :  { %789 = vst [vmem:[%s7170_s18 + $0x88] sm:$0xff] %v5564_v6  ;;  %791 = vst [vmem:[%s7170_s18 + $0x98] sm:$0xff] %v5566_v20  ;;  %v538_v62 = vmul.f32 %v474_v5, %v7357_v58  ;;  %v609_v5 = vld [vmem:[%s7260_s5 + $0xe8] sm:$0xff] }
 0x3ac   :  { %788 = vst [vmem:[%s7170_s18 + $0x80] sm:$0xff] %v5577_v39  ;;  %790 = vst [vmem:[%s7170_s18 + $0x90] sm:$0xff] %v5579_v59  ;;  %v5624_v55 = vadd.f32 %v665_v4, %v537_v61  ;;  %v5626_v0 = vadd.f32 %v667_v2, %v539_v14  ;;  %v5637_v50 = vadd.f32 %v664_v32, %v536_v17 }
 0x3ad   :  { %v5639_v38 = vadd.f32 %v666_v11, %v538_v62 }
 0x3b3   :  { %v477_v8 = vld [vmem:[%s7159_s7 + $0xc8] sm:$0xff]  ;;  %v479_v41 = vld [vmem:[%s7159_s7 + $0xd8] sm:$0xff]  ;;  %v476_v54 = vld [vmem:[%s7159_s7 + $0xc0] sm:$0xff] }
 0x3b4   :  { %v541_v19 = vmul.f32 %v477_v8, %v7357_v58  ;;  %v543_v13 = vmul.f32 %v479_v41, %v7357_v58  ;;  %v478_v60 = vld [vmem:[%s7159_s7 + $0xd0] sm:$0xff]  ;;  %v540_v26 = vmul.f32 %v476_v54, %v7357_v58  ;;  %v673_v8 = vmul.f32 %v609_v5, %v7358_v3  ;;  %v615_v5 = vld [vmem:[%s7260_s5 + $0x118] sm:$0xff] }
 0x3b5   :  { %793 = vst [vmem:[%s7170_s18 + $0xa8] sm:$0xff] %v5624_v55  ;;  %795 = vst [vmem:[%s7170_s18 + $0xb8] sm:$0xff] %v5626_v0  ;;  %v542_v22 = vmul.f32 %v478_v60, %v7357_v58  ;;  %v675_v41 = vmul.f32 %v611_v31, %v7358_v3 }
 0x3b6   :  { %792 = vst [vmem:[%s7170_s18 + $0xa0] sm:$0xff] %v5637_v50  ;;  %794 = vst [vmem:[%s7170_s18 + $0xb0] sm:$0xff] %v5639_v38  ;;  %v5684_v61 = vadd.f32 %v669_v29, %v541_v19  ;;  %v5686_v14 = vadd.f32 %v671_v16, %v543_v13  ;;  %v5697_v4 = vadd.f32 %v668_v18, %v540_v26  ;;  %v608_v19 = vld [vmem:[%s7260_s5 + $0xe0] sm:$0xff]  ;;  %v610_v13 = vld [vmem:[%s7260_s5 + $0xf0] sm:$0xff] }
 0x3b7   :  { %v5699_v2 = vadd.f32 %v670_v36, %v542_v22  ;;  %v672_v60 = vmul.f32 %v608_v19, %v7358_v3  ;;  %v674_v29 = vmul.f32 %v610_v13, %v7358_v3  ;;  %v613_v22 = vld [vmem:[%s7260_s5 + $0x108] sm:$0xff] }
 0x3bd   :  { %v481_v40 = vld [vmem:[%s7159_s7 + $0xe8] sm:$0xff]  ;;  %v483_v48 = vld [vmem:[%s7159_s7 + $0xf8] sm:$0xff]  ;;  %v480_v62 = vld [vmem:[%s7159_s7 + $0xe0] sm:$0xff] }
 0x3be   :  { %v545_v17 = vmul.f32 %v481_v40, %v7357_v58  ;;  %v547_v33 = vmul.f32 %v483_v48, %v7357_v58  ;;  %v482_v32 = vld [vmem:[%s7159_s7 + $0xf0] sm:$0xff]  ;;  %v544_v34 = vmul.f32 %v480_v62, %v7357_v58  ;;  %v677_v62 = vmul.f32 %v613_v22, %v7358_v3 }
 0x3bf   :  { %797 = vst [vmem:[%s7170_s18 + $0xc8] sm:$0xff] %v5684_v61  ;;  %799 = vst [vmem:[%s7170_s18 + $0xd8] sm:$0xff] %v5686_v14  ;;  %v546_v54 = vmul.f32 %v482_v32, %v7357_v58  ;;  %v679_v32 = vmul.f32 %v615_v5, %v7358_v3  ;;  %v617_v5 = vld [vmem:[%s7260_s5 + $0x128] sm:$0xff] }
 0x3c0   :  { %796 = vst [vmem:[%s7170_s18 + $0xc0] sm:$0xff] %v5697_v4  ;;  %798 = vst [vmem:[%s7170_s18 + $0xd0] sm:$0xff] %v5699_v2  ;;  %v5744_v16 = vadd.f32 %v673_v8, %v545_v17  ;;  %v5746_v26 = vadd.f32 %v675_v41, %v547_v33  ;;  %v5757_v18 = vadd.f32 %v672_v60, %v544_v34  ;;  %v612_v41 = vld [vmem:[%s7260_s5 + $0x100] sm:$0xff]  ;;  %v614_v34 = vld [vmem:[%s7260_s5 + $0x110] sm:$0xff] }
 0x3c1   :  { %v5759_v36 = vadd.f32 %v674_v29, %v546_v54  ;;  %v676_v54 = vmul.f32 %v612_v41, %v7358_v3  ;;  %v678_v60 = vmul.f32 %v614_v34, %v7358_v3  ;;  %v681_v34 = vmul.f32 %v617_v5, %v7358_v3 }
 0x3c7   :  { %v485_v46 = vld [vmem:[%s7159_s7 + $0x108] sm:$0xff]  ;;  %v487_v53 = vld [vmem:[%s7159_s7 + $0x118] sm:$0xff]  ;;  %v484_v17 = vld [vmem:[%s7159_s7 + $0x100] sm:$0xff] }
 0x3c8   :  { %v549_v40 = vmul.f32 %v485_v46, %v7357_v58  ;;  %v551_v48 = vmul.f32 %v487_v53, %v7357_v58  ;;  %v486_v33 = vld [vmem:[%s7159_s7 + $0x110] sm:$0xff]  ;;  %v548_v8 = vmul.f32 %v484_v17, %v7357_v58 }
 0x3c9   :  { %801 = vst [vmem:[%s7170_s18 + $0xe8] sm:$0xff] %v5744_v16  ;;  %803 = vst [vmem:[%s7170_s18 + $0xf8] sm:$0xff] %v5746_v26  ;;  %v550_v13 = vmul.f32 %v486_v33, %v7357_v58 }
 0x3ca   :  { %800 = vst [vmem:[%s7170_s18 + $0xe0] sm:$0xff] %v5757_v18  ;;  %802 = vst [vmem:[%s7170_s18 + $0xf0] sm:$0xff] %v5759_v36  ;;  %v5804_v29 = vadd.f32 %v677_v62, %v549_v40  ;;  %v5806_v46 = vadd.f32 %v679_v32, %v551_v48  ;;  %v5817_v17 = vadd.f32 %v676_v54, %v548_v8  ;;  %v619_v62 = vld [vmem:[%s7260_s5 + $0x138] sm:$0xff] }
 0x3cb   :  { %v5819_v33 = vadd.f32 %v678_v60, %v550_v13  ;;  %v683_v13 = vmul.f32 %v619_v62, %v7358_v3  ;;  %v616_v60 = vld [vmem:[%s7260_s5 + $0x120] sm:$0xff] }
 0x3cc   :  { %7359 = vst [vmem:[#allocation10_spill] sm:$0xff] %v5817_v17  ;;  %v680_v62 = vmul.f32 %v616_v60, %v7358_v3 }
 0x3d1   :  { %v489_v53 = vld [vmem:[%s7159_s7 + $0x128] sm:$0xff]  ;;  %v491_v22 = vld [vmem:[%s7159_s7 + $0x138] sm:$0xff]  ;;  %v488_v32 = vld [vmem:[%s7159_s7 + $0x120] sm:$0xff] }
 0x3d2   :  { %v553_v40 = vmul.f32 %v489_v53, %v7357_v58  ;;  %v555_v48 = vmul.f32 %v491_v22, %v7357_v58  ;;  %v490_v41 = vld [vmem:[%s7159_s7 + $0x130] sm:$0xff]  ;;  %v552_v54 = vmul.f32 %v488_v32, %v7357_v58 }
 0x3d3   :  { %805 = vst [vmem:[%s7170_s18 + $0x108] sm:$0xff] %v5804_v29  ;;  %807 = vst [vmem:[%s7170_s18 + $0x118] sm:$0xff] %v5806_v46  ;;  %v618_v53 = vld [vmem:[%s7260_s5 + $0x130] sm:$0xff]  ;;  %v554_v5 = vmul.f32 %v490_v41, %v7357_v58  ;;  %v621_v41 = vld [vmem:[%s7260_s5 + $0x148] sm:$0xff] }
 0x3d4   :  { %804 = vst [vmem:[%s7170_s18 + $0x100] sm:$0xff] %v5817_v17  ;;  %806 = vst [vmem:[%s7170_s18 + $0x110] sm:$0xff] %v5819_v33  ;;  %v682_v32 = vmul.f32 %v618_v53, %v7358_v3  ;;  %v5864_v8 = vadd.f32 %v681_v34, %v553_v40  ;;  %v5866_v19 = vadd.f32 %v683_v13, %v555_v48  ;;  %v623_v34 = vld [vmem:[%s7260_s5 + $0x158] sm:$0xff] }
 0x3d5   :  { %v5877_v22 = vadd.f32 %v680_v62, %v552_v54  ;;  %v687_v54 = vmul.f32 %v623_v34, %v7358_v3  ;;  %v620_v62 = vld [vmem:[%s7260_s5 + $0x140] sm:$0xff] }
 0x3d6   :  { %7360 = vst [vmem:[#allocation12_spill] sm:$0xff] %v5864_v8  ;;  %7361 = vst [vmem:[#allocation11_spill] sm:$0xff] %v5866_v19  ;;  %v5879_v60 = vadd.f32 %v682_v32, %v554_v5  ;;  %v622_v32 = vld [vmem:[%s7260_s5 + $0x150] sm:$0xff] }
 0x3d7   :  { %7362 = vst [vmem:[#allocation14_spill] sm:$0xff] %v5877_v22 }
 0x3d8   :  { %7363 = vst [vmem:[#allocation13_spill] sm:$0xff] %v5879_v60 }
 0x3db   :  { %v493_v31 = vld [vmem:[%s7159_s7 + $0x148] sm:$0xff]  ;;  %v495_v25 = vld [vmem:[%s7159_s7 + $0x158] sm:$0xff]  ;;  %v492_v13 = vld [vmem:[%s7159_s7 + $0x140] sm:$0xff] }
 0x3dc   :  { %v557_v40 = vmul.f32 %v493_v31, %v7357_v58  ;;  %v559_v48 = vmul.f32 %v495_v25, %v7357_v58  ;;  %v494_v53 = vld [vmem:[%s7159_s7 + $0x150] sm:$0xff]  ;;  %v685_v31 = vmul.f32 %v621_v41, %v7358_v3  ;;  %v556_v5 = vmul.f32 %v492_v13, %v7357_v58 }
 0x3dd   :  { %809 = vst [vmem:[%s7170_s18 + $0x128] sm:$0xff] %v5864_v8  ;;  %811 = vst [vmem:[%s7170_s18 + $0x138] sm:$0xff] %v5866_v19  ;;  %v558_v34 = vmul.f32 %v494_v53, %v7357_v58  ;;  %v684_v13 = vmul.f32 %v620_v62, %v7358_v3  ;;  %v686_v25 = vmul.f32 %v622_v32, %v7358_v3  ;;  %v625_v53 = vld [vmem:[%s7260_s5 + $0x168] sm:$0xff] }
 0x3de   :  { %808 = vst [vmem:[%s7170_s18 + $0x120] sm:$0xff] %v5877_v22  ;;  %810 = vst [vmem:[%s7170_s18 + $0x130] sm:$0xff] %v5879_v60  ;;  %v5924_v11 = vadd.f32 %v685_v31, %v557_v40  ;;  %v5926_v1 = vadd.f32 %v687_v54, %v559_v48  ;;  %v627_v31 = vld [vmem:[%s7260_s5 + $0x178] sm:$0xff] }
 0x3df   :  { %v5937_v41 = vadd.f32 %v684_v13, %v556_v5  ;;  %v5939_v62 = vadd.f32 %v686_v25, %v558_v34  ;;  %v691_v25 = vmul.f32 %v627_v31, %v7358_v3  ;;  %v624_v34 = vld [vmem:[%s7260_s5 + $0x160] sm:$0xff]  ;;  %v626_v13 = vld [vmem:[%s7260_s5 + $0x170] sm:$0xff] }
 0x3e0   :  { %7364 = vst [vmem:[#allocation16_spill] sm:$0xff] %v5924_v11  ;;  %7365 = vst [vmem:[#allocation15_spill] sm:$0xff] %v5926_v1 }
 0x3e1   :  { %7366 = vst [vmem:[#allocation18_spill] sm:$0xff] %v5937_v41  ;;  %7367 = vst [vmem:[#allocation17_spill] sm:$0xff] %v5939_v62 }
 0x3e5   :  { %v497_v27 = vld [vmem:[%s7159_s7 + $0x168] sm:$0xff]  ;;  %v499_v24 = vld [vmem:[%s7159_s7 + $0x178] sm:$0xff]  ;;  %v496_v54 = vld [vmem:[%s7159_s7 + $0x160] sm:$0xff] }
 0x3e6   :  { %v561_v40 = vmul.f32 %v497_v27, %v7357_v58  ;;  %v563_v48 = vmul.f32 %v499_v24, %v7357_v58  ;;  %v498_v32 = vld [vmem:[%s7159_s7 + $0x170] sm:$0xff]  ;;  %v689_v27 = vmul.f32 %v625_v53, %v7358_v3  ;;  %v560_v5 = vmul.f32 %v496_v54, %v7357_v58 }
 0x3e7   :  { %813 = vst [vmem:[%s7170_s18 + $0x148] sm:$0xff] %v5924_v11  ;;  %815 = vst [vmem:[%s7170_s18 + $0x158] sm:$0xff] %v5926_v1  ;;  %v562_v31 = vmul.f32 %v498_v32, %v7357_v58  ;;  %v688_v54 = vmul.f32 %v624_v34, %v7358_v3  ;;  %v690_v24 = vmul.f32 %v626_v13, %v7358_v3  ;;  %v629_v32 = vld [vmem:[%s7260_s5 + $0x188] sm:$0xff] }
 0x3e8   :  { %812 = vst [vmem:[%s7170_s18 + $0x140] sm:$0xff] %v5937_v41  ;;  %814 = vst [vmem:[%s7170_s18 + $0x150] sm:$0xff] %v5939_v62  ;;  %v5984_v52 = vadd.f32 %v689_v27, %v561_v40  ;;  %v5986_v45 = vadd.f32 %v691_v25, %v563_v48  ;;  %v631_v27 = vld [vmem:[%s7260_s5 + $0x198] sm:$0xff] }
 0x3e9   :  { %v5997_v53 = vadd.f32 %v688_v54, %v560_v5  ;;  %v5999_v34 = vadd.f32 %v690_v24, %v562_v31  ;;  %v695_v24 = vmul.f32 %v631_v27, %v7358_v3  ;;  %v628_v31 = vld [vmem:[%s7260_s5 + $0x180] sm:$0xff]  ;;  %v630_v54 = vld [vmem:[%s7260_s5 + $0x190] sm:$0xff] }
 0x3ea   :  { %7368 = vst [vmem:[#allocation20_spill] sm:$0xff] %v5984_v52  ;;  %7369 = vst [vmem:[#allocation19_spill] sm:$0xff] %v5986_v45 }
 0x3eb   :  { %7370 = vst [vmem:[#allocation22_spill] sm:$0xff] %v5997_v53  ;;  %7371 = vst [vmem:[#allocation21_spill] sm:$0xff] %v5999_v34 }
 0x3ef   :  { %v501_v56 = vld [vmem:[%s7159_s7 + $0x188] sm:$0xff]  ;;  %v503_v43 = vld [vmem:[%s7159_s7 + $0x198] sm:$0xff]  ;;  %v500_v25 = vld [vmem:[%s7159_s7 + $0x180] sm:$0xff] }
 0x3f0   :  { %v565_v40 = vmul.f32 %v501_v56, %v7357_v58  ;;  %v567_v48 = vmul.f32 %v503_v43, %v7357_v58  ;;  %v502_v13 = vld [vmem:[%s7159_s7 + $0x190] sm:$0xff]  ;;  %v693_v56 = vmul.f32 %v629_v32, %v7358_v3  ;;  %v564_v5 = vmul.f32 %v500_v25, %v7357_v58 }
 0x3f1   :  { %817 = vst [vmem:[%s7170_s18 + $0x168] sm:$0xff] %v5984_v52  ;;  %819 = vst [vmem:[%s7170_s18 + $0x178] sm:$0xff] %v5986_v45  ;;  %v566_v27 = vmul.f32 %v502_v13, %v7357_v58  ;;  %v692_v25 = vmul.f32 %v628_v31, %v7358_v3  ;;  %v694_v43 = vmul.f32 %v630_v54, %v7358_v3  ;;  %v633_v13 = vld [vmem:[%s7260_s5 + $0x1a8] sm:$0xff] }
 0x3f2   :  { %816 = vst [vmem:[%s7170_s18 + $0x160] sm:$0xff] %v5997_v53  ;;  %818 = vst [vmem:[%s7170_s18 + $0x170] sm:$0xff] %v5999_v34  ;;  %v6044_v12 = vadd.f32 %v693_v56, %v565_v40  ;;  %v6046_v51 = vadd.f32 %v695_v24, %v567_v48  ;;  %v635_v56 = vld [vmem:[%s7260_s5 + $0x1b8] sm:$0xff] }
 0x3f3   :  { %v6057_v32 = vadd.f32 %v692_v25, %v564_v5  ;;  %v6059_v31 = vadd.f32 %v694_v43, %v566_v27  ;;  %v699_v43 = vmul.f32 %v635_v56, %v7358_v3  ;;  %v632_v27 = vld [vmem:[%s7260_s5 + $0x1a0] sm:$0xff]  ;;  %v634_v25 = vld [vmem:[%s7260_s5 + $0x1b0] sm:$0xff] }
 0x3f4   :  { %7372 = vst [vmem:[#allocation24_spill] sm:$0xff] %v6044_v12  ;;  %7373 = vst [vmem:[#allocation23_spill] sm:$0xff] %v6046_v51 }
 0x3f5   :  { %7374 = vst [vmem:[#allocation26_spill] sm:$0xff] %v6057_v32  ;;  %7375 = vst [vmem:[#allocation25_spill] sm:$0xff] %v6059_v31 }
 0x3f9   :  { %v505_v7 = vld [vmem:[%s7159_s7 + $0x1a8] sm:$0xff]  ;;  %v507_v63 = vld [vmem:[%s7159_s7 + $0x1b8] sm:$0xff]  ;;  %v504_v24 = vld [vmem:[%s7159_s7 + $0x1a0] sm:$0xff] }
 0x3fa   :  { %v569_v40 = vmul.f32 %v505_v7, %v7357_v58  ;;  %v571_v48 = vmul.f32 %v507_v63, %v7357_v58  ;;  %v506_v54 = vld [vmem:[%s7159_s7 + $0x1b0] sm:$0xff]  ;;  %v697_v7 = vmul.f32 %v633_v13, %v7358_v3  ;;  %v568_v5 = vmul.f32 %v504_v24, %v7357_v58 }
 0x3fb   :  { %821 = vst [vmem:[%s7170_s18 + $0x188] sm:$0xff] %v6044_v12  ;;  %823 = vst [vmem:[%s7170_s18 + $0x198] sm:$0xff] %v6046_v51  ;;  %v570_v56 = vmul.f32 %v506_v54, %v7357_v58  ;;  %v696_v24 = vmul.f32 %v632_v27, %v7358_v3  ;;  %v698_v63 = vmul.f32 %v634_v25, %v7358_v3  ;;  %v637_v54 = vld [vmem:[%s7260_s5 + $0x1c8] sm:$0xff] }
 0x3fc   :  { %820 = vst [vmem:[%s7170_s18 + $0x180] sm:$0xff] %v6057_v32  ;;  %822 = vst [vmem:[%s7170_s18 + $0x190] sm:$0xff] %v6059_v31  ;;  %v6104_v12 = vadd.f32 %v697_v7, %v569_v40  ;;  %v6106_v51 = vadd.f32 %v699_v43, %v571_v48  ;;  %v639_v7 = vld [vmem:[%s7260_s5 + $0x1d8] sm:$0xff] }
 0x3fd   :  { %v6117_v13 = vadd.f32 %v696_v24, %v568_v5  ;;  %v6119_v27 = vadd.f32 %v698_v63, %v570_v56  ;;  %v703_v63 = vmul.f32 %v639_v7, %v7358_v3  ;;  %v636_v56 = vld [vmem:[%s7260_s5 + $0x1c0] sm:$0xff]  ;;  %v638_v24 = vld [vmem:[%s7260_s5 + $0x1d0] sm:$0xff] }
 0x3fe   :  { %7376 = vst [vmem:[#allocation28_spill] sm:$0xff] %v6104_v12  ;;  %7377 = vst [vmem:[#allocation27_spill] sm:$0xff] %v6106_v51 }
 0x3ff   :  { %7378 = vst [vmem:[#allocation30_spill] sm:$0xff] %v6117_v13  ;;  %7379 = vst [vmem:[#allocation29_spill] sm:$0xff] %v6119_v27 }
 0x403   :  { %v509_v53 = vld [vmem:[%s7159_s7 + $0x1c8] sm:$0xff]  ;;  %v511_v34 = vld [vmem:[%s7159_s7 + $0x1d8] sm:$0xff]  ;;  %v508_v43 = vld [vmem:[%s7159_s7 + $0x1c0] sm:$0xff] }
 0x404   :  { %v573_v40 = vmul.f32 %v509_v53, %v7357_v58  ;;  %v575_v48 = vmul.f32 %v511_v34, %v7357_v58  ;;  %v510_v25 = vld [vmem:[%s7159_s7 + $0x1d0] sm:$0xff]  ;;  %v701_v34 = vmul.f32 %v637_v54, %v7358_v3  ;;  %v572_v5 = vmul.f32 %v508_v43, %v7357_v58 }
 0x405   :  { %825 = vst [vmem:[%s7170_s18 + $0x1a8] sm:$0xff] %v6104_v12  ;;  %827 = vst [vmem:[%s7170_s18 + $0x1b8] sm:$0xff] %v6106_v51  ;;  %v574_v7 = vmul.f32 %v510_v25, %v7357_v58  ;;  %v700_v43 = vmul.f32 %v636_v56, %v7358_v3  ;;  %v702_v53 = vmul.f32 %v638_v24, %v7358_v3  ;;  %v641_v25 = vld [vmem:[%s7260_s5 + $0x1e8] sm:$0xff] }
 0x406   :  { %824 = vst [vmem:[%s7170_s18 + $0x1a0] sm:$0xff] %v6117_v13  ;;  %826 = vst [vmem:[%s7170_s18 + $0x1b0] sm:$0xff] %v6119_v27  ;;  %v6164_v12 = vadd.f32 %v701_v34, %v573_v40  ;;  %v6166_v51 = vadd.f32 %v703_v63, %v575_v48  ;;  %v643_v34 = vld [vmem:[%s7260_s5 + $0x1f8] sm:$0xff] }
 0x407   :  { %v6177_v54 = vadd.f32 %v700_v43, %v572_v5  ;;  %v6179_v56 = vadd.f32 %v702_v53, %v574_v7  ;;  %v707_v53 = vmul.f32 %v643_v34, %v7358_v3  ;;  %v640_v7 = vld [vmem:[%s7260_s5 + $0x1e0] sm:$0xff]  ;;  %v642_v43 = vld [vmem:[%s7260_s5 + $0x1f0] sm:$0xff] }
 0x408   :  { %7380 = vst [vmem:[#allocation32_spill] sm:$0xff] %v6164_v12  ;;  %7381 = vst [vmem:[#allocation31_spill] sm:$0xff] %v6166_v51 }
 0x409   :  { %7382 = vst [vmem:[#allocation34_spill] sm:$0xff] %v6177_v54  ;;  %7383 = vst [vmem:[#allocation33_spill] sm:$0xff] %v6179_v56 }
 0x40d   :  { %v513_v32 = vld [vmem:[%s7159_s7 + $0x1e8] sm:$0xff]  ;;  %v515_v31 = vld [vmem:[%s7159_s7 + $0x1f8] sm:$0xff]  ;;  %v512_v63 = vld [vmem:[%s7159_s7 + $0x1e0] sm:$0xff] }
 0x40e   :  { %v577_v40 = vmul.f32 %v513_v32, %v7357_v58  ;;  %v579_v48 = vmul.f32 %v515_v31, %v7357_v58  ;;  %v514_v24 = vld [vmem:[%s7159_s7 + $0x1f0] sm:$0xff]  ;;  %v705_v31 = vmul.f32 %v641_v25, %v7358_v3  ;;  %v576_v5 = vmul.f32 %v512_v63, %v7357_v58 }
 0x40f   :  { %829 = vst [vmem:[%s7170_s18 + $0x1c8] sm:$0xff] %v6164_v12  ;;  %831 = vst [vmem:[%s7170_s18 + $0x1d8] sm:$0xff] %v6166_v51  ;;  %v578_v34 = vmul.f32 %v514_v24, %v7357_v58  ;;  %v704_v63 = vmul.f32 %v640_v7, %v7358_v3  ;;  %v706_v32 = vmul.f32 %v642_v43, %v7358_v3 }
 0x410   :  { %828 = vst [vmem:[%s7170_s18 + $0x1c0] sm:$0xff] %v6177_v54  ;;  %830 = vst [vmem:[%s7170_s18 + $0x1d0] sm:$0xff] %v6179_v56  ;;  %v6224_v12 = vadd.f32 %v705_v31, %v577_v40  ;;  %v6226_v51 = vadd.f32 %v707_v53, %v579_v48 }
 0x411   :  { %v6228_v13 = vadd.f32 %v704_v63, %v576_v5  ;;  %v6230_v27 = vadd.f32 %v706_v32, %v578_v34 }
 0x412   :  { %7384 = vst [vmem:[#allocation36_spill] sm:$0xff] %v6224_v12  ;;  %7385 = vst [vmem:[#allocation35_spill] sm:$0xff] %v6226_v51 }
 0x413   :  { %7386 = vst [vmem:[#allocation38_spill] sm:$0xff] %v6228_v13  ;;  %7387 = vst [vmem:[#allocation37_spill] sm:$0xff] %v6230_v27 }
 0x414   :  { %833 = vst [vmem:[%s7170_s18 + $0x1e8] sm:$0xff] %v6224_v12  ;;  %835 = vst [vmem:[%s7170_s18 + $0x1f8] sm:$0xff] %v6226_v51 }
 0x415   :  { %832 = vst [vmem:[%s7170_s18 + $0x1e0] sm:$0xff] %v6228_v13  ;;  %834 = vst [vmem:[%s7170_s18 + $0x1f0] sm:$0xff] %v6230_v27 }
 0x419   :  { %v2088_v24 = vpop.f32.mrb[4].mxu1 }
 0x41a   :  { %v2099_v32 = vrot.slane %v2088_v24, 4  ;;  %v2090_v31 = vpop.f32.mrb[5].mxu1 }
 0x41b   :  { %v2105_v53 = vrot.slane %v2090_v31, 4  ;;  %v2092_v5 = vpop.f32.mrb[6].mxu1 }
 0x41c   :  { %v2100_v7 = vadd.f32 %v2099_v32, %v2088_v24  ;;  %v2111_v43 = vrot.slane %v2092_v5, 4  ;;  %v2094_v34 = vpop.f32.mrb[7].mxu1 }
 0x41d   :  { %v2106_v63 = vadd.f32 %v2105_v53, %v2090_v31  ;;  %v2117_v40 = vrot.slane %v2094_v34, 4 }
 0x41e   :  { %v2101_v25 = vrot.slane %v2100_v7, 2  ;;  %v2112_v3 = vadd.f32 %v2111_v43, %v2092_v5 }
 0x41f   :  { %v2107_v58 = vrot.slane %v2106_v63, 2  ;;  %v2118_v12 = vadd.f32 %v2117_v40, %v2094_v34 }
 0x420   :  { %v2102_v51 = vadd.f32 %v2101_v25, %v2100_v7  ;;  %v2113_v54 = vrot.slane %v2112_v3, 2 }
 0x421   :  { %v2108_v56 = vadd.f32 %v2107_v58, %v2106_v63  ;;  %v2119_v52 = vrot.slane %v2118_v12, 2 }
 0x422   :  { %v2103_v45 = vrot.slane %v2102_v51, 1  ;;  %v2114_v48 = vadd.f32 %v2113_v54, %v2112_v3 }
 0x423   :  { %v2109_v13 = vrot.slane %v2108_v56, 1  ;;  %v2120_v27 = vadd.f32 %v2119_v52, %v2118_v12 }
 0x424   :  { %v2104_v41 = vadd.f32 %v2103_v45, %v2102_v51  ;;  %v2115_v62 = vrot.slane %v2114_v48, 1 }
 0x425   :  { %v2110_v11 = vadd.f32 %v2109_v13, %v2108_v56  ;;  %v2121_v32 = vrot.slane %v2120_v27, 1 }
 0x426   :  { %v2123_v1 = vmul.f32 0.125, %v2104_v41  ;;  %v2116_v22 = vadd.f32 %v2115_v62, %v2114_v48 }
 0x427   :  { %v2124_v53 = vmul.f32 0.125, %v2110_v11  ;;  %v2122_v60 = vadd.f32 %v2121_v32, %v2120_v27 }
 0x428   :  { %v2127_v8 = vsub.f32 %v2088_v24, %v2123_v1  ;;  %v2125_v43 = vmul.f32 0.125, %v2116_v22 }
 0x429   :  { %v2128_v19 = vsub.f32 %v2090_v31, %v2124_v53  ;;  %v2126_v40 = vmul.f32 0.125, %v2122_v60 }
 0x42a   :  { %v2131_v25 = vmul.f32 %v2127_v8, %v2127_v8  ;;  %v2129_v7 = vsub.f32 %v2092_v5, %v2125_v43 }
 0x42b   :  { %v2132_v58 = vmul.f32 %v2128_v19, %v2128_v19  ;;  %v2130_v63 = vsub.f32 %v2094_v34, %v2126_v40 }
 0x42c   :  { %v2135_v17 = vrot.slane %v2131_v25, 4  ;;  %v2133_v3 = vmul.f32 %v2129_v7, %v2129_v7 }
 0x42d   :  { %v2141_v54 = vrot.slane %v2132_v58, 4  ;;  %v2134_v12 = vmul.f32 %v2130_v63, %v2130_v63 }
 0x42e   :  { %v2136_v51 = vadd.f32 %v2135_v17, %v2131_v25  ;;  %v2147_v45 = vrot.slane %v2133_v3, 4 }
 0x42f   :  { %v2142_v52 = vadd.f32 %v2141_v54, %v2132_v58  ;;  %v2153_v13 = vrot.slane %v2134_v12, 4 }
 0x430   :  { %v2137_v41 = vrot.slane %v2136_v51, 2  ;;  %v2148_v62 = vadd.f32 %v2147_v45, %v2133_v3 }
 0x431   :  { %v2143_v11 = vrot.slane %v2142_v52, 2  ;;  %v2154_v27 = vadd.f32 %v2153_v13, %v2134_v12  ;;  %v2097_v13 = vld [vmem:[%s7164_s12] sm:$0x3] }
 0x432   :  { %v2138_v1 = vadd.f32 %v2137_v41, %v2136_v51  ;;  %v2149_v22 = vrot.slane %v2148_v62, 2  ;;  %v2098_v41 = vld [vmem:[%s7165_s13] sm:$0x3] }
 0x433   :  { %v2144_v56 = vadd.f32 %v2143_v11, %v2142_v52  ;;  %v2155_v60 = vrot.slane %v2154_v27, 2 }
 0x434   :  { %v2139_v48 = vrot.slane %v2138_v1, 1  ;;  %v2150_v24 = vadd.f32 %v2149_v22, %v2148_v62  ;;  %v7388_v62 = vld [vmem:[#allocation6_spill] sm:$0xff] }
 0x435   :  { %v2145_v31 = vrot.slane %v2144_v56, 1  ;;  %v2156_v5 = vadd.f32 %v2155_v60, %v2154_v27  ;;  %v2179_v11 = vrot.slane %v2097_v13, %v7388_v62 }
 0x436   :  { %v2140_v34 = vadd.f32 %v2139_v48, %v2138_v1  ;;  %v2151_v32 = vrot.slane %v2150_v24, 1  ;;  %v7389_v1 = vld [vmem:[#allocation7_spill] sm:$0xff]  ;;  %v2194_v48 = vrot.slane %v2098_v41, %v7388_v62 }
 0x437   :  { %v2146_v53 = vadd.f32 %v2145_v31, %v2144_v56  ;;  %v2157_v43 = vrot.slane %v2156_v5, 1  ;;  %v2183_v22 = vrot.slane %v2097_v13, %v7389_v1 }
 0x438   :  { %v2159_v17 = vmul.f32 0.125, %v2140_v34  ;;  %v2152_v40 = vadd.f32 %v2151_v32, %v2150_v24 }
 0x439   :  { %v2160_v25 = vmul.f32 0.125, %v2146_v53  ;;  %v2158_v58 = vadd.f32 %v2157_v43, %v2156_v5  ;;  %v2198_v5 = vrot.slane %v2098_v41, %v7389_v1  ;;  %v7392_v41 = vpack.c.bf16 %v5399_v23, %v5397_v21 }
 0x43a   :  { %v2163_v54 = vadd.f32 1e-05, %v2159_v17  ;;  %v2161_v3 = vmul.f32 0.125, %v2152_v40  ;;  %v7395_v21 = vpack.c.bf16 %v5506_v49, %v5504_v35  ;;  %v7401_v35 = vpack.c.bf16 %v5686_v14, %v5684_v61  ;;  %v7414_v14 = vld [vmem:[#allocation15_spill] sm:$0xff] }
 0x43b   :  { %v2164_v45 = vadd.f32 1e-05, %v2160_v25  ;;  %v2162_v12 = vmul.f32 0.125, %v2158_v58  ;;  %v7402_v49 = vpack.c.bf16 %v5699_v2, %v5697_v4  ;;  %v7415_v4 = vld [vmem:[#allocation16_spill] sm:$0xff] }
 0x43c   :  { %3273 = vrsqrt.f32 %v2163_v54  ;;  %v2165_v51 = vadd.f32 1e-05, %v2161_v3  ;;  %v7416_v2 = vpack.c.bf16 %v7414_v14, %v7415_v4 }
 0x43d   :  { %3275 = vrsqrt.f32 %v2164_v45  ;;  %v2166_v52 = vadd.f32 1e-05, %v2162_v12 }
 0x43e   :  { %3277 = vrsqrt.f32 %v2165_v51 }
 0x43f   :  { %3279 = vrsqrt.f32 %v2166_v52 }
 0x446   :  { %v3274_v27 = vpop.eup %3273 }
 0x447   :  { %v3276_v56 = vpop.eup %3275  ;;  %v2171_v60 = vmul.f32 %v3274_v27, %v2127_v8 }
 0x448   :  { %v3278_v24 = vpop.eup %3277  ;;  %v2172_v31 = vmul.f32 %v3276_v56, %v2128_v19  ;;  %v7390_v19 = vpack.c.bf16 %v5349_v10, %v5332_v44  ;;  %v7393_v56 = vpack.c.bf16 %v5446_v28, %v5444_v15  ;;  %v7396_v15 = vpack.c.bf16 %v5519_v30, %v5517_v42 }
 0x449   :  { %v3280_v34 = vpop.eup %3279  ;;  %v2186_v32 = vmul.f32 %v2179_v11, %v2171_v60  ;;  %v2173_v53 = vmul.f32 %v3278_v24, %v2129_v7  ;;  %v7391_v7 = vpack.c.bf16 %v5386_v37, %v5384_v57  ;;  %v7394_v57 = vpack.c.bf16 %v5459_v47, %v5457_v9 }
 0x44a   :  { %v2187_v43 = vmul.f32 %v2183_v22, %v2172_v31  ;;  %v2174_v17 = vmul.f32 %v3280_v34, %v2130_v63  ;;  %v7397_v28 = vpack.c.bf16 %v5566_v20, %v5564_v6  ;;  %v7398_v31 = vpack.c.bf16 %v5579_v59, %v5577_v39  ;;  %v7406_v20 = vld [vmem:[#allocation10_spill] sm:$0xff]  ;;  %v7408_v59 = vld [vmem:[#allocation11_spill] sm:$0xff] }
 0x44b   :  { %v2201_v40 = vadd.f32 %v2194_v48, %v2186_v32  ;;  %v2188_v25 = vmul.f32 %v2179_v11, %v2173_v53  ;;  %v7399_v9 = vpack.c.bf16 %v5626_v0, %v5624_v55  ;;  %v7400_v47 = vpack.c.bf16 %v5639_v38, %v5637_v50  ;;  %v7409_v55 = vld [vmem:[#allocation12_spill] sm:$0xff]  ;;  %v7411_v50 = vld [vmem:[#allocation13_spill] sm:$0xff]  ;;  %v7412_v38 = vld [vmem:[#allocation14_spill] sm:$0xff] }
 0x44c   :  { %v2189_v58 = vmul.f32 %v2183_v22, %v2174_v17  ;;  %v2202_v54 = vadd.f32 %v2198_v5, %v2187_v43  ;;  %v7403_v42 = vpack.c.bf16 %v5746_v26, %v5744_v16  ;;  %v7404_v30 = vpack.c.bf16 %v5759_v36, %v5757_v18  ;;  %v7417_v16 = vld [vmem:[#allocation17_spill] sm:$0xff]  ;;  %v7418_v26 = vld [vmem:[#allocation18_spill] sm:$0xff]  ;;  %v7420_v36 = vld [vmem:[#allocation19_spill] sm:$0xff] }
 0x44d   :  { %v2203_v3 = vadd.f32 %v2194_v48, %v2188_v25  ;;  %v2205_v12 = vmax.f32 %v2201_v40, 0.0  ;;  %v7405_v6 = vpack.c.bf16 %v5806_v46, %v5804_v29  ;;  %v7407_v39 = vpack.c.bf16 %v5819_v33, %v7406_v20  ;;  %v7421_v29 = vld [vmem:[#allocation20_spill] sm:$0xff]  ;;  %v7423_v33 = vld [vmem:[#allocation21_spill] sm:$0xff]  ;;  %v7426_v32 = vld [vmem:[#allocation23_spill] sm:$0xff] }
 0x44e   :  { %v2204_v45 = vadd.f32 %v2198_v5, %v2189_v58  ;;  %v2206_v8 = vmax.f32 %v2202_v54, 0.0  ;;  %v7410_v0 = vpack.c.bf16 %v7408_v59, %v7409_v55  ;;  %v7413_v61 = vpack.c.bf16 %v7411_v50, %v7412_v38  ;;  %v7424_v5 = vld [vmem:[#allocation22_spill] sm:$0xff]  ;;  %v7427_v53 = vld [vmem:[#allocation24_spill] sm:$0xff]  ;;  %v7429_v17 = vld [vmem:[#allocation25_spill] sm:$0xff] }
 0x44f   :  { %v2207_v51 = vmax.f32 %v2203_v3, 0.0  ;;  %v7419_v18 = vpack.c.bf16 %v7417_v16, %v7418_v26  ;;  %v7422_v46 = vpack.c.bf16 %v7420_v36, %v7421_v29  ;;  %v7425_v34 = vpack.c.bf16 %v7423_v33, %v7424_v5  ;;  %v7430_v40 = vld [vmem:[#allocation26_spill] sm:$0xff]  ;;  %v7432_v58 = vld [vmem:[#allocation27_spill] sm:$0xff]  ;;  %v7433_v54 = vld [vmem:[#allocation28_spill] sm:$0xff] }
 0x450   :  { %v2208_v52 = vmax.f32 %v2204_v45, 0.0  ;;  %v7428_v43 = vpack.c.bf16 %v7426_v32, %v7427_v53  ;;  %v7431_v25 = vpack.c.bf16 %v7429_v17, %v7430_v40  ;;  %v7434_v3 = vpack.c.bf16 %v7432_v58, %v7433_v54  ;;  %v7435_v45 = vld [vmem:[#allocation29_spill] sm:$0xff] }
 0x451   :  { %v2209_v13 = vpack.c.bf16 %v2207_v51, %v2205_v12  ;;  %v7436_v12 = vld [vmem:[#allocation30_spill] sm:$0xff]  ;;  %v838_v55 = vld [vmem:[%s7263_s24] sm:$0x3]  ;;  %v7452_v26 = vlaneseq }
 0x452   :  { %v2210_v27 = vpack.c.bf16 %v2208_v52, %v2206_v8  ;;  %v7437_v51 = vpack.c.bf16 %v7435_v45, %v7436_v12  ;;  %v7438_v8 = vld [vmem:[#allocation31_spill] sm:$0xff]  ;;  %v7439_v52 = vld [vmem:[#allocation32_spill] sm:$0xff]  ;;  %v848_v50 = vld [vmem:[%s7265_s3] sm:$0x3] }
 0x453   :  { %vm843_vm0 = vcmp.lt.s32.totalorder %v7452_v26, 256  ;;  %v984_v45 = vld [vmem:[%s7261_s27 + $0x20] sm:$0xff]  ;;  %v986_v12 = vld [vmem:[%s7261_s27 + $0x30] sm:$0xff] }
 0x454   :  { %2435 = vmatprep.mubr.bf16.mxu0 %v2210_v27  ;;  %v7441_v27 = vld [vmem:[#allocation33_spill] sm:$0xff]  ;;  %v994_v26 = vld [vmem:[%s7261_s27 + $0x70] sm:$0xff] }
 0x455   :  { %2436 = vmatmul.mubr.bf16.vlgmr.msra.gmra.mrb[8].mxu0 %v2209_v13  ;;  %v7440_v13 = vpack.c.bf16 %v7438_v8, %v7439_v52 }
 0x456   :  { %2560 = vmatpush1.bf16.msra.mxu0 %v7390_v19  ;;  %v7442_v19 = vld [vmem:[#allocation34_spill] sm:$0xff] }
 0x457   :  { %2561 = vmatprep.subr.bf16.mxu0 %v7391_v7  ;;  %v7443_v7 = vpack.c.bf16 %v7441_v27, %v7442_v19 }
 0x459   :  { %v2512_v63 = vpop.f32.mrb[8].mxu1 }
 0x45a   :  { %2562 = vmatpush1.bf16.msra.mxu0 %v7392_v41  ;;  %v2521_v11 = vmax.f32 %v2512_v63, 0.0  ;;  %v2514_v22 = vpop.f32.mrb[9].mxu1  ;;  %v7444_v63 = vld [vmem:[#allocation35_spill] sm:$0xff]  ;;  %v7445_v41 = vld [vmem:[#allocation36_spill] sm:$0xff] }
 0x45b   :  { %2563 = vmatprep.subr.bf16.mxu0 %v7393_v56  ;;  %v2522_v60 = vmax.f32 %v2514_v22, 0.0  ;;  %v2516_v48 = vpop.f32.mrb[10].mxu1  ;;  %v7447_v22 = vld [vmem:[#allocation37_spill] sm:$0xff]  ;;  %v7448_v56 = vld [vmem:[#allocation38_spill] sm:$0xff] }
 0x45c   :  { %v2523_v24 = vmax.f32 %v2516_v48, 0.0  ;;  %v2518_v44 = vpop.f32.mrb[11].mxu1  ;;  %v853_v48 = vld [vmem:[%s7162_s10 + $0x8] sm:$0xff] }
 0x45d   :  { %v2524_v10 = vmax.f32 %v2518_v44, 0.0  ;;  %v981_v44 = vld [vmem:[%s7261_s27 + $0x8] sm:$0xff] }
 0x45e   :  { %2564 = vmatpush1.bf16.msra.mxu0 %v7394_v57  ;;  %v2525_v37 = vpack.c.bf16 %v2523_v24, %v2521_v11  ;;  %v7446_v11 = vpack.c.bf16 %v7444_v63, %v7445_v41  ;;  %v855_v24 = vld [vmem:[%s7162_s10 + $0x18] sm:$0xff] }
 0x45f   :  { %2565 = vmatprep.subr.bf16.mxu0 %v7395_v21  ;;  %v2526_v23 = vpack.c.bf16 %v2524_v10, %v2522_v60  ;;  %v7449_v60 = vpack.c.bf16 %v7447_v22, %v7448_v56  ;;  %v7450_v10 = vld [vmem:[#allocation8_spill] sm:$0xff] }
 0x460   :  { %v917_v57 = vmul.f32 %v853_v48, %v7450_v10  ;;  %v919_v21 = vmul.f32 %v855_v24, %v7450_v10  ;;  %v991_v56 = vld [vmem:[%s7261_s27 + $0x58] sm:$0xff] }
 0x461   :  { %2591 = vmatprep.mubr.bf16.mxu0 %v2526_v23  ;;  %v7451_v23 = vld [vmem:[#allocation9_spill] sm:$0xff] }
 0x462   :  { %2566 = vmatpush1.bf16.msra.mxu0 %v7396_v15  ;;  %v1045_v15 = vmul.f32 %v981_v44, %v7451_v23  ;;  %v849_v4 = vmul.f32 %v848_v50, %v7451_v23  ;;  %v1048_v8 = vmul.f32 %v984_v45, %v7451_v23  ;;  %v1050_v52 = vmul.f32 %v986_v12, %v7451_v23 }
 0x463   :  { %2567 = vmatprep.subr.bf16.mxu0 %v7397_v28  ;;  %v852_v28 = vld [vmem:[%s7162_s10] sm:$0xff] }
 0x466   :  { %2568 = vmatpush1.bf16.msra.mxu0 %v7398_v31  ;;  %v854_v31 = vld [vmem:[%s7162_s10 + $0x10] sm:$0xff] }
 0x467   :  { %2569 = vmatprep.subr.bf16.mxu0 %v7399_v9 }
 0x46a   :  { %2570 = vmatpush1.bf16.msra.mxu0 %v7400_v47  ;;  %v916_v47 = vmul.f32 %v852_v28, %v7450_v10 }
 0x46b   :  { %2571 = vmatprep.subr.bf16.mxu0 %v7401_v35  ;;  %v918_v35 = vmul.f32 %v854_v31, %v7450_v10 }
 0x46e   :  { %2572 = vmatpush1.bf16.msra.mxu0 %v7402_v49  ;;  %v980_v49 = vld [vmem:[%s7261_s27] sm:$0xff] }
 0x46f   :  { %2573 = vmatprep.subr.bf16.mxu0 %v7403_v42  ;;  %v982_v42 = vld [vmem:[%s7261_s27 + $0x10] sm:$0xff]  ;;  %v1044_v20 = vmul.f32 %v980_v49, %v7451_v23 }
 0x472   :  { %2574 = vmatpush1.bf16.msra.mxu0 %v7404_v30  ;;  %v836_v30 = vld [vmem:[%s7160_s8] sm:$0x3] }
 0x473   :  { %2575 = vmatprep.subr.bf16.mxu0 %v7405_v6  ;;  %v1109_v6 = vadd.f32 %v1045_v15, %v917_v57  ;;  %v837_v59 = vmul.f32 %v836_v30, %v7450_v10  ;;  %v1055_v57 = vmul.f32 %v991_v56, %v7451_v23  ;;  %v990_v15 = vld [vmem:[%s7261_s27 + $0x50] sm:$0xff] }
 0x475   :  { %1173 = vst [vmem:[%s7173_s21 + $0x8] sm:$0xff] %v1109_v6 }
 0x476   :  { %2576 = vmatpush1.bf16.msra.mxu0 %v7407_v39  ;;  %v1046_v39 = vmul.f32 %v982_v42, %v7451_v23 }
 0x477   :  { %2577 = vmatprep.subr.bf16.mxu0 %v7410_v0  ;;  %v846_v0 = vld [vmem:[%s7161_s9] sm:$0x3] }
 0x478   :  { %v847_v14 = vmul.f32 %v846_v0, %v7450_v10  ;;  %v1110_v16 = vadd.f32 %v1046_v39, %v918_v35  ;;  %v995_v0 = vld [vmem:[%s7261_s27 + $0x78] sm:$0xff] }
 0x47a   :  { %2578 = vmatpush1.bf16.msra.mxu0 %v7413_v61  ;;  %v839_v61 = vmul.f32 %v838_v55, %v7451_v23  ;;  %v6412_v29 = vadd.f32 %v849_v4, %v847_v14  ;;  %1174 = vst [vmem:[%s7173_s21 + $0x10] sm:$0xff] %v1110_v16  ;;  %v1059_v4 = vmul.f32 %v995_v0, %v7451_v23 }
 0x47b   :  { %2579 = vmatprep.subr.bf16.mxu0 %v7416_v2  ;;  %v1108_v2 = vadd.f32 %v1044_v20, %v916_v47  ;;  %v1054_v47 = vmul.f32 %v990_v15, %v7451_v23  ;;  %v1003_v15 = vld [vmem:[%s7261_s27 + $0xb8] sm:$0xff] }
 0x47c   :  { %v6410_v36 = vadd.f32 %v839_v61, %v837_v59  ;;  %851 = vst.msk [vmem:[%s7453_s16] sm:$0x3] %vm843_vm0, %v6412_v29 }
 0x47d   :  { %1172 = vst [vmem:[%s7173_s21] sm:$0xff] %v1108_v2 }
 0x47e   :  { %2580 = vmatpush1.bf16.msra.mxu0 %v7419_v18  ;;  %845 = vst.msk [vmem:[%s7171_s19] sm:$0x3] %vm843_vm0, %v6410_v36 }
 0x47f   :  { %2581 = vmatprep.subr.bf16.mxu0 %v7422_v46  ;;  %v2714_v46 = vpack.c.bf16 %v1110_v16, %v1108_v2  ;;  %v992_v16 = vld [vmem:[%s7261_s27 + $0x60] sm:$0xff] }
 0x482   :  { %2582 = vmatpush1.bf16.msra.mxu0 %v7425_v34  ;;  %v985_v34 = vld [vmem:[%s7261_s27 + $0x28] sm:$0xff] }
 0x483   :  { %2583 = vmatprep.subr.bf16.mxu0 %v7428_v43  ;;  %v987_v43 = vld [vmem:[%s7261_s27 + $0x38] sm:$0xff]  ;;  %v1049_v17 = vmul.f32 %v985_v34, %v7451_v23 }
 0x484   :  { %v1051_v58 = vmul.f32 %v987_v43, %v7451_v23 }
 0x486   :  { %2584 = vmatpush1.bf16.msra.mxu0 %v7431_v25 }
 0x487   :  { %2585 = vmatprep.subr.bf16.mxu0 %v7434_v3 }
 0x48a   :  { %2586 = vmatpush1.bf16.msra.mxu0 %v7437_v51 }
 0x48b   :  { %2587 = vmatprep.subr.bf16.mxu0 %v7440_v13 }
 0x48e   :  { %2588 = vmatpush1.bf16.msra.mxu0 %v7443_v7  ;;  %v989_v7 = vld [vmem:[%s7261_s27 + $0x48] sm:$0xff] }
 0x48f   :  { %2589 = vmatprep.subr.bf16.mxu0 %v7446_v11  ;;  %v1053_v44 = vmul.f32 %v989_v7, %v7451_v23 }
 0x492   :  { %2590 = vmatpush1.bf16.msra.mxu0 %v7449_v60 }
 0x495   :  { %2592 = vmatmul.mubr.bf16.vlgmr.msra.gmra.mrb[12].mxu0 %v2525_v37  ;;  %v983_v37 = vld [vmem:[%s7261_s27 + $0x18] sm:$0xff] }
 0x496   :  { %v1047_v9 = vmul.f32 %v983_v37, %v7451_v23  ;;  %v988_v37 = vld [vmem:[%s7261_s27 + $0x40] sm:$0xff] }
 0x498   :  { %v1111_v38 = vadd.f32 %v1047_v9, %v919_v21  ;;  %v1052_v9 = vmul.f32 %v988_v37, %v7451_v23 }
 0x49a   :  { %1175 = vst [vmem:[%s7173_s21 + $0x18] sm:$0xff] %v1111_v38  ;;  %v2715_v18 = vpack.c.bf16 %v1111_v38, %v1109_v6  ;;  %v993_v6 = vld [vmem:[%s7261_s27 + $0x68] sm:$0xff] }
 0x49b   :  { %v1057_v14 = vmul.f32 %v993_v6, %v7451_v23 }
 0x49c   :  { %2746 = vmatprep.subr.bf16.mxu1 %v2715_v18 }
 0x49d   :  { %2747 = vmatpush1.bf16.msra.mxu1 %v2714_v46 }
 0x4a1   :  { %v857_v33 = vld [vmem:[%s7162_s10 + $0x28] sm:$0xff]  ;;  %v859_v5 = vld [vmem:[%s7162_s10 + $0x38] sm:$0xff]  ;;  %v856_v40 = vld [vmem:[%s7162_s10 + $0x20] sm:$0xff] }
 0x4a2   :  { %v921_v32 = vmul.f32 %v857_v33, %v7450_v10  ;;  %v923_v53 = vmul.f32 %v859_v5, %v7450_v10  ;;  %v858_v25 = vld [vmem:[%s7162_s10 + $0x30] sm:$0xff]  ;;  %v920_v54 = vmul.f32 %v856_v40, %v7450_v10  ;;  %v861_v27 = vld [vmem:[%s7162_s10 + $0x48] sm:$0xff]  ;;  %v863_v19 = vld [vmem:[%s7162_s10 + $0x58] sm:$0xff]  ;;  %v1056_v33 = vmul.f32 %v992_v16, %v7451_v23 }
 0x4a3   :  { %v922_v3 = vmul.f32 %v858_v25, %v7450_v10  ;;  %v925_v11 = vmul.f32 %v861_v27, %v7450_v10  ;;  %v927_v22 = vmul.f32 %v863_v19, %v7450_v10  ;;  %v1058_v5 = vmul.f32 %v994_v26, %v7451_v23  ;;  %v996_v27 = vld [vmem:[%s7261_s27 + $0x80] sm:$0xff]  ;;  %v998_v19 = vld [vmem:[%s7261_s27 + $0x90] sm:$0xff]  ;;  %v1007_v26 = vld [vmem:[%s7261_s27 + $0xd8] sm:$0xff] }
 0x4a4   :  { %v1113_v51 = vadd.f32 %v1049_v17, %v921_v32  ;;  %v1115_v13 = vadd.f32 %v1051_v58, %v923_v53  ;;  %v1112_v63 = vadd.f32 %v1048_v8, %v920_v54  ;;  %v997_v17 = vld [vmem:[%s7261_s27 + $0x88] sm:$0xff] }
 0x4a5   :  { %v1114_v41 = vadd.f32 %v1050_v52, %v922_v3  ;;  %v1117_v35 = vadd.f32 %v1053_v44, %v925_v11  ;;  %v1119_v49 = vadd.f32 %v1055_v57, %v927_v22  ;;  %v999_v3 = vld [vmem:[%s7261_s27 + $0x98] sm:$0xff]  ;;  %v1061_v8 = vmul.f32 %v997_v17, %v7451_v23 }
 0x4a6   :  { %1177 = vst [vmem:[%s7173_s21 + $0x28] sm:$0xff] %v1113_v51  ;;  %v2717_v24 = vpack.c.bf16 %v1115_v13, %v1113_v51  ;;  %v1063_v52 = vmul.f32 %v999_v3, %v7451_v23  ;;  %v1062_v11 = vmul.f32 %v998_v19, %v7451_v23  ;;  %v1011_v19 = vld [vmem:[%s7261_s27 + $0xf8] sm:$0xff] }
 0x4a7   :  { %v2716_v28 = vpack.c.bf16 %v1114_v41, %v1112_v63  ;;  %v2719_v61 = vpack.c.bf16 %v1119_v49, %v1117_v35 }
 0x4a8   :  { %2748 = vmatprep.subr.bf16.mxu1 %v2717_v24  ;;  %v1001_v24 = vld [vmem:[%s7261_s27 + $0xa8] sm:$0xff] }
 0x4a9   :  { %2749 = vmatpush1.bf16.msra.mxu1 %v2716_v28 }
 0x4aa   :  { %2750 = vmatprep.subr.bf16.mxu1 %v2719_v61  ;;  %v1005_v61 = vld [vmem:[%s7261_s27 + $0xc8] sm:$0xff] }
 0x4ad   :  { %v860_v60 = vld [vmem:[%s7162_s10 + $0x40] sm:$0xff]  ;;  %v862_v48 = vld [vmem:[%s7162_s10 + $0x50] sm:$0xff] }
 0x4ae   :  { %1179 = vst [vmem:[%s7173_s21 + $0x38] sm:$0xff] %v1115_v13  ;;  %v924_v21 = vmul.f32 %v860_v60, %v7450_v10  ;;  %1176 = vst [vmem:[%s7173_s21 + $0x20] sm:$0xff] %v1112_v63  ;;  %v926_v31 = vmul.f32 %v862_v48, %v7450_v10 }
 0x4af   :  { %1178 = vst [vmem:[%s7173_s21 + $0x30] sm:$0xff] %v1114_v41  ;;  %v1060_v41 = vmul.f32 %v996_v27, %v7451_v23 }
 0x4b0   :  { %v1116_v20 = vadd.f32 %v1052_v9, %v924_v21  ;;  %v1118_v39 = vadd.f32 %v1054_v47, %v926_v31  ;;  %v1065_v47 = vmul.f32 %v1001_v24, %v7451_v23 }
 0x4b2   :  { %v2718_v18 = vpack.c.bf16 %v1118_v39, %v1116_v20 }
 0x4b4   :  { %2751 = vmatpush1.bf16.msra.mxu1 %v2718_v18 }
 0x4b6   :  { %v865_v42 = vld [vmem:[%s7162_s10 + $0x68] sm:$0xff]  ;;  %v867_v30 = vld [vmem:[%s7162_s10 + $0x78] sm:$0xff]  ;;  %v864_v50 = vld [vmem:[%s7162_s10 + $0x60] sm:$0xff] }
 0x4b7   :  { %v929_v59 = vmul.f32 %v865_v42, %v7450_v10  ;;  %v931_v55 = vmul.f32 %v867_v30, %v7450_v10  ;;  %v866_v38 = vld [vmem:[%s7162_s10 + $0x70] sm:$0xff]  ;;  %v928_v2 = vmul.f32 %v864_v50, %v7450_v10  ;;  %v1000_v42 = vld [vmem:[%s7261_s27 + $0xa0] sm:$0xff] }
 0x4b8   :  { %1181 = vst [vmem:[%s7173_s21 + $0x48] sm:$0xff] %v1117_v35  ;;  %1183 = vst [vmem:[%s7173_s21 + $0x58] sm:$0xff] %v1119_v49  ;;  %v930_v46 = vmul.f32 %v866_v38, %v7450_v10  ;;  %v1067_v35 = vmul.f32 %v1003_v15, %v7451_v23  ;;  %v1002_v30 = vld [vmem:[%s7261_s27 + $0xb0] sm:$0xff] }
 0x4b9   :  { %1180 = vst [vmem:[%s7173_s21 + $0x40] sm:$0xff] %v1116_v20  ;;  %1182 = vst [vmem:[%s7173_s21 + $0x50] sm:$0xff] %v1118_v39  ;;  %v1121_v34 = vadd.f32 %v1057_v14, %v929_v59  ;;  %v1123_v32 = vadd.f32 %v1059_v4, %v931_v55  ;;  %v1120_v40 = vadd.f32 %v1056_v33, %v928_v2 }
 0x4ba   :  { %v1122_v25 = vadd.f32 %v1058_v5, %v930_v46  ;;  %v1064_v39 = vmul.f32 %v1000_v42, %v7451_v23  ;;  %v1066_v59 = vmul.f32 %v1002_v30, %v7451_v23  ;;  %v1069_v5 = vmul.f32 %v1005_v61, %v7451_v23  ;;  %v1015_v30 = vld [vmem:[%s7261_s27 + $0x118] sm:$0xff] }
 0x4bb   :  { %v2721_v51 = vpack.c.bf16 %v1123_v32, %v1121_v34 }
 0x4bc   :  { %v2720_v7 = vpack.c.bf16 %v1122_v25, %v1120_v40 }
 0x4bd   :  { %2752 = vmatprep.subr.bf16.mxu1 %v2721_v51  ;;  %v1009_v51 = vld [vmem:[%s7261_s27 + $0xe8] sm:$0xff] }
 0x4be   :  { %2753 = vmatpush1.bf16.msra.mxu1 %v2720_v7 }
 0x4c0   :  { %v869_v53 = vld [vmem:[%s7162_s10 + $0x88] sm:$0xff]  ;;  %v871_v43 = vld [vmem:[%s7162_s10 + $0x98] sm:$0xff]  ;;  %v868_v45 = vld [vmem:[%s7162_s10 + $0x80] sm:$0xff] }
 0x4c1   :  { %v933_v58 = vmul.f32 %v869_v53, %v7450_v10  ;;  %v935_v54 = vmul.f32 %v871_v43, %v7450_v10  ;;  %v870_v12 = vld [vmem:[%s7162_s10 + $0x90] sm:$0xff]  ;;  %v932_v13 = vmul.f32 %v868_v45, %v7450_v10  ;;  %v1004_v53 = vld [vmem:[%s7261_s27 + $0xc0] sm:$0xff] }
 0x4c2   :  { %1185 = vst [vmem:[%s7173_s21 + $0x68] sm:$0xff] %v1121_v34  ;;  %1187 = vst [vmem:[%s7173_s21 + $0x78] sm:$0xff] %v1123_v32  ;;  %v934_v63 = vmul.f32 %v870_v12, %v7450_v10  ;;  %v1071_v34 = vmul.f32 %v1007_v26, %v7451_v23  ;;  %v1006_v43 = vld [vmem:[%s7261_s27 + $0xd0] sm:$0xff] }
 0x4c3   :  { %1184 = vst [vmem:[%s7173_s21 + $0x60] sm:$0xff] %v1120_v40  ;;  %1186 = vst [vmem:[%s7173_s21 + $0x70] sm:$0xff] %v1122_v25  ;;  %v1125_v22 = vadd.f32 %v1061_v8, %v933_v58  ;;  %v1127_v56 = vadd.f32 %v1063_v52, %v935_v54  ;;  %v1124_v44 = vadd.f32 %v1060_v41, %v932_v13 }
 0x4c4   :  { %v1126_v57 = vadd.f32 %v1062_v11, %v934_v63  ;;  %v1068_v25 = vmul.f32 %v1004_v53, %v7451_v23  ;;  %v1070_v58 = vmul.f32 %v1006_v43, %v7451_v23  ;;  %v1073_v11 = vmul.f32 %v1009_v51, %v7451_v23  ;;  %v1019_v43 = vld [vmem:[%s7261_s27 + $0x138] sm:$0xff] }
 0x4c5   :  { %v2723_v9 = vpack.c.bf16 %v1127_v56, %v1125_v22 }
 0x4c6   :  { %v2722_v6 = vpack.c.bf16 %v1126_v57, %v1124_v44 }
 0x4c7   :  { %2754 = vmatprep.subr.bf16.mxu1 %v2723_v9  ;;  %v1013_v9 = vld [vmem:[%s7261_s27 + $0x108] sm:$0xff] }
 0x4c8   :  { %2755 = vmatpush1.bf16.msra.mxu1 %v2722_v6 }
 0x4ca   :  { %v873_v60 = vld [vmem:[%s7162_s10 + $0xa8] sm:$0xff]  ;;  %v875_v48 = vld [vmem:[%s7162_s10 + $0xb8] sm:$0xff]  ;;  %v872_v28 = vld [vmem:[%s7162_s10 + $0xa0] sm:$0xff] }
 0x4cb   :  { %v937_v21 = vmul.f32 %v873_v60, %v7450_v10  ;;  %v939_v37 = vmul.f32 %v875_v48, %v7450_v10  ;;  %v874_v31 = vld [vmem:[%s7162_s10 + $0xb0] sm:$0xff]  ;;  %v936_v49 = vmul.f32 %v872_v28, %v7450_v10  ;;  %v1008_v60 = vld [vmem:[%s7261_s27 + $0xe0] sm:$0xff] }
 0x4cc   :  { %1189 = vst [vmem:[%s7173_s21 + $0x88] sm:$0xff] %v1125_v22  ;;  %1191 = vst [vmem:[%s7173_s21 + $0x98] sm:$0xff] %v1127_v56  ;;  %v938_v20 = vmul.f32 %v874_v31, %v7450_v10  ;;  %v1075_v22 = vmul.f32 %v1011_v19, %v7451_v23  ;;  %v1010_v48 = vld [vmem:[%s7261_s27 + $0xf0] sm:$0xff] }
 0x4cd   :  { %1188 = vst [vmem:[%s7173_s21 + $0x80] sm:$0xff] %v1124_v44  ;;  %1190 = vst [vmem:[%s7173_s21 + $0x90] sm:$0xff] %v1126_v57  ;;  %v1129_v55 = vadd.f32 %v1065_v47, %v937_v21  ;;  %v1131_v0 = vadd.f32 %v1067_v35, %v939_v37  ;;  %v1128_v14 = vadd.f32 %v1064_v39, %v936_v49 }
 0x4ce   :  { %v1130_v4 = vadd.f32 %v1066_v59, %v938_v20  ;;  %v1072_v57 = vmul.f32 %v1008_v60, %v7451_v23  ;;  %v1074_v21 = vmul.f32 %v1010_v48, %v7451_v23  ;;  %v1077_v59 = vmul.f32 %v1013_v9, %v7451_v23  ;;  %v1023_v48 = vld [vmem:[%s7261_s27 + $0x158] sm:$0xff] }
 0x4cf   :  { %v2725_v33 = vpack.c.bf16 %v1131_v0, %v1129_v55 }
 0x4d0   :  { %v2724_v17 = vpack.c.bf16 %v1130_v4, %v1128_v14 }
 0x4d1   :  { %2756 = vmatprep.subr.bf16.mxu1 %v2725_v33  ;;  %v1017_v33 = vld [vmem:[%s7261_s27 + $0x128] sm:$0xff] }
 0x4d2   :  { %2757 = vmatpush1.bf16.msra.mxu1 %v2724_v17 }
 0x4d4   :  { %v877_v50 = vld [vmem:[%s7162_s10 + $0xc8] sm:$0xff]  ;;  %v879_v38 = vld [vmem:[%s7162_s10 + $0xd8] sm:$0xff]  ;;  %v876_v18 = vld [vmem:[%s7162_s10 + $0xc0] sm:$0xff] }
 0x4d5   :  { %v941_v2 = vmul.f32 %v877_v50, %v7450_v10  ;;  %v943_v16 = vmul.f32 %v879_v38, %v7450_v10  ;;  %v878_v46 = vld [vmem:[%s7162_s10 + $0xd0] sm:$0xff]  ;;  %v940_v32 = vmul.f32 %v876_v18, %v7450_v10  ;;  %v1012_v50 = vld [vmem:[%s7261_s27 + $0x100] sm:$0xff] }
 0x4d6   :  { %1193 = vst [vmem:[%s7173_s21 + $0xa8] sm:$0xff] %v1129_v55  ;;  %1195 = vst [vmem:[%s7173_s21 + $0xb8] sm:$0xff] %v1131_v0  ;;  %v942_v40 = vmul.f32 %v878_v46, %v7450_v10  ;;  %v1079_v55 = vmul.f32 %v1015_v30, %v7451_v23  ;;  %v1014_v38 = vld [vmem:[%s7261_s27 + $0x110] sm:$0xff] }
 0x4d7   :  { %1192 = vst [vmem:[%s7173_s21 + $0xa0] sm:$0xff] %v1128_v14  ;;  %1194 = vst [vmem:[%s7173_s21 + $0xb0] sm:$0xff] %v1130_v4  ;;  %v1133_v54 = vadd.f32 %v1069_v5, %v941_v2  ;;  %v1135_v3 = vadd.f32 %v1071_v34, %v943_v16  ;;  %v1132_v8 = vadd.f32 %v1068_v25, %v940_v32 }
 0x4d8   :  { %v1134_v52 = vadd.f32 %v1070_v58, %v942_v40  ;;  %v1076_v4 = vmul.f32 %v1012_v50, %v7451_v23  ;;  %v1078_v2 = vmul.f32 %v1014_v38, %v7451_v23  ;;  %v1081_v58 = vmul.f32 %v1017_v33, %v7451_v23  ;;  %v1027_v38 = vld [vmem:[%s7261_s27 + $0x178] sm:$0xff] }
 0x4d9   :  { %v2727_v41 = vpack.c.bf16 %v1135_v3, %v1133_v54 }
 0x4da   :  { %v2726_v24 = vpack.c.bf16 %v1134_v52, %v1132_v8 }
 0x4db   :  { %2758 = vmatprep.subr.bf16.mxu1 %v2727_v41  ;;  %v1021_v41 = vld [vmem:[%s7261_s27 + $0x148] sm:$0xff] }
 0x4dc   :  { %2759 = vmatpush1.bf16.msra.mxu1 %v2726_v24 }
 0x4de   :  { %v881_v45 = vld [vmem:[%s7162_s10 + $0xe8] sm:$0xff]  ;;  %v883_v12 = vld [vmem:[%s7162_s10 + $0xf8] sm:$0xff]  ;;  %v880_v7 = vld [vmem:[%s7162_s10 + $0xe0] sm:$0xff] }
 0x4df   :  { %v945_v13 = vmul.f32 %v881_v45, %v7450_v10  ;;  %v947_v27 = vmul.f32 %v883_v12, %v7450_v10  ;;  %v882_v63 = vld [vmem:[%s7162_s10 + $0xf0] sm:$0xff]  ;;  %v944_v56 = vmul.f32 %v880_v7, %v7450_v10  ;;  %v1016_v45 = vld [vmem:[%s7261_s27 + $0x120] sm:$0xff] }
 0x4e0   :  { %1197 = vst [vmem:[%s7173_s21 + $0xc8] sm:$0xff] %v1133_v54  ;;  %1199 = vst [vmem:[%s7173_s21 + $0xd8] sm:$0xff] %v1135_v3  ;;  %v946_v44 = vmul.f32 %v882_v63, %v7450_v10  ;;  %v1083_v54 = vmul.f32 %v1019_v43, %v7451_v23  ;;  %v1018_v12 = vld [vmem:[%s7261_s27 + $0x130] sm:$0xff] }
 0x4e1   :  { %1196 = vst [vmem:[%s7173_s21 + $0xc0] sm:$0xff] %v1132_v8  ;;  %1198 = vst [vmem:[%s7173_s21 + $0xd0] sm:$0xff] %v1134_v52  ;;  %v1137_v37 = vadd.f32 %v1073_v11, %v945_v13  ;;  %v1139_v15 = vadd.f32 %v1075_v22, %v947_v27  ;;  %v1136_v47 = vadd.f32 %v1072_v57, %v944_v56 }
 0x4e2   :  { %v1138_v35 = vadd.f32 %v1074_v21, %v946_v44  ;;  %v1080_v52 = vmul.f32 %v1016_v45, %v7451_v23  ;;  %v1082_v13 = vmul.f32 %v1018_v12, %v7451_v23  ;;  %v1085_v21 = vmul.f32 %v1021_v41, %v7451_v23  ;;  %v1031_v12 = vld [vmem:[%s7261_s27 + $0x198] sm:$0xff] }
 0x4e3   :  { %v2729_v39 = vpack.c.bf16 %v1139_v15, %v1137_v37 }
 0x4e4   :  { %v2728_v61 = vpack.c.bf16 %v1138_v35, %v1136_v47 }
 0x4e5   :  { %2760 = vmatprep.subr.bf16.mxu1 %v2729_v39  ;;  %v1025_v39 = vld [vmem:[%s7261_s27 + $0x168] sm:$0xff] }
 0x4e6   :  { %2761 = vmatpush1.bf16.msra.mxu1 %v2728_v61 }
 0x4e8   :  { %v885_v28 = vld [vmem:[%s7162_s10 + $0x108] sm:$0xff]  ;;  %v887_v31 = vld [vmem:[%s7162_s10 + $0x118] sm:$0xff]  ;;  %v884_v6 = vld [vmem:[%s7162_s10 + $0x100] sm:$0xff] }
 0x4e9   :  { %v949_v49 = vmul.f32 %v885_v28, %v7450_v10  ;;  %v951_v42 = vmul.f32 %v887_v31, %v7450_v10  ;;  %v886_v20 = vld [vmem:[%s7162_s10 + $0x110] sm:$0xff]  ;;  %v948_v0 = vmul.f32 %v884_v6, %v7450_v10  ;;  %v1020_v28 = vld [vmem:[%s7261_s27 + $0x140] sm:$0xff] }
 0x4ea   :  { %1201 = vst [vmem:[%s7173_s21 + $0xe8] sm:$0xff] %v1137_v37  ;;  %1203 = vst [vmem:[%s7173_s21 + $0xf8] sm:$0xff] %v1139_v15  ;;  %v950_v14 = vmul.f32 %v886_v20, %v7450_v10  ;;  %v1087_v37 = vmul.f32 %v1023_v48, %v7451_v23  ;;  %v1022_v31 = vld [vmem:[%s7261_s27 + $0x150] sm:$0xff] }
 0x4eb   :  { %1200 = vst [vmem:[%s7173_s21 + $0xe0] sm:$0xff] %v1136_v47  ;;  %1202 = vst [vmem:[%s7173_s21 + $0xf0] sm:$0xff] %v1138_v35  ;;  %v1141_v16 = vadd.f32 %v1077_v59, %v949_v49  ;;  %v1143_v26 = vadd.f32 %v1079_v55, %v951_v42  ;;  %v1140_v5 = vadd.f32 %v1076_v4, %v948_v0 }
 0x4ec   :  { %v1142_v34 = vadd.f32 %v1078_v2, %v950_v14  ;;  %v1084_v35 = vmul.f32 %v1020_v28, %v7451_v23  ;;  %v1086_v49 = vmul.f32 %v1022_v31, %v7451_v23  ;;  %v1089_v2 = vmul.f32 %v1025_v39, %v7451_v23  ;;  %v1035_v31 = vld [vmem:[%s7261_s27 + $0x1b8] sm:$0xff] }
 0x4ed   :  { %v2731_v25 = vpack.c.bf16 %v1143_v26, %v1141_v16 }
 0x4ee   :  { %v2730_v51 = vpack.c.bf16 %v1142_v34, %v1140_v5 }
 0x4ef   :  { %2762 = vmatprep.subr.bf16.mxu1 %v2731_v25  ;;  %v1029_v25 = vld [vmem:[%s7261_s27 + $0x188] sm:$0xff] }
 0x4f0   :  { %2763 = vmatpush1.bf16.msra.mxu1 %v2730_v51 }
 0x4f2   :  { %v889_v18 = vld [vmem:[%s7162_s10 + $0x128] sm:$0xff]  ;;  %v891_v46 = vld [vmem:[%s7162_s10 + $0x138] sm:$0xff]  ;;  %v888_v17 = vld [vmem:[%s7162_s10 + $0x120] sm:$0xff] }
 0x4f3   :  { %v953_v32 = vmul.f32 %v889_v18, %v7450_v10  ;;  %v955_v53 = vmul.f32 %v891_v46, %v7450_v10  ;;  %v890_v40 = vld [vmem:[%s7162_s10 + $0x130] sm:$0xff]  ;;  %v952_v3 = vmul.f32 %v888_v17, %v7450_v10  ;;  %v1024_v18 = vld [vmem:[%s7261_s27 + $0x160] sm:$0xff] }
 0x4f4   :  { %1205 = vst [vmem:[%s7173_s21 + $0x108] sm:$0xff] %v1141_v16  ;;  %1207 = vst [vmem:[%s7173_s21 + $0x118] sm:$0xff] %v1143_v26  ;;  %v954_v8 = vmul.f32 %v890_v40, %v7450_v10  ;;  %v1091_v16 = vmul.f32 %v1027_v38, %v7451_v23  ;;  %v1026_v46 = vld [vmem:[%s7261_s27 + $0x170] sm:$0xff] }
 0x4f5   :  { %1204 = vst [vmem:[%s7173_s21 + $0x100] sm:$0xff] %v1140_v5  ;;  %1206 = vst [vmem:[%s7173_s21 + $0x110] sm:$0xff] %v1142_v34  ;;  %v1145_v27 = vadd.f32 %v1081_v58, %v953_v32  ;;  %v1147_v19 = vadd.f32 %v1083_v54, %v955_v53  ;;  %v1144_v11 = vadd.f32 %v1080_v52, %v952_v3 }
 0x4f6   :  { %v1146_v22 = vadd.f32 %v1082_v13, %v954_v8  ;;  %v1088_v34 = vmul.f32 %v1024_v18, %v7451_v23  ;;  %v1090_v32 = vmul.f32 %v1026_v46, %v7451_v23  ;;  %v1093_v13 = vmul.f32 %v1029_v25, %v7451_v23  ;;  %v1039_v18 = vld [vmem:[%s7261_s27 + $0x1d8] sm:$0xff] }
 0x4f7   :  { %v2733_v57 = vpack.c.bf16 %v1147_v19, %v1145_v27 }
 0x4f8   :  { %v2732_v9 = vpack.c.bf16 %v1146_v22, %v1144_v11 }
 0x4f9   :  { %2764 = vmatprep.subr.bf16.mxu1 %v2733_v57  ;;  %v1033_v57 = vld [vmem:[%s7261_s27 + $0x1a8] sm:$0xff] }
 0x4fa   :  { %2765 = vmatpush1.bf16.msra.mxu1 %v2732_v9 }
 0x4fc   :  { %v893_v7 = vld [vmem:[%s7162_s10 + $0x148] sm:$0xff]  ;;  %v895_v63 = vld [vmem:[%s7162_s10 + $0x158] sm:$0xff]  ;;  %v892_v24 = vld [vmem:[%s7162_s10 + $0x140] sm:$0xff] }
 0x4fd   :  { %v957_v56 = vmul.f32 %v893_v7, %v7450_v10  ;;  %v959_v60 = vmul.f32 %v895_v63, %v7450_v10  ;;  %v894_v44 = vld [vmem:[%s7162_s10 + $0x150] sm:$0xff]  ;;  %v956_v15 = vmul.f32 %v892_v24, %v7450_v10  ;;  %v1028_v7 = vld [vmem:[%s7261_s27 + $0x180] sm:$0xff] }
 0x4fe   :  { %1209 = vst [vmem:[%s7173_s21 + $0x128] sm:$0xff] %v1145_v27  ;;  %1211 = vst [vmem:[%s7173_s21 + $0x138] sm:$0xff] %v1147_v19  ;;  %v958_v47 = vmul.f32 %v894_v44, %v7450_v10  ;;  %v1095_v27 = vmul.f32 %v1031_v12, %v7451_v23  ;;  %v1030_v63 = vld [vmem:[%s7261_s27 + $0x190] sm:$0xff] }
 0x4ff   :  { %1208 = vst [vmem:[%s7173_s21 + $0x120] sm:$0xff] %v1144_v11  ;;  %1210 = vst [vmem:[%s7173_s21 + $0x130] sm:$0xff] %v1146_v22  ;;  %v1149_v42 = vadd.f32 %v1085_v21, %v957_v56  ;;  %v1151_v30 = vadd.f32 %v1087_v37, %v959_v60  ;;  %v1148_v59 = vadd.f32 %v1084_v35, %v956_v15 }
 0x500   :  { %v1150_v55 = vadd.f32 %v1086_v49, %v958_v47  ;;  %v1092_v22 = vmul.f32 %v1028_v7, %v7451_v23  ;;  %v1094_v56 = vmul.f32 %v1030_v63, %v7451_v23  ;;  %v1097_v49 = vmul.f32 %v1033_v57, %v7451_v23 }
 0x501   :  { %v2735_v4 = vpack.c.bf16 %v1151_v30, %v1149_v42 }
 0x502   :  { %v2734_v33 = vpack.c.bf16 %v1150_v55, %v1148_v59 }
 0x503   :  { %2766 = vmatprep.subr.bf16.mxu1 %v2735_v4  ;;  %v1037_v4 = vld [vmem:[%s7261_s27 + $0x1c8] sm:$0xff] }
 0x504   :  { %2767 = vmatpush1.bf16.msra.mxu1 %v2734_v33 }
 0x506   :  { %v897_v6 = vld [vmem:[%s7162_s10 + $0x168] sm:$0xff]  ;;  %v899_v20 = vld [vmem:[%s7162_s10 + $0x178] sm:$0xff]  ;;  %v896_v61 = vld [vmem:[%s7162_s10 + $0x160] sm:$0xff] }
 0x507   :  { %v961_v0 = vmul.f32 %v897_v6, %v7450_v10  ;;  %v963_v50 = vmul.f32 %v899_v20, %v7450_v10  ;;  %v898_v14 = vld [vmem:[%s7162_s10 + $0x170] sm:$0xff]  ;;  %v960_v26 = vmul.f32 %v896_v61, %v7450_v10  ;;  %v1032_v6 = vld [vmem:[%s7261_s27 + $0x1a0] sm:$0xff] }
 0x508   :  { %1213 = vst [vmem:[%s7173_s21 + $0x148] sm:$0xff] %v1149_v42  ;;  %1215 = vst [vmem:[%s7173_s21 + $0x158] sm:$0xff] %v1151_v30  ;;  %v962_v5 = vmul.f32 %v898_v14, %v7450_v10  ;;  %v1099_v42 = vmul.f32 %v1035_v31, %v7451_v23  ;;  %v1034_v20 = vld [vmem:[%s7261_s27 + $0x1b0] sm:$0xff] }
 0x509   :  { %1212 = vst [vmem:[%s7173_s21 + $0x140] sm:$0xff] %v1148_v59  ;;  %1214 = vst [vmem:[%s7173_s21 + $0x150] sm:$0xff] %v1150_v55  ;;  %v1153_v53 = vadd.f32 %v1089_v2, %v961_v0  ;;  %v1155_v43 = vadd.f32 %v1091_v16, %v963_v50  ;;  %v1152_v58 = vadd.f32 %v1088_v34, %v960_v26 }
 0x50a   :  { %v1154_v54 = vadd.f32 %v1090_v32, %v962_v5  ;;  %v1096_v55 = vmul.f32 %v1032_v6, %v7451_v23  ;;  %v1098_v0 = vmul.f32 %v1034_v20, %v7451_v23  ;;  %v1101_v32 = vmul.f32 %v1037_v4, %v7451_v23 }
 0x50b   :  { %v2737_v52 = vpack.c.bf16 %v1155_v43, %v1153_v53 }
 0x50c   :  { %v2736_v41 = vpack.c.bf16 %v1154_v54, %v1152_v58 }
 0x50d   :  { %2768 = vmatprep.subr.bf16.mxu1 %v2737_v52 }
 0x50e   :  { %2769 = vmatpush1.bf16.msra.mxu1 %v2736_v41 }
 0x510   :  { %v901_v17 = vld [vmem:[%s7162_s10 + $0x188] sm:$0xff]  ;;  %v903_v40 = vld [vmem:[%s7162_s10 + $0x198] sm:$0xff]  ;;  %v900_v51 = vld [vmem:[%s7162_s10 + $0x180] sm:$0xff] }
 0x511   :  { %v965_v3 = vmul.f32 %v901_v17, %v7450_v10  ;;  %v967_v45 = vmul.f32 %v903_v40, %v7450_v10  ;;  %v902_v8 = vld [vmem:[%s7162_s10 + $0x190] sm:$0xff]  ;;  %v964_v19 = vmul.f32 %v900_v51, %v7450_v10  ;;  %v1103_v40 = vmul.f32 %v1039_v18, %v7451_v23 }
 0x512   :  { %1217 = vst [vmem:[%s7173_s21 + $0x168] sm:$0xff] %v1153_v53  ;;  %1219 = vst [vmem:[%s7173_s21 + $0x178] sm:$0xff] %v1155_v43  ;;  %v966_v11 = vmul.f32 %v902_v8, %v7450_v10  ;;  %v1036_v53 = vld [vmem:[%s7261_s27 + $0x1c0] sm:$0xff]  ;;  %v1038_v43 = vld [vmem:[%s7261_s27 + $0x1d0] sm:$0xff] }
 0x513   :  { %1216 = vst [vmem:[%s7173_s21 + $0x160] sm:$0xff] %v1152_v58  ;;  %1218 = vst [vmem:[%s7173_s21 + $0x170] sm:$0xff] %v1154_v54  ;;  %v1157_v60 = vadd.f32 %v1093_v13, %v965_v3  ;;  %v1159_v48 = vadd.f32 %v1095_v27, %v967_v45  ;;  %v1156_v21 = vadd.f32 %v1092_v22, %v964_v19  ;;  %v1041_v8 = vld [vmem:[%s7261_s27 + $0x1e8] sm:$0xff]  ;;  %v1043_v19 = vld [vmem:[%s7261_s27 + $0x1f8] sm:$0xff] }
 0x514   :  { %v1158_v37 = vadd.f32 %v1094_v56, %v966_v11  ;;  %v1100_v3 = vmul.f32 %v1036_v53, %v7451_v23  ;;  %v1102_v45 = vmul.f32 %v1038_v43, %v7451_v23  ;;  %v1105_v7 = vmul.f32 %v1041_v8, %v7451_v23 }
 0x515   :  { %v2739_v35 = vpack.c.bf16 %v1159_v48, %v1157_v60  ;;  %v1107_v56 = vmul.f32 %v1043_v19, %v7451_v23 }
 0x516   :  { %v2738_v39 = vpack.c.bf16 %v1158_v37, %v1156_v21 }
 0x517   :  { %2770 = vmatprep.subr.bf16.mxu1 %v2739_v35 }
 0x518   :  { %2771 = vmatpush1.bf16.msra.mxu1 %v2738_v39 }
 0x51a   :  { %v905_v24 = vld [vmem:[%s7162_s10 + $0x1a8] sm:$0xff]  ;;  %v907_v44 = vld [vmem:[%s7162_s10 + $0x1b8] sm:$0xff]  ;;  %v904_v9 = vld [vmem:[%s7162_s10 + $0x1a0] sm:$0xff] }
 0x51b   :  { %v969_v15 = vmul.f32 %v905_v24, %v7450_v10  ;;  %v971_v28 = vmul.f32 %v907_v44, %v7450_v10  ;;  %v906_v47 = vld [vmem:[%s7162_s10 + $0x1b0] sm:$0xff]  ;;  %v968_v30 = vmul.f32 %v904_v9, %v7450_v10 }
 0x51c   :  { %1221 = vst [vmem:[%s7173_s21 + $0x188] sm:$0xff] %v1157_v60  ;;  %1223 = vst [vmem:[%s7173_s21 + $0x198] sm:$0xff] %v1159_v48  ;;  %v970_v59 = vmul.f32 %v906_v47, %v7450_v10  ;;  %v1040_v48 = vld [vmem:[%s7261_s27 + $0x1e0] sm:$0xff]  ;;  %v1042_v24 = vld [vmem:[%s7261_s27 + $0x1f0] sm:$0xff] }
 0x51d   :  { %1220 = vst [vmem:[%s7173_s21 + $0x180] sm:$0xff] %v1156_v21  ;;  %1222 = vst [vmem:[%s7173_s21 + $0x190] sm:$0xff] %v1158_v37  ;;  %v1161_v50 = vadd.f32 %v1097_v49, %v969_v15  ;;  %v1163_v38 = vadd.f32 %v1099_v42, %v971_v28  ;;  %v1160_v2 = vadd.f32 %v1096_v55, %v968_v30 }
 0x51e   :  { %v1162_v16 = vadd.f32 %v1098_v0, %v970_v59  ;;  %v1104_v37 = vmul.f32 %v1040_v48, %v7451_v23  ;;  %v1106_v31 = vmul.f32 %v1042_v24, %v7451_v23 }
 0x51f   :  { %v2741_v5 = vpack.c.bf16 %v1163_v38, %v1161_v50 }
 0x520   :  { %v2740_v17 = vpack.c.bf16 %v1162_v16, %v1160_v2 }
 0x521   :  { %2772 = vmatprep.subr.bf16.mxu1 %v2741_v5 }
 0x522   :  { %2773 = vmatpush1.bf16.msra.mxu1 %v2740_v17 }
 0x524   :  { %v909_v61 = vld [vmem:[%s7162_s10 + $0x1c8] sm:$0xff]  ;;  %v911_v14 = vld [vmem:[%s7162_s10 + $0x1d8] sm:$0xff]  ;;  %v908_v46 = vld [vmem:[%s7162_s10 + $0x1c0] sm:$0xff] }
 0x525   :  { %v973_v26 = vmul.f32 %v909_v61, %v7450_v10  ;;  %v910_v33 = vld [vmem:[%s7162_s10 + $0x1d0] sm:$0xff]  ;;  %v975_v34 = vmul.f32 %v911_v14, %v7450_v10  ;;  %v972_v25 = vmul.f32 %v908_v46, %v7450_v10 }
 0x526   :  { %1225 = vst [vmem:[%s7173_s21 + $0x1a8] sm:$0xff] %v1161_v50  ;;  %1227 = vst [vmem:[%s7173_s21 + $0x1b8] sm:$0xff] %v1163_v38  ;;  %v974_v54 = vmul.f32 %v910_v33, %v7450_v10 }
 0x527   :  { %1224 = vst [vmem:[%s7173_s21 + $0x1a0] sm:$0xff] %v1160_v2  ;;  %1226 = vst [vmem:[%s7173_s21 + $0x1b0] sm:$0xff] %v1162_v16  ;;  %v1165_v58 = vadd.f32 %v1101_v32, %v973_v26  ;;  %v1167_v52 = vadd.f32 %v1103_v40, %v975_v34  ;;  %v1164_v11 = vadd.f32 %v1100_v3, %v972_v25 }
 0x528   :  { %v1166_v22 = vadd.f32 %v1102_v45, %v974_v54  ;;  %v7088_v35 = vpop.f32.mrb[8].mxu0 }
 0x529   :  { %v2743_v44 = vpack.c.bf16 %v1167_v52, %v1165_v58  ;;  %v2865_v49 = vmul.f32 %v7088_v35, %v7088_v35  ;;  %v7092_v42 = vpop.f32.mrb[9].mxu0 }
 0x52a   :  { %v2742_v15 = vpack.c.bf16 %v1166_v22, %v1164_v11  ;;  %v2866_v30 = vmul.f32 %v7092_v42, %v7092_v42  ;;  %v7096_v6 = vpop.f32.mrb[10].mxu0 }
 0x52b   :  { %2774 = vmatprep.subr.bf16.mxu1 %v2743_v44  ;;  %v2958_v20 = vmul.f32 %v7096_v6, %v7096_v6  ;;  %v7100_v39 = vpop.f32.mrb[11].mxu0 }
 0x52c   :  { %2775 = vmatpush1.bf16.msra.mxu1 %v2742_v15  ;;  %v2959_v59 = vmul.f32 %v7100_v39, %v7100_v39  ;;  %v2867_v55 = vadd.f32 %v2866_v30, %v2865_v49 }
 0x52e   :  { %v913_v12 = vld [vmem:[%s7162_s10 + $0x1e8] sm:$0xff]  ;;  %v915_v51 = vld [vmem:[%s7162_s10 + $0x1f8] sm:$0xff]  ;;  %v912_v63 = vld [vmem:[%s7162_s10 + $0x1e0] sm:$0xff]  ;;  %2868 = vadd.xlane.f32.xlu1 %v2867_v55  ;;  %v2960_v0 = vadd.f32 %v2959_v59, %v2958_v20 }
 0x52f   :  { %v977_v13 = vmul.f32 %v913_v12, %v7450_v10  ;;  %v979_v27 = vmul.f32 %v915_v51, %v7450_v10  ;;  %v914_v41 = vld [vmem:[%s7162_s10 + $0x1f0] sm:$0xff]  ;;  %v976_v60 = vmul.f32 %v912_v63, %v7450_v10 }
 0x530   :  { %1229 = vst [vmem:[%s7173_s21 + $0x1c8] sm:$0xff] %v1165_v58  ;;  %1231 = vst [vmem:[%s7173_s21 + $0x1d8] sm:$0xff] %v1167_v52  ;;  %v978_v21 = vmul.f32 %v914_v41, %v7450_v10 }
 0x531   :  { %v1169_v57 = vadd.f32 %v1105_v7, %v977_v13  ;;  %1228 = vst [vmem:[%s7173_s21 + $0x1c0] sm:$0xff] %v1164_v11  ;;  %1230 = vst [vmem:[%s7173_s21 + $0x1d0] sm:$0xff] %v1166_v22  ;;  %v1171_v28 = vadd.f32 %v1107_v56, %v979_v27  ;;  %v1168_v10 = vadd.f32 %v1104_v37, %v976_v60 }
 0x532   :  { %v1170_v47 = vadd.f32 %v1106_v31, %v978_v21  ;;  %2961 = vadd.xlane.f32.xlu1 %v2960_v0 }
 0x533   :  { %1233 = vst [vmem:[%s7173_s21 + $0x1e8] sm:$0xff] %v1169_v57  ;;  %1235 = vst [vmem:[%s7173_s21 + $0x1f8] sm:$0xff] %v1171_v28  ;;  %v2745_v9 = vpack.c.bf16 %v1171_v28, %v1169_v57 }
 0x534   :  { %1232 = vst [vmem:[%s7173_s21 + $0x1e0] sm:$0xff] %v1168_v10  ;;  %1234 = vst [vmem:[%s7173_s21 + $0x1f0] sm:$0xff] %v1170_v47  ;;  %v2744_v23 = vpack.c.bf16 %v1170_v47, %v1168_v10 }
 0x535   :  { %2776 = vmatprep.subr.bf16.mxu1 %v2745_v9 }
 0x536   :  { %2777 = vmatpush1.bf16.msra.mxu1 %v2744_v23 }
 0x568   :  { %v2593_v50 = vpop.f32.mrb[12].mxu0 }
 0x569   :  { %v2602_v38 = vrot.slane %v2593_v50, 4  ;;  %v2595_v61 = vpop.f32.mrb[13].mxu0 }
 0x56a   :  { %v2608_v14 = vrot.slane %v2595_v61, 4  ;;  %v2597_v4 = vpop.f32.mrb[14].mxu0 }
 0x56b   :  { %v2603_v2 = vadd.f32 %v2602_v38, %v2593_v50  ;;  %v2614_v16 = vrot.slane %v2597_v4, 4  ;;  %v2599_v26 = vpop.f32.mrb[15].mxu0 }
 0x56c   :  { %v2609_v18 = vadd.f32 %v2608_v14, %v2595_v61  ;;  %v2620_v46 = vrot.slane %v2599_v26, 4 }
 0x56d   :  { %v2604_v33 = vrot.slane %v2603_v2, 2  ;;  %v2615_v5 = vadd.f32 %v2614_v16, %v2597_v4 }
 0x56e   :  { %v2610_v34 = vrot.slane %v2609_v18, 2  ;;  %v2621_v32 = vadd.f32 %v2620_v46, %v2599_v26 }
 0x56f   :  { %v2605_v53 = vadd.f32 %v2604_v33, %v2603_v2  ;;  %v2616_v43 = vrot.slane %v2615_v5, 2 }
 0x570   :  { %v2611_v17 = vadd.f32 %v2610_v34, %v2609_v18  ;;  %v2622_v40 = vrot.slane %v2621_v32, 2 }
 0x571   :  { %v2606_v25 = vrot.slane %v2605_v53, 1  ;;  %v2617_v58 = vadd.f32 %v2616_v43, %v2615_v5 }
 0x572   :  { %v2612_v54 = vrot.slane %v2611_v17, 1  ;;  %v2623_v3 = vadd.f32 %v2622_v40, %v2621_v32 }
 0x573   :  { %v2607_v45 = vadd.f32 %v2606_v25, %v2605_v53  ;;  %v2618_v12 = vrot.slane %v2617_v58, 1  ;;  %v2686_v25 = vrot.slane %v6410_v36, %v7389_v1 }
 0x574   :  { %v2613_v51 = vadd.f32 %v2612_v54, %v2611_v17  ;;  %v2624_v8 = vrot.slane %v2623_v3, 1  ;;  %v2682_v17 = vrot.slane %v6410_v36, %v7388_v62 }
 0x575   :  { %v2626_v52 = vmul.f32 0.125, %v2607_v45  ;;  %v2619_v13 = vadd.f32 %v2618_v12, %v2617_v58 }
 0x576   :  { %v2627_v27 = vmul.f32 0.125, %v2613_v51  ;;  %v2625_v19 = vadd.f32 %v2624_v8, %v2623_v3  ;;  %v2697_v3 = vrot.slane %v6412_v29, %v7388_v62  ;;  %v2701_v51 = vrot.slane %v6412_v29, %v7389_v1 }
 0x577   :  { %v2630_v7 = vsub.f32 %v2593_v50, %v2626_v52  ;;  %v2628_v63 = vmul.f32 0.125, %v2619_v13 }
 0x578   :  { %v2631_v41 = vsub.f32 %v2595_v61, %v2627_v27  ;;  %v2629_v11 = vmul.f32 0.125, %v2625_v19 }
 0x579   :  { %v2634_v22 = vmul.f32 %v2630_v7, %v2630_v7  ;;  %v2632_v56 = vsub.f32 %v2597_v4, %v2628_v63 }
 0x57a   :  { %v2635_v60 = vmul.f32 %v2631_v41, %v2631_v41  ;;  %v2633_v48 = vsub.f32 %v2599_v26, %v2629_v11 }
 0x57b   :  { %v2638_v24 = vrot.slane %v2634_v22, 4  ;;  %v2636_v44 = vmul.f32 %v2632_v56, %v2632_v56 }
 0x57c   :  { %v2644_v57 = vrot.slane %v2635_v60, 4  ;;  %v2637_v21 = vmul.f32 %v2633_v48, %v2633_v48 }
 0x57d   :  { %v2639_v37 = vadd.f32 %v2638_v24, %v2634_v22  ;;  %v2650_v15 = vrot.slane %v2636_v44, 4 }
 0x57e   :  { %v2645_v28 = vadd.f32 %v2644_v57, %v2635_v60  ;;  %v2656_v31 = vrot.slane %v2637_v21, 4 }
 0x57f   :  { %v2640_v10 = vrot.slane %v2639_v37, 2  ;;  %v2651_v9 = vadd.f32 %v2650_v15, %v2636_v44 }
 0x580   :  { %v2646_v47 = vrot.slane %v2645_v28, 2  ;;  %v2657_v23 = vadd.f32 %v2656_v31, %v2637_v21 }
 0x581   :  { %v2641_v49 = vadd.f32 %v2640_v10, %v2639_v37  ;;  %v2652_v30 = vrot.slane %v2651_v9, 2 }
 0x582   :  { %v2647_v20 = vadd.f32 %v2646_v47, %v2645_v28  ;;  %v2658_v59 = vrot.slane %v2657_v23, 2 }
 0x583   :  { %v2642_v55 = vrot.slane %v2641_v49, 1  ;;  %v2653_v0 = vadd.f32 %v2652_v30, %v2651_v9 }
 0x584   :  { %v2648_v50 = vrot.slane %v2647_v20, 1  ;;  %v2659_v38 = vadd.f32 %v2658_v59, %v2657_v23 }
 0x585   :  { %v2643_v61 = vadd.f32 %v2642_v55, %v2641_v49  ;;  %v2654_v14 = vrot.slane %v2653_v0, 1 }
 0x586   :  { %v2649_v4 = vadd.f32 %v2648_v50, %v2647_v20  ;;  %v2660_v2 = vrot.slane %v2659_v38, 1 }
 0x587   :  { %v2662_v16 = vmul.f32 0.125, %v2643_v61  ;;  %v2655_v26 = vadd.f32 %v2654_v14, %v2653_v0 }
 0x588   :  { %v2663_v18 = vmul.f32 0.125, %v2649_v4  ;;  %v2661_v46 = vadd.f32 %v2660_v2, %v2659_v38 }
 0x589   :  { %v2666_v33 = vadd.f32 1e-05, %v2662_v16  ;;  %v2664_v5 = vmul.f32 0.125, %v2655_v26 }
 0x58a   :  { %v2667_v34 = vadd.f32 1e-05, %v2663_v18  ;;  %v2665_v32 = vmul.f32 0.125, %v2661_v46 }
 0x58b   :  { %3281 = vrsqrt.f32 %v2666_v33  ;;  %v2668_v53 = vadd.f32 1e-05, %v2664_v5 }
 0x58c   :  { %3283 = vrsqrt.f32 %v2667_v34  ;;  %v2669_v43 = vadd.f32 1e-05, %v2665_v32 }
 0x58d   :  { %3285 = vrsqrt.f32 %v2668_v53 }
 0x58e   :  { %3287 = vrsqrt.f32 %v2669_v43 }
 0x595   :  { %v3282_v40 = vpop.eup %3281 }
 0x596   :  { %v3284_v58 = vpop.eup %3283  ;;  %v2674_v54 = vmul.f32 %v3282_v40, %v2630_v7 }
 0x597   :  { %v3286_v45 = vpop.eup %3285  ;;  %v2675_v12 = vmul.f32 %v3284_v58, %v2631_v41 }
 0x598   :  { %v3288_v8 = vpop.eup %3287  ;;  %v2689_v52 = vmul.f32 %v2682_v17, %v2674_v54  ;;  %v2676_v13 = vmul.f32 %v3286_v45, %v2632_v56 }
 0x599   :  { %v2690_v27 = vmul.f32 %v2686_v25, %v2675_v12  ;;  %v2677_v19 = vmul.f32 %v3288_v8, %v2633_v48 }
 0x59a   :  { %v2704_v63 = vadd.f32 %v2697_v3, %v2689_v52  ;;  %v2691_v11 = vmul.f32 %v2682_v17, %v2676_v13 }
 0x59b   :  { %v2692_v22 = vmul.f32 %v2686_v25, %v2677_v19  ;;  %v2705_v60 = vadd.f32 %v2701_v51, %v2690_v27 }
 0x59c   :  { %v2706_v36 = vadd.f32 %v2697_v3, %v2691_v11  ;;  %v2708_v7 = vmax.f32 %v2704_v63, 0.0 }
 0x59d   :  { %v2707_v24 = vadd.f32 %v2701_v51, %v2692_v22  ;;  %v2709_v57 = vmax.f32 %v2705_v60, 0.0 }
 0x59e   :  { %v2710_v44 = vmax.f32 %v2706_v36, 0.0 }
 0x59f   :  { %v2711_v62 = vmax.f32 %v2707_v24, 0.0 }
 0x5a0   :  { %v2712_v21 = vpack.c.bf16 %v2710_v44, %v2708_v7 }
 0x5a1   :  { %v2713_v41 = vpack.c.bf16 %v2711_v62, %v2709_v57 }
 0x5a3   :  { %2778 = vmatprep.mubr.bf16.mxu1 %v2713_v41 }
 0x5a4   :  { %2779 = vmatmul.mubr.bf16.vlgmr.msra.gmra.mrb[12].mxu1 %v2712_v21 }
 0x5bb   :  { %v2869_v1 = vpop.xlane.xlu1 %2868 }
 0x5bc   :  { %v2870_v29 = vmax.f32 %v2869_v1, 1e-24 }
 0x5be   :  { %3289 = vrsqrt.f32 %v2870_v29 }
 0x5bf   :  { %v2962_v56 = vpop.xlane.xlu1 %2961 }
 0x5c0   :  { %v2963_v37 = vmax.f32 %v2962_v56, 1e-24 }
 0x5c2   :  { %3291 = vrsqrt.f32 %v2963_v37 }
 0x5c8   :  { %v3290_v48 = vpop.eup %3289 }
 0x5c9   :  { %v7113_v15 = vmul.f32 %v3290_v48, %v7092_v42  ;;  %v7116_v28 = vmul.f32 %v3290_v48, %v7088_v35 }
 0x5cb   :  { %v2889_v31 = vpack.c.bf16 %v7113_v15, %v7113_v15 }
 0x5cc   :  { %v3292_v10 = vpop.eup %3291 }
 0x5cd   :  { %2924 = vmatprep.mubr.bf16.mxu0 %v2889_v31  ;;  %v7121_v9 = vmul.f32 %v3292_v10, %v7100_v39  ;;  %v7124_v47 = vmul.f32 %v3292_v10, %v7096_v6 }
 0x5cf   :  { %v2982_v23 = vpack.c.bf16 %v7121_v9, %v7121_v9 }
 0x5d1   :  { %3017 = vmatprep.mubr.bf16.mxu1 %v2982_v23 }
 0x677   :  { %v2780_v42 = vpop.f32.mrb[12].mxu1 }
 0x678   :  { %v2789_v49 = vrot.slane %v2780_v42, 4  ;;  %v2782_v30 = vpop.f32.mrb[13].mxu1 }
 0x679   :  { %v2795_v35 = vrot.slane %v2782_v30, 4  ;;  %v2784_v20 = vpop.f32.mrb[14].mxu1 }
 0x67a   :  { %v2790_v59 = vadd.f32 %v2789_v49, %v2780_v42  ;;  %v2801_v55 = vrot.slane %v2784_v20, 4  ;;  %v2786_v0 = vpop.f32.mrb[15].mxu1 }
 0x67b   :  { %v2796_v50 = vadd.f32 %v2795_v35, %v2782_v30  ;;  %v2807_v38 = vrot.slane %v2786_v0, 4 }
 0x67c   :  { %v2791_v61 = vrot.slane %v2790_v59, 2  ;;  %v2802_v39 = vadd.f32 %v2801_v55, %v2784_v20 }
 0x67d   :  { %v2797_v14 = vrot.slane %v2796_v50, 2  ;;  %v2808_v4 = vadd.f32 %v2807_v38, %v2786_v0 }
 0x67e   :  { %v2792_v6 = vadd.f32 %v2791_v61, %v2790_v59  ;;  %v2803_v2 = vrot.slane %v2802_v39, 2 }
 0x67f   :  { %v2798_v16 = vadd.f32 %v2797_v14, %v2796_v50  ;;  %v2809_v26 = vrot.slane %v2808_v4, 2 }
 0x680   :  { %v2793_v18 = vrot.slane %v2792_v6, 1  ;;  %v2804_v46 = vadd.f32 %v2803_v2, %v2802_v39 }
 0x681   :  { %v2799_v33 = vrot.slane %v2798_v16, 1  ;;  %v2810_v5 = vadd.f32 %v2809_v26, %v2808_v4 }
 0x682   :  { %v2794_v34 = vadd.f32 %v2793_v18, %v2792_v6  ;;  %v2805_v32 = vrot.slane %v2804_v46, 1 }
 0x683   :  { %v2800_v53 = vadd.f32 %v2799_v33, %v2798_v16  ;;  %v2811_v43 = vrot.slane %v2810_v5, 1 }
 0x684   :  { %v2813_v17 = vmul.f32 0.125, %v2794_v34  ;;  %v2806_v40 = vadd.f32 %v2805_v32, %v2804_v46 }
 0x685   :  { %v2814_v25 = vmul.f32 0.125, %v2800_v53  ;;  %v2812_v58 = vadd.f32 %v2811_v43, %v2810_v5 }
 0x686   :  { %v2817_v54 = vsub.f32 %v2780_v42, %v2813_v17  ;;  %v2815_v3 = vmul.f32 0.125, %v2806_v40 }
 0x687   :  { %v2818_v45 = vsub.f32 %v2782_v30, %v2814_v25  ;;  %v2816_v12 = vmul.f32 0.125, %v2812_v58 }
 0x688   :  { %v2821_v51 = vmul.f32 %v2817_v54, %v2817_v54  ;;  %v2819_v8 = vsub.f32 %v2784_v20, %v2815_v3 }
 0x689   :  { %v2822_v52 = vmul.f32 %v2818_v45, %v2818_v45  ;;  %v2820_v13 = vsub.f32 %v2786_v0, %v2816_v12 }
 0x68a   :  { %v2825_v27 = vrot.slane %v2821_v51, 4  ;;  %v2823_v19 = vmul.f32 %v2819_v8, %v2819_v8 }
 0x68b   :  { %v2831_v63 = vrot.slane %v2822_v52, 4  ;;  %v2824_v11 = vmul.f32 %v2820_v13, %v2820_v13 }
 0x68c   :  { %v2826_v22 = vadd.f32 %v2825_v27, %v2821_v51  ;;  %v2837_v60 = vrot.slane %v2823_v19, 4 }
 0x68d   :  { %v2832_v36 = vadd.f32 %v2831_v63, %v2822_v52  ;;  %v2843_v24 = vrot.slane %v2824_v11, 4 }
 0x68e   :  { %v2827_v7 = vrot.slane %v2826_v22, 2  ;;  %v2838_v44 = vadd.f32 %v2837_v60, %v2823_v19 }
 0x68f   :  { %v2833_v57 = vrot.slane %v2832_v36, 2  ;;  %v2844_v62 = vadd.f32 %v2843_v24, %v2824_v11 }
 0x690   :  { %v2828_v21 = vadd.f32 %v2827_v7, %v2826_v22  ;;  %v2839_v41 = vrot.slane %v2838_v44, 2  ;;  %v2888_v7 = vpack.c.bf16 %v7116_v28, %v7116_v28 }
 0x691   :  { %v2834_v1 = vadd.f32 %v2833_v57, %v2832_v36  ;;  %v2845_v29 = vrot.slane %v2844_v62, 2 }
 0x692   :  { %v2829_v56 = vrot.slane %v2828_v21, 1  ;;  %v2840_v37 = vadd.f32 %v2839_v41, %v2838_v44 }
 0x693   :  { %v2835_v48 = vrot.slane %v2834_v1, 1  ;;  %v2846_v31 = vadd.f32 %v2845_v29, %v2844_v62 }
 0x694   :  { %v2830_v10 = vadd.f32 %v2829_v56, %v2828_v21  ;;  %v2841_v23 = vrot.slane %v2840_v37, 1 }
 0x695   :  { %v2836_v42 = vadd.f32 %v2835_v48, %v2834_v1  ;;  %v2847_v49 = vrot.slane %v2846_v31, 1 }
 0x696   :  { %v2849_v30 = vmul.f32 0.125, %v2830_v10  ;;  %v2842_v35 = vadd.f32 %v2841_v23, %v2840_v37 }
 0x697   :  { %v2850_v20 = vmul.f32 0.125, %v2836_v42  ;;  %v2848_v59 = vadd.f32 %v2847_v49, %v2846_v31 }
 0x698   :  { %v2853_v55 = vadd.f32 1e-05, %v2849_v30  ;;  %v2851_v0 = vmul.f32 0.125, %v2842_v35 }
 0x699   :  { %v2854_v50 = vadd.f32 1e-05, %v2850_v20  ;;  %v2852_v38 = vmul.f32 0.125, %v2848_v59 }
 0x69a   :  { %3293 = vrsqrt.f32 %v2853_v55  ;;  %v2855_v61 = vadd.f32 1e-05, %v2851_v0 }
 0x69b   :  { %3295 = vrsqrt.f32 %v2854_v50  ;;  %v2856_v39 = vadd.f32 1e-05, %v2852_v38 }
 0x69c   :  { %3297 = vrsqrt.f32 %v2855_v61 }
 0x69d   :  { %3299 = vrsqrt.f32 %v2856_v39 }
 0x6a4   :  { %v3294_v14 = vpop.eup %3293 }
 0x6a5   :  { %v3296_v4 = vpop.eup %3295  ;;  %v2861_v18 = vmul.f32 %v3294_v14, %v2817_v54 }
 0x6a6   :  { %v3298_v6 = vpop.eup %3297  ;;  %v2862_v46 = vmul.f32 %v3296_v4, %v2818_v45 }
 0x6a7   :  { %v3300_v2 = vpop.eup %3299  ;;  %v2863_v16 = vmul.f32 %v3298_v6, %v2819_v8  ;;  %v2967_v32 = vmul.f32 %v2861_v18, %v2861_v18 }
 0x6a8   :  { %v2864_v26 = vmul.f32 %v3300_v2, %v2820_v13  ;;  %v2968_v53 = vmul.f32 %v2862_v46, %v2862_v46 }
 0x6a9   :  { %v2874_v33 = vmul.f32 %v2863_v16, %v2863_v16 }
 0x6aa   :  { %v2875_v5 = vmul.f32 %v2864_v26, %v2864_v26  ;;  %v2969_v43 = vadd.f32 %v2968_v53, %v2967_v32 }
 0x6ac   :  { %v2876_v34 = vadd.f32 %v2875_v5, %v2874_v33 }
 0x6ae   :  { %2877 = vadd.xlane.f32.xlu0 %v2876_v34 }
 0x6b2   :  { %2970 = vadd.xlane.f32.xlu0 %v2969_v43 }
 0x73b   :  { %v2878_v17 = vpop.xlane.xlu0 %2877 }
 0x73c   :  { %v2879_v40 = vmax.f32 %v2878_v17, 1e-24 }
 0x73e   :  { %3301 = vrsqrt.f32 %v2879_v40 }
 0x73f   :  { %v2971_v25 = vpop.xlane.xlu0 %2970 }
 0x740   :  { %v2972_v58 = vmax.f32 %v2971_v25, 1e-24 }
 0x742   :  { %3303 = vrsqrt.f32 %v2972_v58 }
 0x748   :  { %v3302_v3 = vpop.eup %3301 }
 0x749   :  { %v2882_v12 = vmul.f32 %v3302_v3, %v2864_v26  ;;  %v2881_v51 = vmul.f32 %v3302_v3, %v2863_v16 }
 0x74b   :  { %v2891_v8 = vpack.c.bf16 %v2882_v12, %v2882_v12  ;;  %v2890_v54 = vpack.c.bf16 %v2881_v51, %v2881_v51  ;;  %v2883_v45 = vmul.f32 %v2881_v51, %v7116_v28  ;;  %v2884_v52 = vmul.f32 %v2882_v12, %v7113_v15 }
 0x74c   :  { %v3304_v13 = vpop.eup %3303  ;;  %v2981_v15 = vpack.c.bf16 %v7124_v47, %v7124_v47 }
 0x74d   :  { %2892 = vmatprep.subr.bf16.mxu0 %v2891_v8  ;;  %v2975_v27 = vmul.f32 %v3304_v13, %v2862_v46  ;;  %v2974_v19 = vmul.f32 %v3304_v13, %v2861_v18  ;;  %v2885_v63 = vadd.f32 %v2884_v52, %v2883_v45 }
 0x74e   :  { %2893 = vmatpush1.bf16.xpose.msra.mxu0 %v2890_v54 }
 0x74f   :  { %v2984_v11 = vpack.c.bf16 %v2975_v27, %v2975_v27  ;;  %v2983_v22 = vpack.c.bf16 %v2974_v19, %v2974_v19  ;;  %v2976_v60 = vmul.f32 %v2974_v19, %v7124_v47  ;;  %v2977_v36 = vmul.f32 %v2975_v27, %v7121_v9 }
 0x751   :  { %2985 = vmatprep.subr.bf16.mxu1 %v2984_v11  ;;  %v2978_v24 = vadd.f32 %v2977_v36, %v2976_v60 }
 0x752   :  { %2986 = vmatpush1.bf16.xpose.msra.mxu1 %v2983_v22 }
 0x755   :  { %2925 = vmatmul.mubr.bf16.vlgmr.msra.gmra.mrb[16].mxu0 %v2888_v7 }
 0x759   :  { %3018 = vmatmul.mubr.bf16.vlgmr.msra.gmra.mrb[16].mxu1 %v2981_v15 }
 0x828   :  { %v2926_v44 = vpop.f32.mrb[16].mxu0 }
 0x829   :  { %v2928_v57 = vpop.f32.mrb[17].mxu0  ;;  %v2933_v62 = vsel %vm2932_vm1, %v2926_v44, -inf }
 0x82a   :  { %2934 = vmax.xlane.f32.xlu0 %v2933_v62  ;;  %v2929_v21 = vpop.f32.mrb[18].mxu0 }
 0x82b   :  { %v2930_v41 = vpop.f32.mrb[19].mxu0 }
 0x82c   :  { %v3019_v9 = vpop.f32.mrb[16].mxu1 }
 0x82d   :  { %v3021_v1 = vpop.f32.mrb[17].mxu1  ;;  %v3025_v29 = vsel %vm2932_vm1, %v3019_v9, -inf }
 0x82e   :  { %3026 = vmax.xlane.f32.xlu1 %v3025_v29  ;;  %v3022_v56 = vpop.f32.mrb[18].mxu1 }
 0x82f   :  { %v3023_v28 = vpop.f32.mrb[19].mxu1 }
 0x8b7   :  { %v2935_v37 = vpop.xlane.xlu0 %2934 }
 0x8b8   :  { %v2936_v48 = vsub.f32 %v2926_v44, %v2935_v37 }
 0x8ba   :  { %v2937_v31 = vmul.f32 1.442695, %v2936_v48 }
 0x8bb   :  { %v3027_v47 = vpop.xlane.xlu1 %3026 }
 0x8bc   :  { %3305 = vpow2.f32 %v2937_v31  ;;  %v3028_v10 = vsub.f32 %v3019_v9, %v3027_v47 }
 0x8be   :  { %v3029_v23 = vmul.f32 1.442695, %v3028_v10 }
 0x8c0   :  { %3307 = vpow2.f32 %v3029_v23 }
 0x8c6   :  { %v3306_v42 = vpop.eup %3305 }
 0x8c7   :  { %v2939_v49 = vsel %vm2932_vm1, %v3306_v42, 0.0 }
 0x8c8   :  { %2940 = vadd.xlane.f32.xlu0 %v2939_v49 }
 0x8ca   :  { %v3308_v30 = vpop.eup %3307 }
 0x8cb   :  { %v3031_v35 = vsel %vm2932_vm1, %v3308_v30, 0.0 }
 0x8cc   :  { %3032 = vadd.xlane.f32.xlu1 %v3031_v35  ;;  %2886 = vadd.xlane.f32.xlu0 %v2885_v63 }
 0x8d0   :  { %2979 = vadd.xlane.f32.xlu1 %v2978_v24 }
 0x955   :  { %v2941_v20 = vpop.xlane.xlu0 %2940 }
 0x956   :  { %3309 = vlog2.f32 %v2941_v20 }
 0x959   :  { %v3033_v59 = vpop.xlane.xlu1 %3032  ;;  %v2887_v61 = vpop.xlane.xlu0 %2886 }
 0x95a   :  { %3311 = vlog2.f32 %v3033_v59 }
 0x95d   :  { %v2980_v2 = vpop.xlane.xlu1 %2979 }
 0x960   :  { %v3310_v55 = vpop.eup %3309 }
 0x961   :  { %v2943_v0 = vmul.f32 0.6931472, %v3310_v55 }
 0x963   :  { %v2944_v50 = vadd.f32 %v2943_v0, %v2935_v37 }
 0x964   :  { %v3312_v38 = vpop.eup %3311 }
 0x965   :  { %v3035_v39 = vmul.f32 0.6931472, %v3312_v38  ;;  %v2945_v14 = vsub.f32 %v2944_v50, %v2887_v61 }
 0x967   :  { %v3036_v4 = vadd.f32 %v3035_v39, %v3027_v47  ;;  %v2947_v6 = vsel %vm2946_vm2, %v2945_v14, 0.0 }
 0x968   :  { %2948 = vadd.xlane.f32.xlu0 %v2947_v6 }
 0x969   :  { %v3037_v16 = vsub.f32 %v3036_v4, %v2980_v2 }
 0x96b   :  { %v3038_v26 = vsel %vm2946_vm2, %v3037_v16, 0.0 }
 0x96c   :  { %3039 = vadd.xlane.f32.xlu1 %v3038_v26 }
 0x9f5   :  { %v2949_v18 = vpop.xlane.xlu0 %2948 }
 0x9f6   :  { %v2950_v46 = vrot.slane %v2949_v18, 4 }
 0x9f8   :  { %v2951_v33 = vadd.f32 %v2950_v46, %v2949_v18 }
 0x9f9   :  { %v3040_v5 = vpop.xlane.xlu1 %3039 }
 0x9fa   :  { %v2952_v34 = vrot.slane %v2951_v33, 2  ;;  %v3041_v32 = vrot.slane %v3040_v5, 4 }
 0x9fc   :  { %v3042_v53 = vadd.f32 %v3041_v32, %v3040_v5  ;;  %v2953_v43 = vadd.f32 %v2952_v34, %v2951_v33 }
 0x9fe   :  { %v3043_v17 = vrot.slane %v3042_v53, 2  ;;  %v2954_v40 = vrot.slane %v2953_v43, 1 }
 0xa00   :  { %v3044_v25 = vadd.f32 %v3043_v17, %v3042_v53  ;;  %v2955_v58 = vadd.f32 %v2954_v40, %v2953_v43 }
 0xa02   :  { %3153 = vpush %v2955_v58  ;;  %v3045_v3 = vrot.slane %v3044_v25, 1 }
 0xa04   :  { %v3046_v12 = vadd.f32 %v3045_v3, %v3044_v25 }
 0xa06   :  { %3155 = vpush %v3046_v12 }
 0xa33   :  { %s3154_s21 = spop %3153 }
 0xa34   :  { %v2957_v51 = vstv %s3154_s21 }
 0xa37   :  { %s3156_s14 = spop %3155 }
 0xa38   :  { %v3048_v8 = vstv %s3156_s14 }
 0xa39   :  { %v3049_v54 = vadd.f32 %v3048_v8, %v2957_v51 }
 0xa3b   :  { %v3050_v45 = vmul.f32 0.25, %v3049_v54 }
 0xa3d   :  { %3052 = vst.msk [vmem:[#allocation3] sm:$0x1] %vm3051_vm3, %v3050_v45 }
 0xa3e   :  { %3326 = shalt.err (!%p3323_p4)
}
 0xa3f   :  { %s7454_s5 = sld [smem:[#allocation45_spill]] }
 0xa45   :  { %s3327_s11 = scalar_lea.hbm %s7454_s5, 16 }
 0xa46   :  { %p3328_p5 = scmp.ne.s32.totalorder %s7454_s5, %s3327_s11  ;;  %p3331_p6 = scmp.lt.u32.totalorder %s3327_s11, %s7454_s5 }
 0xa48   :  { %p3333_p7 = pnand %p3331_p6, %p3328_p5 }
 0xa4a   :  { %3336 = shalt.err (!%p3333_p7)
}
 0xa4b   :  { %3062 = dma.vmem_to_hbm [thread:$0]  %s3060_s1, 16, %s7454_s5, [#allocation4]  }
 0xa4c   :  { %3337 = dma.done.wait [#allocation4], 16  }
 0xa4d   :  { %3338 = vsyncadd [#allocation4], 4294967280 }
 0xa4e   :  { %3086 = vsyncpa [#allocation4], 1 }

</bundles_post_ra>
